<compile_context>
chip_gen: v5e
topology: v5e:2x2
jax: 0.10.0
libtpu: 0.0.40
codegen_flags: <defaults>
</compile_context>

<pallas_src>
import functools

import jax
import jax.numpy as jnp
from jax.experimental import pallas as pl
from jax.experimental.pallas import tpu as pltpu

EPS = 1e-5
MATMUL_DTYPE = jnp.bfloat16   # use jnp.float32 for exact-f32 MXU matmuls


def _mm(a, b):
    """MXU matmul with f32 accumulation; operands cast to MATMUL_DTYPE."""
    return jnp.dot(a.astype(MATMUL_DTYPE), b.astype(MATMUL_DTYPE),
                   preferred_element_type=jnp.float32)


def _layer_norm_flat(x, gamma, beta, sc, denom):
    """LayerNorm over (C, V) per frame on a lane-dense (C, L*V) slab.

    Single fused statistics matmul: [x ; x*x] (2C, LV) against
    sc = kron(I_L, 1_{VxV}) (bf16; 0/1 so exact) gives the per-frame sums of x
    and x^2 broadcast back over each frame's V lanes; a sublane reduce then
    yields mean and E[x^2]; var = E[x^2] - mean^2 (clamped >= 0 for numerical
    safety).  Statistics stay f32 after the matmul; rsqrt is f32 (v5e has no
    bf16 VPU/EUP).
    """
    c = x.shape[0]
    stacked = jnp.concatenate([x, x * x], axis=0).astype(MATMUL_DTYPE)  # (2C, LV)
    sums = jnp.dot(stacked, sc, preferred_element_type=jnp.float32)     # (2C, LV)
    mean = jnp.sum(sums[:c], axis=0, keepdims=True) / denom             # (1, LV)
    ex2 = jnp.sum(sums[c:], axis=0, keepdims=True) / denom              # (1, LV)
    var = jnp.maximum(ex2 - mean * mean, 0.0)
    return (x - mean) * jax.lax.rsqrt(var + EPS) * gamma + beta


def _model_kernel(x_ref, ing_ref, inb_ref, fiw_ref, fib_ref,
                  lw_ref, lb_ref, g_ref, lg_ref, lbeta_ref,
                  sc_ref, pvb_ref, fow_ref, fob_ref, o_ref,
                  *, num_layers, num_partitions, out_channels, nb, lv,
                  in_denom, layer_denom):
    C, P, LV = out_channels, num_partitions, lv
    sc = sc_ref[...]                                     # (LV, LV) bf16 (0/1)

    # ---- norm_in (per sample) + fcn_in (one matmul over nb*LV dense lanes) --
    xin = x_ref[0]                                       # (Cin, nb*LV) f32
    pieces = [_layer_norm_flat(xin[:, s * LV:(s + 1) * LV],
                               ing_ref[...], inb_ref[...], sc, in_denom)
              for s in range(nb)]
    x = pieces[0] if nb == 1 else jnp.concatenate(pieces, axis=1)
    x = _mm(fiw_ref[...], x) + fib_ref[...]              # (C, nb*LV)

    # ---- st-gcn stack (statically unrolled, fully VMEM-resident) ------------
    # TODO(synk): at >~4 layers switch to lax.fori_loop over the stacked weight
    # refs and/or add a layer grid axis to stream G per layer (v7x VMEM).
    for i in range(num_layers):
        res = x                                          # identity residual
        xc = _mm(lw_ref[i], x) + lb_ref[i]               # 1x1 conv -> (P*C, nb*LV)
        g_i = g_ref[i]                                   # (P*LV, LV) bf16
        ys = []
        for s in range(nb):
            xcs = xc[:, s * LV:(s + 1) * LV]             # (P*C, LV)
            # partition channel blocks side-by-side along K -> one wide-K push
            wide = jnp.concatenate(
                [xcs[p * C:(p + 1) * C, :] for p in range(P)], axis=1)  # (C, P*LV)
            agg = jnp.dot(wide.astype(MATMUL_DTYPE), g_i,
                          preferred_element_type=jnp.float32)           # (C, LV)
            ys.append(_layer_norm_flat(agg, lg_ref[i], lbeta_ref[i], sc,
                                       layer_denom))
        y = ys[0] if nb == 1 else jnp.concatenate(ys, axis=1)           # (C, nb*LV)
        x = jnp.maximum(jnp.maximum(y, 0.0) + res, 0.0)  # bn_relu, +res, do=ReLU

    # ---- head: fcn_out first (lane-dense result), then AvgPool2d((1, V)) ----
    head = _mm(fow_ref[...], x)                          # (K, nb*LV)
    pooled = jnp.dot(head.astype(MATMUL_DTYPE), pvb_ref[...],
                     preferred_element_type=jnp.float32) # (K, nb*L)
    o_ref[0] = pooled + fob_ref[...]


# ---------------------------------------------------------------------------
# Parameter folding (run once, outside jit)
# ---------------------------------------------------------------------------
def make_toeplitz(segment, kernel_size, stride):
    T = jnp.zeros((segment, segment), jnp.float32)
    for i in range(kernel_size // stride):
        s = stride * i
        eye = jnp.eye(segment - s, dtype=jnp.float32)
        # F.pad(eye, (s, 0, 0, s)): left-pad columns by s, bottom-pad rows by s
        T = T + jnp.pad(eye, ((0, s), (s, 0)))
    return T


def pack_params(params):
    """Fold graph/temporal/affine operators into the lane-dense fused forms
    consumed by the single Pallas kernel."""
    A = params["A"]                                  # (P, V, V)
    P, V, _ = A.shape
    layers = params["layers"]
    L = layers[0]["toeplitz"].shape[0]
    C = layers[0]["ln_g"].shape[0]

    # TODO(synk): the stacked layout assumes a homogeneous st-gcn stack (same
    # C and P for every layer), which holds for this configuration.
    for lp in layers:
        assert lp["conv_w"].shape == (C * P, C) and lp["ln_g"].shape[0] == C

    def tile_affine(p_c1v):                          # (C,1,V) -> (C, L*V)
        return jnp.tile(p_c1v[:, 0, :], (1, L))

    lw, lb, G, lg, lbeta = [], [], [], [], []
    for lp in layers:
        AE = A * lp["edge_importance"]               # (P, V, V)
        T = lp["toeplitz"]                           # (L, L)
        # kron(T, AE[p]) applied on the right of a (C, L*V) slab == graph
        # matmul followed by the Toeplitz temporal matmul + partition sum.
        # Partitions are stacked along K so the whole aggregation per sample
        # is ONE (C, P*LV)@(P*LV, LV) MXU push.
        G.append(jnp.concatenate([jnp.kron(T, AE[p]) for p in range(P)], axis=0))
        lw.append(lp["conv_w"])
        lb.append(lp["conv_b"].reshape(C * P, 1))
        lg.append(tile_affine(lp["ln_g"]))
        lbeta.append(tile_affine(lp["ln_b"]))

    eye_L = jnp.eye(L, dtype=jnp.float32)
    return {
        "ng": tile_affine(params["norm_in_g"]),
        "nb": tile_affine(params["norm_in_b"]),
        "fiw": params["fcn_in_w"].astype(MATMUL_DTYPE),
        "fib": params["fcn_in_b"].reshape(-1, 1),
        "lw": jnp.stack(lw).astype(MATMUL_DTYPE),          # (nl, P*C, C)
        "lb": jnp.stack(lb),                               # (nl, P*C, 1)
        "G": jnp.stack(G).astype(MATMUL_DTYPE),            # (nl, P*LV, LV)
        "lg": jnp.stack(lg),                               # (nl, C, LV)
        "lbeta": jnp.stack(lbeta),                         # (nl, C, LV)
        # sc = kron(I_L, 1_{VxV}) is 0/1 -> exact in bf16
        "sc": jnp.kron(eye_L, jnp.ones((V, V), jnp.float32)).astype(MATMUL_DTYPE),
        "pv": jnp.kron(eye_L, jnp.full((V, 1), 1.0 / V, jnp.float32)),  # (LV, L)
        "fow": params["fcn_out_w"].astype(MATMUL_DTYPE),
        "fob": params["fcn_out_b"].reshape(-1, 1),
    }


def _pick_batch_block(N):
    """Largest divisor of N that still leaves >= 2 grid steps (v7x: 2 TCs)."""
    target = min(max(1, N // 2), 8)
    nb = 1
    for cand in range(1, target + 1):
        if N % cand == 0:
            nb = cand
    return nb


# ---------------------------------------------------------------------------
# Forward: one fused pallas_call for the entire model
# ---------------------------------------------------------------------------
def rtstgcn_forward(x, p, batch_block=None):
    """(N, C_in, L, V) -> (N, num_classes, L)."""
    N, C_in, L, V = x.shape
    LV = L * V
    num_layers, PC, _ = p["lw"].shape
    P = p["G"].shape[1] // LV
    C = PC // P
    K = p["fow"].shape[0]

    nb = batch_block if batch_block is not None else _pick_batch_block(N)
    assert N % nb == 0
    nblk = N // nb

    # lane-dense, batch-blocked input: (nblk, C_in, nb*LV), lane = s*LV + l*V + v
    xb = (x.reshape(nblk, nb, C_in, LV)
           .transpose(0, 2, 1, 3)
           .reshape(nblk, C_in, nb * LV))

    # block-diagonal pooling operator for nb samples: (nb*LV, nb*L)
    pvb = jnp.kron(jnp.eye(nb, dtype=jnp.float32), p["pv"]).astype(MATMUL_DTYPE)

    kern = functools.partial(
        _model_kernel,
        num_layers=num_layers, num_partitions=P, out_channels=C,
        nb=nb, lv=LV,
        in_denom=float(C_in * V), layer_denom=float(C * V))

    def full(arr):   # whole-array block, resident across all grid steps
        return pl.BlockSpec(arr.shape, lambda *_: (0,) * arr.ndim)

    weights = (p["ng"], p["nb"], p["fiw"], p["fib"], p["lw"], p["lb"],
               p["G"], p["lg"], p["lbeta"], p["sc"], pvb,
               p["fow"], p["fob"])

    out = pl.pallas_call(
        kern,
        out_shape=jax.ShapeDtypeStruct((nblk, K, nb * L), jnp.float32),
        grid_spec=pltpu.PrefetchScalarGridSpec(
            num_scalar_prefetch=0,
            grid=(nblk,),
            in_specs=[pl.BlockSpec((1, C_in, nb * LV), lambda n: (n, 0, 0))]
                     + [full(w) for w in weights],
            out_specs=pl.BlockSpec((1, K, nb * L), lambda n: (n, 0, 0)),
        ),
        compiler_params=pltpu.CompilerParams(
            dimension_semantics=("parallel",)),
    )(xb, *weights)

    # (nblk, K, nb*L) lane-dense slab -> (N, K, L) (tiny XLA layout plumbing)
    return (out.reshape(nblk, K, nb, L)
               .transpose(0, 2, 1, 3)
               .reshape(N, K, L))


# ---------------------------------------------------------------------------
if __name__ == "__main__":
    key = jax.random.PRNGKey(0)
    N, in_feat, L, V = 8, 4, 8, 16        # batch, input feats, frames, joints
    P = 3                                  # graph partitions
    num_layers = 2
    in_ch = [32, 32]
    out_ch = [32, 32]
    kernel = 3
    stride = [1, 1]
    num_classes = 10

    ks = jax.random.split(key, 8)
    x = jax.random.normal(ks[0], (N, in_feat, L, V), dtype=jnp.float32)

    # deterministic synthetic adjacency (stands in for Graph(...).A)
    A = jax.random.uniform(ks[1], (P, V, V), dtype=jnp.float32) * 0.2

    params = {
        "A": A,
        "norm_in_g": jnp.ones((in_feat, 1, V), jnp.float32),
        "norm_in_b": jnp.zeros((in_feat, 1, V), jnp.float32),
        "fcn_in_w": 0.1 * jax.random.normal(ks[2], (in_ch[0], in_feat), jnp.float32),
        "fcn_in_b": jnp.zeros((in_ch[0],), jnp.float32),
        "fcn_out_w": 0.1 * jax.random.normal(ks[3], (num_classes, out_ch[-1]), jnp.float32),
        "fcn_out_b": jnp.zeros((num_classes,), jnp.float32),
        "layers": [],
    }
    for i in range(num_layers):
        params["layers"].append({
            "conv_w": 0.1 * jax.random.normal(ks[4 + i], (out_ch[i] * P, in_ch[i]), jnp.float32),
            "conv_b": jnp.zeros((out_ch[i] * P,), jnp.float32),
            "edge_importance": jnp.ones((P, V, V), jnp.float32),
            "ln_g": jnp.ones((out_ch[i], 1, V), jnp.float32),
            "ln_b": jnp.zeros((out_ch[i], 1, V), jnp.float32),
            "toeplitz": make_toeplitz(L, kernel, stride[i]),
        })

    packed = pack_params(params)           # one-time operator folding
    fwd = jax.jit(rtstgcn_forward)
    out = jax.block_until_ready(fwd(x, packed))

    assert out.shape == (N, num_classes, L), out.shape
    assert bool(jnp.all(jnp.isfinite(out)))
    print("KERNEL_OK")
</pallas_src>

<mosaic_0001>
module attributes {stable_mosaic.version = 11 : i64} {
  func.func @_model_kernel(%arg0: i32, %arg1: memref<1x4x512xf32, #tpu.memory_space<vmem>>, %arg2: memref<4x128xf32, #tpu.memory_space<vmem>>, %arg3: memref<4x128xf32, #tpu.memory_space<vmem>>, %arg4: memref<32x4xbf16, #tpu.memory_space<vmem>>, %arg5: memref<32x1xf32, #tpu.memory_space<vmem>>, %arg6: memref<2x96x32xbf16, #tpu.memory_space<vmem>>, %arg7: memref<2x96x1xf32, #tpu.memory_space<vmem>>, %arg8: memref<2x384x128xbf16, #tpu.memory_space<vmem>>, %arg9: memref<2x32x128xf32, #tpu.memory_space<vmem>>, %arg10: memref<2x32x128xf32, #tpu.memory_space<vmem>>, %arg11: memref<128x128xbf16, #tpu.memory_space<vmem>>, %arg12: memref<512x32xbf16, #tpu.memory_space<vmem>>, %arg13: memref<10x32xbf16, #tpu.memory_space<vmem>>, %arg14: memref<10x1xf32, #tpu.memory_space<vmem>>, %arg15: memref<1x10x32xf32, #tpu.memory_space<vmem>>) attributes {dimension_semantics = [#tpu.dimension_semantics<parallel>], iteration_bounds = array<i64: 2>, scalar_prefetch = 0 : i64, scratch_operands = 0 : i64, tpu.core_type = #tpu.core_type<tc>, window_params = [{transform_indices = @transform_0, window_bounds = array<i64: 1, 4, 512>}, {pipeline_mode = #tpu.pipeline_mode<synchronous>, transform_indices = @transform_1, window_bounds = array<i64: 4, 128>}, {pipeline_mode = #tpu.pipeline_mode<synchronous>, transform_indices = @transform_2, window_bounds = array<i64: 4, 128>}, {pipeline_mode = #tpu.pipeline_mode<synchronous>, transform_indices = @transform_3, window_bounds = array<i64: 32, 4>}, {pipeline_mode = #tpu.pipeline_mode<synchronous>, transform_indices = @transform_4, window_bounds = array<i64: 32, 1>}, {pipeline_mode = #tpu.pipeline_mode<synchronous>, transform_indices = @transform_5, window_bounds = array<i64: 2, 96, 32>}, {pipeline_mode = #tpu.pipeline_mode<synchronous>, transform_indices = @transform_6, window_bounds = array<i64: 2, 96, 1>}, {pipeline_mode = #tpu.pipeline_mode<synchronous>, transform_indices = @transform_7, window_bounds = array<i64: 2, 384, 128>}, {pipeline_mode = #tpu.pipeline_mode<synchronous>, transform_indices = @transform_8, window_bounds = array<i64: 2, 32, 128>}, {pipeline_mode = #tpu.pipeline_mode<synchronous>, transform_indices = @transform_9, window_bounds = array<i64: 2, 32, 128>}, {pipeline_mode = #tpu.pipeline_mode<synchronous>, transform_indices = @transform_10, window_bounds = array<i64: 128, 128>}, {pipeline_mode = #tpu.pipeline_mode<synchronous>, transform_indices = @transform_11, window_bounds = array<i64: 512, 32>}, {pipeline_mode = #tpu.pipeline_mode<synchronous>, transform_indices = @transform_12, window_bounds = array<i64: 10, 32>}, {pipeline_mode = #tpu.pipeline_mode<synchronous>, transform_indices = @transform_13, window_bounds = array<i64: 10, 1>}, {transform_indices = @transform_14, window_bounds = array<i64: 1, 10, 32>}]} {
    %c0 = arith.constant 0 : index
    %c0_0 = arith.constant 0 : index
    %0 = vector.load %arg11[%c0, %c0_0] : memref<128x128xbf16, #tpu.memory_space<vmem>>, vector<128x128xbf16>
    %c0_1 = arith.constant 0 : index
    %c0_2 = arith.constant 0 : index
    %c0_3 = arith.constant 0 : index
    %1 = vector.load %arg1[%c0_1, %c0_2, %c0_3] : memref<1x4x512xf32, #tpu.memory_space<vmem>>, vector<1x4x512xf32>
    %2 = vector.shape_cast %1 : vector<1x4x512xf32> to vector<4x512xf32>
    %3 = vector.extract_strided_slice %2 {offsets = [0, 0], sizes = [4, 128], strides = [1, 1]} : vector<4x512xf32> to vector<4x128xf32>
    %c0_4 = arith.constant 0 : index
    %c0_5 = arith.constant 0 : index
    %4 = vector.load %arg2[%c0_4, %c0_5] : memref<4x128xf32, #tpu.memory_space<vmem>>, vector<4x128xf32>
    %c0_6 = arith.constant 0 : index
    %c0_7 = arith.constant 0 : index
    %5 = vector.load %arg3[%c0_6, %c0_7] : memref<4x128xf32, #tpu.memory_space<vmem>>, vector<4x128xf32>
    %6 = arith.mulf %3, %3 : vector<4x128xf32>
    %7 = tpu.concatenate %3, %6 in 0 : vector<4x128xf32>, vector<4x128xf32> -> vector<8x128xf32>
    %8 = arith.truncf %7 : vector<8x128xf32> to vector<8x128xbf16>
    %cst = arith.constant dense<0.000000e+00> : vector<8x128xf32>
    %9 = tpu.matmul %8, %0, %cst {dimension_numbers = #tpu.dot_dimension_numbers<[1], [0], [0], [1], [0, 0, 1, 1], [], []>} : vector<8x128xbf16>, vector<128x128xbf16>, vector<8x128xf32> -> vector<8x128xf32>
    %10 = vector.extract_strided_slice %9 {offsets = [0, 0], sizes = [4, 128], strides = [1, 1]} : vector<8x128xf32> to vector<4x128xf32>
    %cst_8 = arith.constant dense<0.000000e+00> : vector<128xf32>
    %11 = vector.multi_reduction <add>, %10, %cst_8 [0] : vector<4x128xf32> to vector<128xf32>
    %12 = vector.shape_cast %11 : vector<128xf32> to vector<1x128xf32>
    %cst_9 = arith.constant 6.400000e+01 : f32
    %13 = vector.broadcast %cst_9 : f32 to vector<1x128xf32>
    %14 = arith.divf %12, %13 : vector<1x128xf32>
    %15 = vector.extract_strided_slice %9 {offsets = [4, 0], sizes = [4, 128], strides = [1, 1]} : vector<8x128xf32> to vector<4x128xf32>
    %cst_10 = arith.constant dense<0.000000e+00> : vector<128xf32>
    %16 = vector.multi_reduction <add>, %15, %cst_10 [0] : vector<4x128xf32> to vector<128xf32>
    %17 = vector.shape_cast %16 : vector<128xf32> to vector<1x128xf32>
    %cst_11 = arith.constant 6.400000e+01 : f32
    %18 = vector.broadcast %cst_11 : f32 to vector<1x128xf32>
    %19 = arith.divf %17, %18 : vector<1x128xf32>
    %20 = arith.mulf %14, %14 : vector<1x128xf32>
    %21 = arith.subf %19, %20 : vector<1x128xf32>
    %cst_12 = arith.constant 0.000000e+00 : f32
    %22 = vector.broadcast %cst_12 : f32 to vector<1x128xf32>
    %23 = arith.maximumf %21, %22 : vector<1x128xf32>
    %24 = vector.broadcast %14 : vector<1x128xf32> to vector<4x128xf32>
    %25 = arith.subf %3, %24 : vector<4x128xf32>
    %cst_13 = arith.constant 9.99999974E-6 : f32
    %26 = vector.broadcast %cst_13 : f32 to vector<1x128xf32>
    %27 = arith.addf %23, %26 : vector<1x128xf32>
    %28 = math.rsqrt %27 : vector<1x128xf32>
    %29 = vector.broadcast %28 : vector<1x128xf32> to vector<4x128xf32>
    %30 = arith.mulf %25, %29 : vector<4x128xf32>
    %31 = arith.mulf %30, %4 : vector<4x128xf32>
    %32 = arith.addf %31, %5 : vector<4x128xf32>
    %33 = vector.extract_strided_slice %2 {offsets = [0, 128], sizes = [4, 128], strides = [1, 1]} : vector<4x512xf32> to vector<4x128xf32>
    %c0_14 = arith.constant 0 : index
    %c0_15 = arith.constant 0 : index
    %34 = vector.load %arg2[%c0_14, %c0_15] : memref<4x128xf32, #tpu.memory_space<vmem>>, vector<4x128xf32>
    %c0_16 = arith.constant 0 : index
    %c0_17 = arith.constant 0 : index
    %35 = vector.load %arg3[%c0_16, %c0_17] : memref<4x128xf32, #tpu.memory_space<vmem>>, vector<4x128xf32>
    %36 = arith.mulf %33, %33 : vector<4x128xf32>
    %37 = tpu.concatenate %33, %36 in 0 : vector<4x128xf32>, vector<4x128xf32> -> vector<8x128xf32>
    %38 = arith.truncf %37 : vector<8x128xf32> to vector<8x128xbf16>
    %cst_18 = arith.constant dense<0.000000e+00> : vector<8x128xf32>
    %39 = tpu.matmul %38, %0, %cst_18 {dimension_numbers = #tpu.dot_dimension_numbers<[1], [0], [0], [1], [0, 0, 1, 1], [], []>} : vector<8x128xbf16>, vector<128x128xbf16>, vector<8x128xf32> -> vector<8x128xf32>
    %40 = vector.extract_strided_slice %39 {offsets = [0, 0], sizes = [4, 128], strides = [1, 1]} : vector<8x128xf32> to vector<4x128xf32>
    %cst_19 = arith.constant dense<0.000000e+00> : vector<128xf32>
    %41 = vector.multi_reduction <add>, %40, %cst_19 [0] : vector<4x128xf32> to vector<128xf32>
    %42 = vector.shape_cast %41 : vector<128xf32> to vector<1x128xf32>
    %cst_20 = arith.constant 6.400000e+01 : f32
    %43 = vector.broadcast %cst_20 : f32 to vector<1x128xf32>
    %44 = arith.divf %42, %43 : vector<1x128xf32>
    %45 = vector.extract_strided_slice %39 {offsets = [4, 0], sizes = [4, 128], strides = [1, 1]} : vector<8x128xf32> to vector<4x128xf32>
    %cst_21 = arith.constant dense<0.000000e+00> : vector<128xf32>
    %46 = vector.multi_reduction <add>, %45, %cst_21 [0] : vector<4x128xf32> to vector<128xf32>
    %47 = vector.shape_cast %46 : vector<128xf32> to vector<1x128xf32>
    %cst_22 = arith.constant 6.400000e+01 : f32
    %48 = vector.broadcast %cst_22 : f32 to vector<1x128xf32>
    %49 = arith.divf %47, %48 : vector<1x128xf32>
    %50 = arith.mulf %44, %44 : vector<1x128xf32>
    %51 = arith.subf %49, %50 : vector<1x128xf32>
    %cst_23 = arith.constant 0.000000e+00 : f32
    %52 = vector.broadcast %cst_23 : f32 to vector<1x128xf32>
    %53 = arith.maximumf %51, %52 : vector<1x128xf32>
    %54 = vector.broadcast %44 : vector<1x128xf32> to vector<4x128xf32>
    %55 = arith.subf %33, %54 : vector<4x128xf32>
    %cst_24 = arith.constant 9.99999974E-6 : f32
    %56 = vector.broadcast %cst_24 : f32 to vector<1x128xf32>
    %57 = arith.addf %53, %56 : vector<1x128xf32>
    %58 = math.rsqrt %57 : vector<1x128xf32>
    %59 = vector.broadcast %58 : vector<1x128xf32> to vector<4x128xf32>
    %60 = arith.mulf %55, %59 : vector<4x128xf32>
    %61 = arith.mulf %60, %34 : vector<4x128xf32>
    %62 = arith.addf %61, %35 : vector<4x128xf32>
    %63 = vector.extract_strided_slice %2 {offsets = [0, 256], sizes = [4, 128], strides = [1, 1]} : vector<4x512xf32> to vector<4x128xf32>
    %c0_25 = arith.constant 0 : index
    %c0_26 = arith.constant 0 : index
    %64 = vector.load %arg2[%c0_25, %c0_26] : memref<4x128xf32, #tpu.memory_space<vmem>>, vector<4x128xf32>
    %c0_27 = arith.constant 0 : index
    %c0_28 = arith.constant 0 : index
    %65 = vector.load %arg3[%c0_27, %c0_28] : memref<4x128xf32, #tpu.memory_space<vmem>>, vector<4x128xf32>
    %66 = arith.mulf %63, %63 : vector<4x128xf32>
    %67 = tpu.concatenate %63, %66 in 0 : vector<4x128xf32>, vector<4x128xf32> -> vector<8x128xf32>
    %68 = arith.truncf %67 : vector<8x128xf32> to vector<8x128xbf16>
    %cst_29 = arith.constant dense<0.000000e+00> : vector<8x128xf32>
    %69 = tpu.matmul %68, %0, %cst_29 {dimension_numbers = #tpu.dot_dimension_numbers<[1], [0], [0], [1], [0, 0, 1, 1], [], []>} : vector<8x128xbf16>, vector<128x128xbf16>, vector<8x128xf32> -> vector<8x128xf32>
    %70 = vector.extract_strided_slice %69 {offsets = [0, 0], sizes = [4, 128], strides = [1, 1]} : vector<8x128xf32> to vector<4x128xf32>
    %cst_30 = arith.constant dense<0.000000e+00> : vector<128xf32>
    %71 = vector.multi_reduction <add>, %70, %cst_30 [0] : vector<4x128xf32> to vector<128xf32>
    %72 = vector.shape_cast %71 : vector<128xf32> to vector<1x128xf32>
    %cst_31 = arith.constant 6.400000e+01 : f32
    %73 = vector.broadcast %cst_31 : f32 to vector<1x128xf32>
    %74 = arith.divf %72, %73 : vector<1x128xf32>
    %75 = vector.extract_strided_slice %69 {offsets = [4, 0], sizes = [4, 128], strides = [1, 1]} : vector<8x128xf32> to vector<4x128xf32>
    %cst_32 = arith.constant dense<0.000000e+00> : vector<128xf32>
    %76 = vector.multi_reduction <add>, %75, %cst_32 [0] : vector<4x128xf32> to vector<128xf32>
    %77 = vector.shape_cast %76 : vector<128xf32> to vector<1x128xf32>
    %cst_33 = arith.constant 6.400000e+01 : f32
    %78 = vector.broadcast %cst_33 : f32 to vector<1x128xf32>
    %79 = arith.divf %77, %78 : vector<1x128xf32>
    %80 = arith.mulf %74, %74 : vector<1x128xf32>
    %81 = arith.subf %79, %80 : vector<1x128xf32>
    %cst_34 = arith.constant 0.000000e+00 : f32
    %82 = vector.broadcast %cst_34 : f32 to vector<1x128xf32>
    %83 = arith.maximumf %81, %82 : vector<1x128xf32>
    %84 = vector.broadcast %74 : vector<1x128xf32> to vector<4x128xf32>
    %85 = arith.subf %63, %84 : vector<4x128xf32>
    %cst_35 = arith.constant 9.99999974E-6 : f32
    %86 = vector.broadcast %cst_35 : f32 to vector<1x128xf32>
    %87 = arith.addf %83, %86 : vector<1x128xf32>
    %88 = math.rsqrt %87 : vector<1x128xf32>
    %89 = vector.broadcast %88 : vector<1x128xf32> to vector<4x128xf32>
    %90 = arith.mulf %85, %89 : vector<4x128xf32>
    %91 = arith.mulf %90, %64 : vector<4x128xf32>
    %92 = arith.addf %91, %65 : vector<4x128xf32>
    %93 = vector.extract_strided_slice %2 {offsets = [0, 384], sizes = [4, 128], strides = [1, 1]} : vector<4x512xf32> to vector<4x128xf32>
    %c0_36 = arith.constant 0 : index
    %c0_37 = arith.constant 0 : index
    %94 = vector.load %arg2[%c0_36, %c0_37] : memref<4x128xf32, #tpu.memory_space<vmem>>, vector<4x128xf32>
    %c0_38 = arith.constant 0 : index
    %c0_39 = arith.constant 0 : index
    %95 = vector.load %arg3[%c0_38, %c0_39] : memref<4x128xf32, #tpu.memory_space<vmem>>, vector<4x128xf32>
    %96 = arith.mulf %93, %93 : vector<4x128xf32>
    %97 = tpu.concatenate %93, %96 in 0 : vector<4x128xf32>, vector<4x128xf32> -> vector<8x128xf32>
    %98 = arith.truncf %97 : vector<8x128xf32> to vector<8x128xbf16>
    %cst_40 = arith.constant dense<0.000000e+00> : vector<8x128xf32>
    %99 = tpu.matmul %98, %0, %cst_40 {dimension_numbers = #tpu.dot_dimension_numbers<[1], [0], [0], [1], [0, 0, 1, 1], [], []>} : vector<8x128xbf16>, vector<128x128xbf16>, vector<8x128xf32> -> vector<8x128xf32>
    %100 = vector.extract_strided_slice %99 {offsets = [0, 0], sizes = [4, 128], strides = [1, 1]} : vector<8x128xf32> to vector<4x128xf32>
    %cst_41 = arith.constant dense<0.000000e+00> : vector<128xf32>
    %101 = vector.multi_reduction <add>, %100, %cst_41 [0] : vector<4x128xf32> to vector<128xf32>
    %102 = vector.shape_cast %101 : vector<128xf32> to vector<1x128xf32>
    %cst_42 = arith.constant 6.400000e+01 : f32
    %103 = vector.broadcast %cst_42 : f32 to vector<1x128xf32>
    %104 = arith.divf %102, %103 : vector<1x128xf32>
    %105 = vector.extract_strided_slice %99 {offsets = [4, 0], sizes = [4, 128], strides = [1, 1]} : vector<8x128xf32> to vector<4x128xf32>
    %cst_43 = arith.constant dense<0.000000e+00> : vector<128xf32>
    %106 = vector.multi_reduction <add>, %105, %cst_43 [0] : vector<4x128xf32> to vector<128xf32>
    %107 = vector.shape_cast %106 : vector<128xf32> to vector<1x128xf32>
    %cst_44 = arith.constant 6.400000e+01 : f32
    %108 = vector.broadcast %cst_44 : f32 to vector<1x128xf32>
    %109 = arith.divf %107, %108 : vector<1x128xf32>
    %110 = arith.mulf %104, %104 : vector<1x128xf32>
    %111 = arith.subf %109, %110 : vector<1x128xf32>
    %cst_45 = arith.constant 0.000000e+00 : f32
    %112 = vector.broadcast %cst_45 : f32 to vector<1x128xf32>
    %113 = arith.maximumf %111, %112 : vector<1x128xf32>
    %114 = vector.broadcast %104 : vector<1x128xf32> to vector<4x128xf32>
    %115 = arith.subf %93, %114 : vector<4x128xf32>
    %cst_46 = arith.constant 9.99999974E-6 : f32
    %116 = vector.broadcast %cst_46 : f32 to vector<1x128xf32>
    %117 = arith.addf %113, %116 : vector<1x128xf32>
    %118 = math.rsqrt %117 : vector<1x128xf32>
    %119 = vector.broadcast %118 : vector<1x128xf32> to vector<4x128xf32>
    %120 = arith.mulf %115, %119 : vector<4x128xf32>
    %121 = arith.mulf %120, %94 : vector<4x128xf32>
    %122 = arith.addf %121, %95 : vector<4x128xf32>
    %123 = tpu.concatenate %32, %62, %92, %122 in 1 : vector<4x128xf32>, vector<4x128xf32>, vector<4x128xf32>, vector<4x128xf32> -> vector<4x512xf32>
    %c0_47 = arith.constant 0 : index
    %c0_48 = arith.constant 0 : index
    %124 = vector.load %arg4[%c0_47, %c0_48] : memref<32x4xbf16, #tpu.memory_space<vmem>>, vector<32x4xbf16>
    %125 = arith.truncf %123 : vector<4x512xf32> to vector<4x512xbf16>
    %cst_49 = arith.constant dense<0.000000e+00> : vector<32x512xf32>
    %126 = tpu.matmul %124, %125, %cst_49 {dimension_numbers = #tpu.dot_dimension_numbers<[1], [0], [0], [1], [0, 0, 1, 1], [], []>} : vector<32x4xbf16>, vector<4x512xbf16>, vector<32x512xf32> -> vector<32x512xf32>
    %c0_50 = arith.constant 0 : index
    %c0_51 = arith.constant 0 : index
    %127 = vector.load %arg5[%c0_50, %c0_51] : memref<32x1xf32, #tpu.memory_space<vmem>>, vector<32x1xf32>
    %128 = vector.broadcast %127 : vector<32x1xf32> to vector<32x512xf32>
    %129 = arith.addf %126, %128 : vector<32x512xf32>
    %c0_52 = arith.constant 0 : index
    %c0_53 = arith.constant 0 : index
    %c0_54 = arith.constant 0 : index
    %130 = vector.load %arg6[%c0_52, %c0_53, %c0_54] : memref<2x96x32xbf16, #tpu.memory_space<vmem>>, vector<1x96x32xbf16>
    %131 = vector.shape_cast %130 : vector<1x96x32xbf16> to vector<96x32xbf16>
    %132 = arith.truncf %129 : vector<32x512xf32> to vector<32x512xbf16>
    %cst_55 = arith.constant dense<0.000000e+00> : vector<96x512xf32>
    %133 = tpu.matmul %131, %132, %cst_55 {dimension_numbers = #tpu.dot_dimension_numbers<[1], [0], [0], [1], [0, 0, 1, 1], [], []>} : vector<96x32xbf16>, vector<32x512xbf16>, vector<96x512xf32> -> vector<96x512xf32>
    %c0_56 = arith.constant 0 : index
    %c0_57 = arith.constant 0 : index
    %c0_58 = arith.constant 0 : index
    %134 = vector.load %arg7[%c0_56, %c0_57, %c0_58] : memref<2x96x1xf32, #tpu.memory_space<vmem>>, vector<1x96x1xf32>
    %135 = vector.shape_cast %134 : vector<1x96x1xf32> to vector<96x1xf32>
    %136 = vector.broadcast %135 : vector<96x1xf32> to vector<96x512xf32>
    %137 = arith.addf %133, %136 : vector<96x512xf32>
    %c0_59 = arith.constant 0 : index
    %c0_60 = arith.constant 0 : index
    %c0_61 = arith.constant 0 : index
    %138 = vector.load %arg8[%c0_59, %c0_60, %c0_61] : memref<2x384x128xbf16, #tpu.memory_space<vmem>>, vector<1x384x128xbf16>
    %139 = vector.shape_cast %138 : vector<1x384x128xbf16> to vector<384x128xbf16>
    %140 = vector.extract_strided_slice %137 {offsets = [0, 0], sizes = [96, 128], strides = [1, 1]} : vector<96x512xf32> to vector<96x128xf32>
    %141 = vector.extract_strided_slice %140 {offsets = [0, 0], sizes = [32, 128], strides = [1, 1]} : vector<96x128xf32> to vector<32x128xf32>
    %142 = vector.extract_strided_slice %140 {offsets = [32, 0], sizes = [32, 128], strides = [1, 1]} : vector<96x128xf32> to vector<32x128xf32>
    %143 = vector.extract_strided_slice %140 {offsets = [64, 0], sizes = [32, 128], strides = [1, 1]} : vector<96x128xf32> to vector<32x128xf32>
    %144 = tpu.concatenate %141, %142, %143 in 1 : vector<32x128xf32>, vector<32x128xf32>, vector<32x128xf32> -> vector<32x384xf32>
    %145 = arith.truncf %144 : vector<32x384xf32> to vector<32x384xbf16>
    %cst_62 = arith.constant dense<0.000000e+00> : vector<32x128xf32>
    %146 = tpu.matmul %145, %139, %cst_62 {dimension_numbers = #tpu.dot_dimension_numbers<[1], [0], [0], [1], [0, 0, 1, 1], [], []>} : vector<32x384xbf16>, vector<384x128xbf16>, vector<32x128xf32> -> vector<32x128xf32>
    %c0_63 = arith.constant 0 : index
    %c0_64 = arith.constant 0 : index
    %c0_65 = arith.constant 0 : index
    %147 = vector.load %arg9[%c0_63, %c0_64, %c0_65] : memref<2x32x128xf32, #tpu.memory_space<vmem>>, vector<1x32x128xf32>
    %148 = vector.shape_cast %147 : vector<1x32x128xf32> to vector<32x128xf32>
    %c0_66 = arith.constant 0 : index
    %c0_67 = arith.constant 0 : index
    %c0_68 = arith.constant 0 : index
    %149 = vector.load %arg10[%c0_66, %c0_67, %c0_68] : memref<2x32x128xf32, #tpu.memory_space<vmem>>, vector<1x32x128xf32>
    %150 = vector.shape_cast %149 : vector<1x32x128xf32> to vector<32x128xf32>
    %151 = arith.mulf %146, %146 : vector<32x128xf32>
    %152 = tpu.concatenate %146, %151 in 0 : vector<32x128xf32>, vector<32x128xf32> -> vector<64x128xf32>
    %153 = arith.truncf %152 : vector<64x128xf32> to vector<64x128xbf16>
    %cst_69 = arith.constant dense<0.000000e+00> : vector<64x128xf32>
    %154 = tpu.matmul %153, %0, %cst_69 {dimension_numbers = #tpu.dot_dimension_numbers<[1], [0], [0], [1], [0, 0, 1, 1], [], []>} : vector<64x128xbf16>, vector<128x128xbf16>, vector<64x128xf32> -> vector<64x128xf32>
    %155 = vector.extract_strided_slice %154 {offsets = [0, 0], sizes = [32, 128], strides = [1, 1]} : vector<64x128xf32> to vector<32x128xf32>
    %cst_70 = arith.constant dense<0.000000e+00> : vector<128xf32>
    %156 = vector.multi_reduction <add>, %155, %cst_70 [0] : vector<32x128xf32> to vector<128xf32>
    %157 = vector.shape_cast %156 : vector<128xf32> to vector<1x128xf32>
    %cst_71 = arith.constant 5.120000e+02 : f32
    %158 = vector.broadcast %cst_71 : f32 to vector<1x128xf32>
    %159 = arith.divf %157, %158 : vector<1x128xf32>
    %160 = vector.extract_strided_slice %154 {offsets = [32, 0], sizes = [32, 128], strides = [1, 1]} : vector<64x128xf32> to vector<32x128xf32>
    %cst_72 = arith.constant dense<0.000000e+00> : vector<128xf32>
    %161 = vector.multi_reduction <add>, %160, %cst_72 [0] : vector<32x128xf32> to vector<128xf32>
    %162 = vector.shape_cast %161 : vector<128xf32> to vector<1x128xf32>
    %cst_73 = arith.constant 5.120000e+02 : f32
    %163 = vector.broadcast %cst_73 : f32 to vector<1x128xf32>
    %164 = arith.divf %162, %163 : vector<1x128xf32>
    %165 = arith.mulf %159, %159 : vector<1x128xf32>
    %166 = arith.subf %164, %165 : vector<1x128xf32>
    %cst_74 = arith.constant 0.000000e+00 : f32
    %167 = vector.broadcast %cst_74 : f32 to vector<1x128xf32>
    %168 = arith.maximumf %166, %167 : vector<1x128xf32>
    %169 = vector.broadcast %159 : vector<1x128xf32> to vector<32x128xf32>
    %170 = arith.subf %146, %169 : vector<32x128xf32>
    %cst_75 = arith.constant 9.99999974E-6 : f32
    %171 = vector.broadcast %cst_75 : f32 to vector<1x128xf32>
    %172 = arith.addf %168, %171 : vector<1x128xf32>
    %173 = math.rsqrt %172 : vector<1x128xf32>
    %174 = vector.broadcast %173 : vector<1x128xf32> to vector<32x128xf32>
    %175 = arith.mulf %170, %174 : vector<32x128xf32>
    %176 = arith.mulf %175, %148 : vector<32x128xf32>
    %177 = arith.addf %176, %150 : vector<32x128xf32>
    %178 = vector.extract_strided_slice %137 {offsets = [0, 128], sizes = [96, 128], strides = [1, 1]} : vector<96x512xf32> to vector<96x128xf32>
    %179 = vector.extract_strided_slice %178 {offsets = [0, 0], sizes = [32, 128], strides = [1, 1]} : vector<96x128xf32> to vector<32x128xf32>
    %180 = vector.extract_strided_slice %178 {offsets = [32, 0], sizes = [32, 128], strides = [1, 1]} : vector<96x128xf32> to vector<32x128xf32>
    %181 = vector.extract_strided_slice %178 {offsets = [64, 0], sizes = [32, 128], strides = [1, 1]} : vector<96x128xf32> to vector<32x128xf32>
    %182 = tpu.concatenate %179, %180, %181 in 1 : vector<32x128xf32>, vector<32x128xf32>, vector<32x128xf32> -> vector<32x384xf32>
    %183 = arith.truncf %182 : vector<32x384xf32> to vector<32x384xbf16>
    %cst_76 = arith.constant dense<0.000000e+00> : vector<32x128xf32>
    %184 = tpu.matmul %183, %139, %cst_76 {dimension_numbers = #tpu.dot_dimension_numbers<[1], [0], [0], [1], [0, 0, 1, 1], [], []>} : vector<32x384xbf16>, vector<384x128xbf16>, vector<32x128xf32> -> vector<32x128xf32>
    %c0_77 = arith.constant 0 : index
    %c0_78 = arith.constant 0 : index
    %c0_79 = arith.constant 0 : index
    %185 = vector.load %arg9[%c0_77, %c0_78, %c0_79] : memref<2x32x128xf32, #tpu.memory_space<vmem>>, vector<1x32x128xf32>
    %186 = vector.shape_cast %185 : vector<1x32x128xf32> to vector<32x128xf32>
    %c0_80 = arith.constant 0 : index
    %c0_81 = arith.constant 0 : index
    %c0_82 = arith.constant 0 : index
    %187 = vector.load %arg10[%c0_80, %c0_81, %c0_82] : memref<2x32x128xf32, #tpu.memory_space<vmem>>, vector<1x32x128xf32>
    %188 = vector.shape_cast %187 : vector<1x32x128xf32> to vector<32x128xf32>
    %189 = arith.mulf %184, %184 : vector<32x128xf32>
    %190 = tpu.concatenate %184, %189 in 0 : vector<32x128xf32>, vector<32x128xf32> -> vector<64x128xf32>
    %191 = arith.truncf %190 : vector<64x128xf32> to vector<64x128xbf16>
    %cst_83 = arith.constant dense<0.000000e+00> : vector<64x128xf32>
    %192 = tpu.matmul %191, %0, %cst_83 {dimension_numbers = #tpu.dot_dimension_numbers<[1], [0], [0], [1], [0, 0, 1, 1], [], []>} : vector<64x128xbf16>, vector<128x128xbf16>, vector<64x128xf32> -> vector<64x128xf32>
    %193 = vector.extract_strided_slice %192 {offsets = [0, 0], sizes = [32, 128], strides = [1, 1]} : vector<64x128xf32> to vector<32x128xf32>
    %cst_84 = arith.constant dense<0.000000e+00> : vector<128xf32>
    %194 = vector.multi_reduction <add>, %193, %cst_84 [0] : vector<32x128xf32> to vector<128xf32>
    %195 = vector.shape_cast %194 : vector<128xf32> to vector<1x128xf32>
    %cst_85 = arith.constant 5.120000e+02 : f32
    %196 = vector.broadcast %cst_85 : f32 to vector<1x128xf32>
    %197 = arith.divf %195, %196 : vector<1x128xf32>
    %198 = vector.extract_strided_slice %192 {offsets = [32, 0], sizes = [32, 128], strides = [1, 1]} : vector<64x128xf32> to vector<32x128xf32>
    %cst_86 = arith.constant dense<0.000000e+00> : vector<128xf32>
    %199 = vector.multi_reduction <add>, %198, %cst_86 [0] : vector<32x128xf32> to vector<128xf32>
    %200 = vector.shape_cast %199 : vector<128xf32> to vector<1x128xf32>
    %cst_87 = arith.constant 5.120000e+02 : f32
    %201 = vector.broadcast %cst_87 : f32 to vector<1x128xf32>
    %202 = arith.divf %200, %201 : vector<1x128xf32>
    %203 = arith.mulf %197, %197 : vector<1x128xf32>
    %204 = arith.subf %202, %203 : vector<1x128xf32>
    %cst_88 = arith.constant 0.000000e+00 : f32
    %205 = vector.broadcast %cst_88 : f32 to vector<1x128xf32>
    %206 = arith.maximumf %204, %205 : vector<1x128xf32>
    %207 = vector.broadcast %197 : vector<1x128xf32> to vector<32x128xf32>
    %208 = arith.subf %184, %207 : vector<32x128xf32>
    %cst_89 = arith.constant 9.99999974E-6 : f32
    %209 = vector.broadcast %cst_89 : f32 to vector<1x128xf32>
    %210 = arith.addf %206, %209 : vector<1x128xf32>
    %211 = math.rsqrt %210 : vector<1x128xf32>
    %212 = vector.broadcast %211 : vector<1x128xf32> to vector<32x128xf32>
    %213 = arith.mulf %208, %212 : vector<32x128xf32>
    %214 = arith.mulf %213, %186 : vector<32x128xf32>
    %215 = arith.addf %214, %188 : vector<32x128xf32>
    %216 = vector.extract_strided_slice %137 {offsets = [0, 256], sizes = [96, 128], strides = [1, 1]} : vector<96x512xf32> to vector<96x128xf32>
    %217 = vector.extract_strided_slice %216 {offsets = [0, 0], sizes = [32, 128], strides = [1, 1]} : vector<96x128xf32> to vector<32x128xf32>
    %218 = vector.extract_strided_slice %216 {offsets = [32, 0], sizes = [32, 128], strides = [1, 1]} : vector<96x128xf32> to vector<32x128xf32>
    %219 = vector.extract_strided_slice %216 {offsets = [64, 0], sizes = [32, 128], strides = [1, 1]} : vector<96x128xf32> to vector<32x128xf32>
    %220 = tpu.concatenate %217, %218, %219 in 1 : vector<32x128xf32>, vector<32x128xf32>, vector<32x128xf32> -> vector<32x384xf32>
    %221 = arith.truncf %220 : vector<32x384xf32> to vector<32x384xbf16>
    %cst_90 = arith.constant dense<0.000000e+00> : vector<32x128xf32>
    %222 = tpu.matmul %221, %139, %cst_90 {dimension_numbers = #tpu.dot_dimension_numbers<[1], [0], [0], [1], [0, 0, 1, 1], [], []>} : vector<32x384xbf16>, vector<384x128xbf16>, vector<32x128xf32> -> vector<32x128xf32>
    %c0_91 = arith.constant 0 : index
    %c0_92 = arith.constant 0 : index
    %c0_93 = arith.constant 0 : index
    %223 = vector.load %arg9[%c0_91, %c0_92, %c0_93] : memref<2x32x128xf32, #tpu.memory_space<vmem>>, vector<1x32x128xf32>
    %224 = vector.shape_cast %223 : vector<1x32x128xf32> to vector<32x128xf32>
    %c0_94 = arith.constant 0 : index
    %c0_95 = arith.constant 0 : index
    %c0_96 = arith.constant 0 : index
    %225 = vector.load %arg10[%c0_94, %c0_95, %c0_96] : memref<2x32x128xf32, #tpu.memory_space<vmem>>, vector<1x32x128xf32>
    %226 = vector.shape_cast %225 : vector<1x32x128xf32> to vector<32x128xf32>
    %227 = arith.mulf %222, %222 : vector<32x128xf32>
    %228 = tpu.concatenate %222, %227 in 0 : vector<32x128xf32>, vector<32x128xf32> -> vector<64x128xf32>
    %229 = arith.truncf %228 : vector<64x128xf32> to vector<64x128xbf16>
    %cst_97 = arith.constant dense<0.000000e+00> : vector<64x128xf32>
    %230 = tpu.matmul %229, %0, %cst_97 {dimension_numbers = #tpu.dot_dimension_numbers<[1], [0], [0], [1], [0, 0, 1, 1], [], []>} : vector<64x128xbf16>, vector<128x128xbf16>, vector<64x128xf32> -> vector<64x128xf32>
    %231 = vector.extract_strided_slice %230 {offsets = [0, 0], sizes = [32, 128], strides = [1, 1]} : vector<64x128xf32> to vector<32x128xf32>
    %cst_98 = arith.constant dense<0.000000e+00> : vector<128xf32>
    %232 = vector.multi_reduction <add>, %231, %cst_98 [0] : vector<32x128xf32> to vector<128xf32>
    %233 = vector.shape_cast %232 : vector<128xf32> to vector<1x128xf32>
    %cst_99 = arith.constant 5.120000e+02 : f32
    %234 = vector.broadcast %cst_99 : f32 to vector<1x128xf32>
    %235 = arith.divf %233, %234 : vector<1x128xf32>
    %236 = vector.extract_strided_slice %230 {offsets = [32, 0], sizes = [32, 128], strides = [1, 1]} : vector<64x128xf32> to vector<32x128xf32>
    %cst_100 = arith.constant dense<0.000000e+00> : vector<128xf32>
    %237 = vector.multi_reduction <add>, %236, %cst_100 [0] : vector<32x128xf32> to vector<128xf32>
    %238 = vector.shape_cast %237 : vector<128xf32> to vector<1x128xf32>
    %cst_101 = arith.constant 5.120000e+02 : f32
    %239 = vector.broadcast %cst_101 : f32 to vector<1x128xf32>
    %240 = arith.divf %238, %239 : vector<1x128xf32>
    %241 = arith.mulf %235, %235 : vector<1x128xf32>
    %242 = arith.subf %240, %241 : vector<1x128xf32>
    %cst_102 = arith.constant 0.000000e+00 : f32
    %243 = vector.broadcast %cst_102 : f32 to vector<1x128xf32>
    %244 = arith.maximumf %242, %243 : vector<1x128xf32>
    %245 = vector.broadcast %235 : vector<1x128xf32> to vector<32x128xf32>
    %246 = arith.subf %222, %245 : vector<32x128xf32>
    %cst_103 = arith.constant 9.99999974E-6 : f32
    %247 = vector.broadcast %cst_103 : f32 to vector<1x128xf32>
    %248 = arith.addf %244, %247 : vector<1x128xf32>
    %249 = math.rsqrt %248 : vector<1x128xf32>
    %250 = vector.broadcast %249 : vector<1x128xf32> to vector<32x128xf32>
    %251 = arith.mulf %246, %250 : vector<32x128xf32>
    %252 = arith.mulf %251, %224 : vector<32x128xf32>
    %253 = arith.addf %252, %226 : vector<32x128xf32>
    %254 = vector.extract_strided_slice %137 {offsets = [0, 384], sizes = [96, 128], strides = [1, 1]} : vector<96x512xf32> to vector<96x128xf32>
    %255 = vector.extract_strided_slice %254 {offsets = [0, 0], sizes = [32, 128], strides = [1, 1]} : vector<96x128xf32> to vector<32x128xf32>
    %256 = vector.extract_strided_slice %254 {offsets = [32, 0], sizes = [32, 128], strides = [1, 1]} : vector<96x128xf32> to vector<32x128xf32>
    %257 = vector.extract_strided_slice %254 {offsets = [64, 0], sizes = [32, 128], strides = [1, 1]} : vector<96x128xf32> to vector<32x128xf32>
    %258 = tpu.concatenate %255, %256, %257 in 1 : vector<32x128xf32>, vector<32x128xf32>, vector<32x128xf32> -> vector<32x384xf32>
    %259 = arith.truncf %258 : vector<32x384xf32> to vector<32x384xbf16>
    %cst_104 = arith.constant dense<0.000000e+00> : vector<32x128xf32>
    %260 = tpu.matmul %259, %139, %cst_104 {dimension_numbers = #tpu.dot_dimension_numbers<[1], [0], [0], [1], [0, 0, 1, 1], [], []>} : vector<32x384xbf16>, vector<384x128xbf16>, vector<32x128xf32> -> vector<32x128xf32>
    %c0_105 = arith.constant 0 : index
    %c0_106 = arith.constant 0 : index
    %c0_107 = arith.constant 0 : index
    %261 = vector.load %arg9[%c0_105, %c0_106, %c0_107] : memref<2x32x128xf32, #tpu.memory_space<vmem>>, vector<1x32x128xf32>
    %262 = vector.shape_cast %261 : vector<1x32x128xf32> to vector<32x128xf32>
    %c0_108 = arith.constant 0 : index
    %c0_109 = arith.constant 0 : index
    %c0_110 = arith.constant 0 : index
    %263 = vector.load %arg10[%c0_108, %c0_109, %c0_110] : memref<2x32x128xf32, #tpu.memory_space<vmem>>, vector<1x32x128xf32>
    %264 = vector.shape_cast %263 : vector<1x32x128xf32> to vector<32x128xf32>
    %265 = arith.mulf %260, %260 : vector<32x128xf32>
    %266 = tpu.concatenate %260, %265 in 0 : vector<32x128xf32>, vector<32x128xf32> -> vector<64x128xf32>
    %267 = arith.truncf %266 : vector<64x128xf32> to vector<64x128xbf16>
    %cst_111 = arith.constant dense<0.000000e+00> : vector<64x128xf32>
    %268 = tpu.matmul %267, %0, %cst_111 {dimension_numbers = #tpu.dot_dimension_numbers<[1], [0], [0], [1], [0, 0, 1, 1], [], []>} : vector<64x128xbf16>, vector<128x128xbf16>, vector<64x128xf32> -> vector<64x128xf32>
    %269 = vector.extract_strided_slice %268 {offsets = [0, 0], sizes = [32, 128], strides = [1, 1]} : vector<64x128xf32> to vector<32x128xf32>
    %cst_112 = arith.constant dense<0.000000e+00> : vector<128xf32>
    %270 = vector.multi_reduction <add>, %269, %cst_112 [0] : vector<32x128xf32> to vector<128xf32>
    %271 = vector.shape_cast %270 : vector<128xf32> to vector<1x128xf32>
    %cst_113 = arith.constant 5.120000e+02 : f32
    %272 = vector.broadcast %cst_113 : f32 to vector<1x128xf32>
    %273 = arith.divf %271, %272 : vector<1x128xf32>
    %274 = vector.extract_strided_slice %268 {offsets = [32, 0], sizes = [32, 128], strides = [1, 1]} : vector<64x128xf32> to vector<32x128xf32>
    %cst_114 = arith.constant dense<0.000000e+00> : vector<128xf32>
    %275 = vector.multi_reduction <add>, %274, %cst_114 [0] : vector<32x128xf32> to vector<128xf32>
    %276 = vector.shape_cast %275 : vector<128xf32> to vector<1x128xf32>
    %cst_115 = arith.constant 5.120000e+02 : f32
    %277 = vector.broadcast %cst_115 : f32 to vector<1x128xf32>
    %278 = arith.divf %276, %277 : vector<1x128xf32>
    %279 = arith.mulf %273, %273 : vector<1x128xf32>
    %280 = arith.subf %278, %279 : vector<1x128xf32>
    %cst_116 = arith.constant 0.000000e+00 : f32
    %281 = vector.broadcast %cst_116 : f32 to vector<1x128xf32>
    %282 = arith.maximumf %280, %281 : vector<1x128xf32>
    %283 = vector.broadcast %273 : vector<1x128xf32> to vector<32x128xf32>
    %284 = arith.subf %260, %283 : vector<32x128xf32>
    %cst_117 = arith.constant 9.99999974E-6 : f32
    %285 = vector.broadcast %cst_117 : f32 to vector<1x128xf32>
    %286 = arith.addf %282, %285 : vector<1x128xf32>
    %287 = math.rsqrt %286 : vector<1x128xf32>
    %288 = vector.broadcast %287 : vector<1x128xf32> to vector<32x128xf32>
    %289 = arith.mulf %284, %288 : vector<32x128xf32>
    %290 = arith.mulf %289, %262 : vector<32x128xf32>
    %291 = arith.addf %290, %264 : vector<32x128xf32>
    %292 = tpu.concatenate %177, %215, %253, %291 in 1 : vector<32x128xf32>, vector<32x128xf32>, vector<32x128xf32>, vector<32x128xf32> -> vector<32x512xf32>
    %cst_118 = arith.constant 0.000000e+00 : f32
    %293 = vector.broadcast %cst_118 : f32 to vector<32x512xf32>
    %294 = arith.maximumf %292, %293 : vector<32x512xf32>
    %295 = arith.addf %294, %129 : vector<32x512xf32>
    %cst_119 = arith.constant 0.000000e+00 : f32
    %296 = vector.broadcast %cst_119 : f32 to vector<32x512xf32>
    %297 = arith.maximumf %295, %296 : vector<32x512xf32>
    %c1 = arith.constant 1 : index
    %c0_120 = arith.constant 0 : index
    %c0_121 = arith.constant 0 : index
    %298 = vector.load %arg6[%c1, %c0_120, %c0_121] : memref<2x96x32xbf16, #tpu.memory_space<vmem>>, vector<1x96x32xbf16>
    %299 = vector.shape_cast %298 : vector<1x96x32xbf16> to vector<96x32xbf16>
    %300 = arith.truncf %297 : vector<32x512xf32> to vector<32x512xbf16>
    %cst_122 = arith.constant dense<0.000000e+00> : vector<96x512xf32>
    %301 = tpu.matmul %299, %300, %cst_122 {dimension_numbers = #tpu.dot_dimension_numbers<[1], [0], [0], [1], [0, 0, 1, 1], [], []>} : vector<96x32xbf16>, vector<32x512xbf16>, vector<96x512xf32> -> vector<96x512xf32>
    %c1_123 = arith.constant 1 : index
    %c0_124 = arith.constant 0 : index
    %c0_125 = arith.constant 0 : index
    %302 = vector.load %arg7[%c1_123, %c0_124, %c0_125] : memref<2x96x1xf32, #tpu.memory_space<vmem>>, vector<1x96x1xf32>
    %303 = vector.shape_cast %302 : vector<1x96x1xf32> to vector<96x1xf32>
    %304 = vector.broadcast %303 : vector<96x1xf32> to vector<96x512xf32>
    %305 = arith.addf %301, %304 : vector<96x512xf32>
    %c1_126 = arith.constant 1 : index
    %c0_127 = arith.constant 0 : index
    %c0_128 = arith.constant 0 : index
    %306 = vector.load %arg8[%c1_126, %c0_127, %c0_128] : memref<2x384x128xbf16, #tpu.memory_space<vmem>>, vector<1x384x128xbf16>
    %307 = vector.shape_cast %306 : vector<1x384x128xbf16> to vector<384x128xbf16>
    %308 = vector.extract_strided_slice %305 {offsets = [0, 0], sizes = [96, 128], strides = [1, 1]} : vector<96x512xf32> to vector<96x128xf32>
    %309 = vector.extract_strided_slice %308 {offsets = [0, 0], sizes = [32, 128], strides = [1, 1]} : vector<96x128xf32> to vector<32x128xf32>
    %310 = vector.extract_strided_slice %308 {offsets = [32, 0], sizes = [32, 128], strides = [1, 1]} : vector<96x128xf32> to vector<32x128xf32>
    %311 = vector.extract_strided_slice %308 {offsets = [64, 0], sizes = [32, 128], strides = [1, 1]} : vector<96x128xf32> to vector<32x128xf32>
    %312 = tpu.concatenate %309, %310, %311 in 1 : vector<32x128xf32>, vector<32x128xf32>, vector<32x128xf32> -> vector<32x384xf32>
    %313 = arith.truncf %312 : vector<32x384xf32> to vector<32x384xbf16>
    %cst_129 = arith.constant dense<0.000000e+00> : vector<32x128xf32>
    %314 = tpu.matmul %313, %307, %cst_129 {dimension_numbers = #tpu.dot_dimension_numbers<[1], [0], [0], [1], [0, 0, 1, 1], [], []>} : vector<32x384xbf16>, vector<384x128xbf16>, vector<32x128xf32> -> vector<32x128xf32>
    %c1_130 = arith.constant 1 : index
    %c0_131 = arith.constant 0 : index
    %c0_132 = arith.constant 0 : index
    %315 = vector.load %arg9[%c1_130, %c0_131, %c0_132] : memref<2x32x128xf32, #tpu.memory_space<vmem>>, vector<1x32x128xf32>
    %316 = vector.shape_cast %315 : vector<1x32x128xf32> to vector<32x128xf32>
    %c1_133 = arith.constant 1 : index
    %c0_134 = arith.constant 0 : index
    %c0_135 = arith.constant 0 : index
    %317 = vector.load %arg10[%c1_133, %c0_134, %c0_135] : memref<2x32x128xf32, #tpu.memory_space<vmem>>, vector<1x32x128xf32>
    %318 = vector.shape_cast %317 : vector<1x32x128xf32> to vector<32x128xf32>
    %319 = arith.mulf %314, %314 : vector<32x128xf32>
    %320 = tpu.concatenate %314, %319 in 0 : vector<32x128xf32>, vector<32x128xf32> -> vector<64x128xf32>
    %321 = arith.truncf %320 : vector<64x128xf32> to vector<64x128xbf16>
    %cst_136 = arith.constant dense<0.000000e+00> : vector<64x128xf32>
    %322 = tpu.matmul %321, %0, %cst_136 {dimension_numbers = #tpu.dot_dimension_numbers<[1], [0], [0], [1], [0, 0, 1, 1], [], []>} : vector<64x128xbf16>, vector<128x128xbf16>, vector<64x128xf32> -> vector<64x128xf32>
    %323 = vector.extract_strided_slice %322 {offsets = [0, 0], sizes = [32, 128], strides = [1, 1]} : vector<64x128xf32> to vector<32x128xf32>
    %cst_137 = arith.constant dense<0.000000e+00> : vector<128xf32>
    %324 = vector.multi_reduction <add>, %323, %cst_137 [0] : vector<32x128xf32> to vector<128xf32>
    %325 = vector.shape_cast %324 : vector<128xf32> to vector<1x128xf32>
    %cst_138 = arith.constant 5.120000e+02 : f32
    %326 = vector.broadcast %cst_138 : f32 to vector<1x128xf32>
    %327 = arith.divf %325, %326 : vector<1x128xf32>
    %328 = vector.extract_strided_slice %322 {offsets = [32, 0], sizes = [32, 128], strides = [1, 1]} : vector<64x128xf32> to vector<32x128xf32>
    %cst_139 = arith.constant dense<0.000000e+00> : vector<128xf32>
    %329 = vector.multi_reduction <add>, %328, %cst_139 [0] : vector<32x128xf32> to vector<128xf32>
    %330 = vector.shape_cast %329 : vector<128xf32> to vector<1x128xf32>
    %cst_140 = arith.constant 5.120000e+02 : f32
    %331 = vector.broadcast %cst_140 : f32 to vector<1x128xf32>
    %332 = arith.divf %330, %331 : vector<1x128xf32>
    %333 = arith.mulf %327, %327 : vector<1x128xf32>
    %334 = arith.subf %332, %333 : vector<1x128xf32>
    %cst_141 = arith.constant 0.000000e+00 : f32
    %335 = vector.broadcast %cst_141 : f32 to vector<1x128xf32>
    %336 = arith.maximumf %334, %335 : vector<1x128xf32>
    %337 = vector.broadcast %327 : vector<1x128xf32> to vector<32x128xf32>
    %338 = arith.subf %314, %337 : vector<32x128xf32>
    %cst_142 = arith.constant 9.99999974E-6 : f32
    %339 = vector.broadcast %cst_142 : f32 to vector<1x128xf32>
    %340 = arith.addf %336, %339 : vector<1x128xf32>
    %341 = math.rsqrt %340 : vector<1x128xf32>
    %342 = vector.broadcast %341 : vector<1x128xf32> to vector<32x128xf32>
    %343 = arith.mulf %338, %342 : vector<32x128xf32>
    %344 = arith.mulf %343, %316 : vector<32x128xf32>
    %345 = arith.addf %344, %318 : vector<32x128xf32>
    %346 = vector.extract_strided_slice %305 {offsets = [0, 128], sizes = [96, 128], strides = [1, 1]} : vector<96x512xf32> to vector<96x128xf32>
    %347 = vector.extract_strided_slice %346 {offsets = [0, 0], sizes = [32, 128], strides = [1, 1]} : vector<96x128xf32> to vector<32x128xf32>
    %348 = vector.extract_strided_slice %346 {offsets = [32, 0], sizes = [32, 128], strides = [1, 1]} : vector<96x128xf32> to vector<32x128xf32>
    %349 = vector.extract_strided_slice %346 {offsets = [64, 0], sizes = [32, 128], strides = [1, 1]} : vector<96x128xf32> to vector<32x128xf32>
    %350 = tpu.concatenate %347, %348, %349 in 1 : vector<32x128xf32>, vector<32x128xf32>, vector<32x128xf32> -> vector<32x384xf32>
    %351 = arith.truncf %350 : vector<32x384xf32> to vector<32x384xbf16>
    %cst_143 = arith.constant dense<0.000000e+00> : vector<32x128xf32>
    %352 = tpu.matmul %351, %307, %cst_143 {dimension_numbers = #tpu.dot_dimension_numbers<[1], [0], [0], [1], [0, 0, 1, 1], [], []>} : vector<32x384xbf16>, vector<384x128xbf16>, vector<32x128xf32> -> vector<32x128xf32>
    %c1_144 = arith.constant 1 : index
    %c0_145 = arith.constant 0 : index
    %c0_146 = arith.constant 0 : index
    %353 = vector.load %arg9[%c1_144, %c0_145, %c0_146] : memref<2x32x128xf32, #tpu.memory_space<vmem>>, vector<1x32x128xf32>
    %354 = vector.shape_cast %353 : vector<1x32x128xf32> to vector<32x128xf32>
    %c1_147 = arith.constant 1 : index
    %c0_148 = arith.constant 0 : index
    %c0_149 = arith.constant 0 : index
    %355 = vector.load %arg10[%c1_147, %c0_148, %c0_149] : memref<2x32x128xf32, #tpu.memory_space<vmem>>, vector<1x32x128xf32>
    %356 = vector.shape_cast %355 : vector<1x32x128xf32> to vector<32x128xf32>
    %357 = arith.mulf %352, %352 : vector<32x128xf32>
    %358 = tpu.concatenate %352, %357 in 0 : vector<32x128xf32>, vector<32x128xf32> -> vector<64x128xf32>
    %359 = arith.truncf %358 : vector<64x128xf32> to vector<64x128xbf16>
    %cst_150 = arith.constant dense<0.000000e+00> : vector<64x128xf32>
    %360 = tpu.matmul %359, %0, %cst_150 {dimension_numbers = #tpu.dot_dimension_numbers<[1], [0], [0], [1], [0, 0, 1, 1], [], []>} : vector<64x128xbf16>, vector<128x128xbf16>, vector<64x128xf32> -> vector<64x128xf32>
    %361 = vector.extract_strided_slice %360 {offsets = [0, 0], sizes = [32, 128], strides = [1, 1]} : vector<64x128xf32> to vector<32x128xf32>
    %cst_151 = arith.constant dense<0.000000e+00> : vector<128xf32>
    %362 = vector.multi_reduction <add>, %361, %cst_151 [0] : vector<32x128xf32> to vector<128xf32>
    %363 = vector.shape_cast %362 : vector<128xf32> to vector<1x128xf32>
    %cst_152 = arith.constant 5.120000e+02 : f32
    %364 = vector.broadcast %cst_152 : f32 to vector<1x128xf32>
    %365 = arith.divf %363, %364 : vector<1x128xf32>
    %366 = vector.extract_strided_slice %360 {offsets = [32, 0], sizes = [32, 128], strides = [1, 1]} : vector<64x128xf32> to vector<32x128xf32>
    %cst_153 = arith.constant dense<0.000000e+00> : vector<128xf32>
    %367 = vector.multi_reduction <add>, %366, %cst_153 [0] : vector<32x128xf32> to vector<128xf32>
    %368 = vector.shape_cast %367 : vector<128xf32> to vector<1x128xf32>
    %cst_154 = arith.constant 5.120000e+02 : f32
    %369 = vector.broadcast %cst_154 : f32 to vector<1x128xf32>
    %370 = arith.divf %368, %369 : vector<1x128xf32>
    %371 = arith.mulf %365, %365 : vector<1x128xf32>
    %372 = arith.subf %370, %371 : vector<1x128xf32>
    %cst_155 = arith.constant 0.000000e+00 : f32
    %373 = vector.broadcast %cst_155 : f32 to vector<1x128xf32>
    %374 = arith.maximumf %372, %373 : vector<1x128xf32>
    %375 = vector.broadcast %365 : vector<1x128xf32> to vector<32x128xf32>
    %376 = arith.subf %352, %375 : vector<32x128xf32>
    %cst_156 = arith.constant 9.99999974E-6 : f32
    %377 = vector.broadcast %cst_156 : f32 to vector<1x128xf32>
    %378 = arith.addf %374, %377 : vector<1x128xf32>
    %379 = math.rsqrt %378 : vector<1x128xf32>
    %380 = vector.broadcast %379 : vector<1x128xf32> to vector<32x128xf32>
    %381 = arith.mulf %376, %380 : vector<32x128xf32>
    %382 = arith.mulf %381, %354 : vector<32x128xf32>
    %383 = arith.addf %382, %356 : vector<32x128xf32>
    %384 = vector.extract_strided_slice %305 {offsets = [0, 256], sizes = [96, 128], strides = [1, 1]} : vector<96x512xf32> to vector<96x128xf32>
    %385 = vector.extract_strided_slice %384 {offsets = [0, 0], sizes = [32, 128], strides = [1, 1]} : vector<96x128xf32> to vector<32x128xf32>
    %386 = vector.extract_strided_slice %384 {offsets = [32, 0], sizes = [32, 128], strides = [1, 1]} : vector<96x128xf32> to vector<32x128xf32>
    %387 = vector.extract_strided_slice %384 {offsets = [64, 0], sizes = [32, 128], strides = [1, 1]} : vector<96x128xf32> to vector<32x128xf32>
    %388 = tpu.concatenate %385, %386, %387 in 1 : vector<32x128xf32>, vector<32x128xf32>, vector<32x128xf32> -> vector<32x384xf32>
    %389 = arith.truncf %388 : vector<32x384xf32> to vector<32x384xbf16>
    %cst_157 = arith.constant dense<0.000000e+00> : vector<32x128xf32>
    %390 = tpu.matmul %389, %307, %cst_157 {dimension_numbers = #tpu.dot_dimension_numbers<[1], [0], [0], [1], [0, 0, 1, 1], [], []>} : vector<32x384xbf16>, vector<384x128xbf16>, vector<32x128xf32> -> vector<32x128xf32>
    %c1_158 = arith.constant 1 : index
    %c0_159 = arith.constant 0 : index
    %c0_160 = arith.constant 0 : index
    %391 = vector.load %arg9[%c1_158, %c0_159, %c0_160] : memref<2x32x128xf32, #tpu.memory_space<vmem>>, vector<1x32x128xf32>
    %392 = vector.shape_cast %391 : vector<1x32x128xf32> to vector<32x128xf32>
    %c1_161 = arith.constant 1 : index
    %c0_162 = arith.constant 0 : index
    %c0_163 = arith.constant 0 : index
    %393 = vector.load %arg10[%c1_161, %c0_162, %c0_163] : memref<2x32x128xf32, #tpu.memory_space<vmem>>, vector<1x32x128xf32>
    %394 = vector.shape_cast %393 : vector<1x32x128xf32> to vector<32x128xf32>
    %395 = arith.mulf %390, %390 : vector<32x128xf32>
    %396 = tpu.concatenate %390, %395 in 0 : vector<32x128xf32>, vector<32x128xf32> -> vector<64x128xf32>
    %397 = arith.truncf %396 : vector<64x128xf32> to vector<64x128xbf16>
    %cst_164 = arith.constant dense<0.000000e+00> : vector<64x128xf32>
    %398 = tpu.matmul %397, %0, %cst_164 {dimension_numbers = #tpu.dot_dimension_numbers<[1], [0], [0], [1], [0, 0, 1, 1], [], []>} : vector<64x128xbf16>, vector<128x128xbf16>, vector<64x128xf32> -> vector<64x128xf32>
    %399 = vector.extract_strided_slice %398 {offsets = [0, 0], sizes = [32, 128], strides = [1, 1]} : vector<64x128xf32> to vector<32x128xf32>
    %cst_165 = arith.constant dense<0.000000e+00> : vector<128xf32>
    %400 = vector.multi_reduction <add>, %399, %cst_165 [0] : vector<32x128xf32> to vector<128xf32>
    %401 = vector.shape_cast %400 : vector<128xf32> to vector<1x128xf32>
    %cst_166 = arith.constant 5.120000e+02 : f32
    %402 = vector.broadcast %cst_166 : f32 to vector<1x128xf32>
    %403 = arith.divf %401, %402 : vector<1x128xf32>
    %404 = vector.extract_strided_slice %398 {offsets = [32, 0], sizes = [32, 128], strides = [1, 1]} : vector<64x128xf32> to vector<32x128xf32>
    %cst_167 = arith.constant dense<0.000000e+00> : vector<128xf32>
    %405 = vector.multi_reduction <add>, %404, %cst_167 [0] : vector<32x128xf32> to vector<128xf32>
    %406 = vector.shape_cast %405 : vector<128xf32> to vector<1x128xf32>
    %cst_168 = arith.constant 5.120000e+02 : f32
    %407 = vector.broadcast %cst_168 : f32 to vector<1x128xf32>
    %408 = arith.divf %406, %407 : vector<1x128xf32>
    %409 = arith.mulf %403, %403 : vector<1x128xf32>
    %410 = arith.subf %408, %409 : vector<1x128xf32>
    %cst_169 = arith.constant 0.000000e+00 : f32
    %411 = vector.broadcast %cst_169 : f32 to vector<1x128xf32>
    %412 = arith.maximumf %410, %411 : vector<1x128xf32>
    %413 = vector.broadcast %403 : vector<1x128xf32> to vector<32x128xf32>
    %414 = arith.subf %390, %413 : vector<32x128xf32>
    %cst_170 = arith.constant 9.99999974E-6 : f32
    %415 = vector.broadcast %cst_170 : f32 to vector<1x128xf32>
    %416 = arith.addf %412, %415 : vector<1x128xf32>
    %417 = math.rsqrt %416 : vector<1x128xf32>
    %418 = vector.broadcast %417 : vector<1x128xf32> to vector<32x128xf32>
    %419 = arith.mulf %414, %418 : vector<32x128xf32>
    %420 = arith.mulf %419, %392 : vector<32x128xf32>
    %421 = arith.addf %420, %394 : vector<32x128xf32>
    %422 = vector.extract_strided_slice %305 {offsets = [0, 384], sizes = [96, 128], strides = [1, 1]} : vector<96x512xf32> to vector<96x128xf32>
    %423 = vector.extract_strided_slice %422 {offsets = [0, 0], sizes = [32, 128], strides = [1, 1]} : vector<96x128xf32> to vector<32x128xf32>
    %424 = vector.extract_strided_slice %422 {offsets = [32, 0], sizes = [32, 128], strides = [1, 1]} : vector<96x128xf32> to vector<32x128xf32>
    %425 = vector.extract_strided_slice %422 {offsets = [64, 0], sizes = [32, 128], strides = [1, 1]} : vector<96x128xf32> to vector<32x128xf32>
    %426 = tpu.concatenate %423, %424, %425 in 1 : vector<32x128xf32>, vector<32x128xf32>, vector<32x128xf32> -> vector<32x384xf32>
    %427 = arith.truncf %426 : vector<32x384xf32> to vector<32x384xbf16>
    %cst_171 = arith.constant dense<0.000000e+00> : vector<32x128xf32>
    %428 = tpu.matmul %427, %307, %cst_171 {dimension_numbers = #tpu.dot_dimension_numbers<[1], [0], [0], [1], [0, 0, 1, 1], [], []>} : vector<32x384xbf16>, vector<384x128xbf16>, vector<32x128xf32> -> vector<32x128xf32>
    %c1_172 = arith.constant 1 : index
    %c0_173 = arith.constant 0 : index
    %c0_174 = arith.constant 0 : index
    %429 = vector.load %arg9[%c1_172, %c0_173, %c0_174] : memref<2x32x128xf32, #tpu.memory_space<vmem>>, vector<1x32x128xf32>
    %430 = vector.shape_cast %429 : vector<1x32x128xf32> to vector<32x128xf32>
    %c1_175 = arith.constant 1 : index
    %c0_176 = arith.constant 0 : index
    %c0_177 = arith.constant 0 : index
    %431 = vector.load %arg10[%c1_175, %c0_176, %c0_177] : memref<2x32x128xf32, #tpu.memory_space<vmem>>, vector<1x32x128xf32>
    %432 = vector.shape_cast %431 : vector<1x32x128xf32> to vector<32x128xf32>
    %433 = arith.mulf %428, %428 : vector<32x128xf32>
    %434 = tpu.concatenate %428, %433 in 0 : vector<32x128xf32>, vector<32x128xf32> -> vector<64x128xf32>
    %435 = arith.truncf %434 : vector<64x128xf32> to vector<64x128xbf16>
    %cst_178 = arith.constant dense<0.000000e+00> : vector<64x128xf32>
    %436 = tpu.matmul %435, %0, %cst_178 {dimension_numbers = #tpu.dot_dimension_numbers<[1], [0], [0], [1], [0, 0, 1, 1], [], []>} : vector<64x128xbf16>, vector<128x128xbf16>, vector<64x128xf32> -> vector<64x128xf32>
    %437 = vector.extract_strided_slice %436 {offsets = [0, 0], sizes = [32, 128], strides = [1, 1]} : vector<64x128xf32> to vector<32x128xf32>
    %cst_179 = arith.constant dense<0.000000e+00> : vector<128xf32>
    %438 = vector.multi_reduction <add>, %437, %cst_179 [0] : vector<32x128xf32> to vector<128xf32>
    %439 = vector.shape_cast %438 : vector<128xf32> to vector<1x128xf32>
    %cst_180 = arith.constant 5.120000e+02 : f32
    %440 = vector.broadcast %cst_180 : f32 to vector<1x128xf32>
    %441 = arith.divf %439, %440 : vector<1x128xf32>
    %442 = vector.extract_strided_slice %436 {offsets = [32, 0], sizes = [32, 128], strides = [1, 1]} : vector<64x128xf32> to vector<32x128xf32>
    %cst_181 = arith.constant dense<0.000000e+00> : vector<128xf32>
    %443 = vector.multi_reduction <add>, %442, %cst_181 [0] : vector<32x128xf32> to vector<128xf32>
    %444 = vector.shape_cast %443 : vector<128xf32> to vector<1x128xf32>
    %cst_182 = arith.constant 5.120000e+02 : f32
    %445 = vector.broadcast %cst_182 : f32 to vector<1x128xf32>
    %446 = arith.divf %444, %445 : vector<1x128xf32>
    %447 = arith.mulf %441, %441 : vector<1x128xf32>
    %448 = arith.subf %446, %447 : vector<1x128xf32>
    %cst_183 = arith.constant 0.000000e+00 : f32
    %449 = vector.broadcast %cst_183 : f32 to vector<1x128xf32>
    %450 = arith.maximumf %448, %449 : vector<1x128xf32>
    %451 = vector.broadcast %441 : vector<1x128xf32> to vector<32x128xf32>
    %452 = arith.subf %428, %451 : vector<32x128xf32>
    %cst_184 = arith.constant 9.99999974E-6 : f32
    %453 = vector.broadcast %cst_184 : f32 to vector<1x128xf32>
    %454 = arith.addf %450, %453 : vector<1x128xf32>
    %455 = math.rsqrt %454 : vector<1x128xf32>
    %456 = vector.broadcast %455 : vector<1x128xf32> to vector<32x128xf32>
    %457 = arith.mulf %452, %456 : vector<32x128xf32>
    %458 = arith.mulf %457, %430 : vector<32x128xf32>
    %459 = arith.addf %458, %432 : vector<32x128xf32>
    %460 = tpu.concatenate %345, %383, %421, %459 in 1 : vector<32x128xf32>, vector<32x128xf32>, vector<32x128xf32>, vector<32x128xf32> -> vector<32x512xf32>
    %cst_185 = arith.constant 0.000000e+00 : f32
    %461 = vector.broadcast %cst_185 : f32 to vector<32x512xf32>
    %462 = arith.maximumf %460, %461 : vector<32x512xf32>
    %463 = arith.addf %462, %297 : vector<32x512xf32>
    %cst_186 = arith.constant 0.000000e+00 : f32
    %464 = vector.broadcast %cst_186 : f32 to vector<32x512xf32>
    %465 = arith.maximumf %463, %464 : vector<32x512xf32>
    %c0_187 = arith.constant 0 : index
    %c0_188 = arith.constant 0 : index
    %466 = vector.load %arg13[%c0_187, %c0_188] : memref<10x32xbf16, #tpu.memory_space<vmem>>, vector<10x32xbf16>
    %467 = arith.truncf %465 : vector<32x512xf32> to vector<32x512xbf16>
    %cst_189 = arith.constant dense<0.000000e+00> : vector<10x512xf32>
    %468 = tpu.matmul %466, %467, %cst_189 {dimension_numbers = #tpu.dot_dimension_numbers<[1], [0], [0], [1], [0, 0, 1, 1], [], []>} : vector<10x32xbf16>, vector<32x512xbf16>, vector<10x512xf32> -> vector<10x512xf32>
    %469 = arith.truncf %468 : vector<10x512xf32> to vector<10x512xbf16>
    %c0_190 = arith.constant 0 : index
    %c0_191 = arith.constant 0 : index
    %470 = vector.load %arg12[%c0_190, %c0_191] : memref<512x32xbf16, #tpu.memory_space<vmem>>, vector<512x32xbf16>
    %cst_192 = arith.constant dense<0.000000e+00> : vector<10x32xf32>
    %471 = tpu.matmul %469, %470, %cst_192 {dimension_numbers = #tpu.dot_dimension_numbers<[1], [0], [0], [1], [0, 0, 1, 1], [], []>} : vector<10x512xbf16>, vector<512x32xbf16>, vector<10x32xf32> -> vector<10x32xf32>
    %c0_193 = arith.constant 0 : index
    %c0_194 = arith.constant 0 : index
    %472 = vector.load %arg14[%c0_193, %c0_194] : memref<10x1xf32, #tpu.memory_space<vmem>>, vector<10x1xf32>
    %473 = vector.broadcast %472 : vector<10x1xf32> to vector<10x32xf32>
    %474 = arith.addf %471, %473 : vector<10x32xf32>
    %c0_195 = arith.constant 0 : index
    %c0_196 = arith.constant 0 : index
    %c0_197 = arith.constant 0 : index
    %475 = vector.load %arg15[%c0_195, %c0_196, %c0_197] : memref<1x10x32xf32, #tpu.memory_space<vmem>>, vector<1x10x32xf32>
    %476 = vector.shape_cast %475 : vector<1x10x32xf32> to vector<10x32xf32>
    %477 = vector.shape_cast %474 : vector<10x32xf32> to vector<1x10x32xf32>
    tpu.vector_store %arg15[%c0_195, %c0_196, %c0_197], %477 {strides = array<i32>} : memref<1x10x32xf32, #tpu.memory_space<vmem>>, vector<1x10x32xf32>,
    return
  }
  func.func @transform_0(%arg0: i32) -> (i32, i32, i32) {
    %c0_i32 = arith.constant 0 : i32
    %c0_i32_0 = arith.constant 0 : i32
    %c0_i32_1 = arith.constant 0 : i32
    return %arg0, %c0_i32, %c0_i32_0 : i32, i32, i32
  }
  func.func @transform_1(%arg0: i32) -> (i32, i32) {
    %c0_i32 = arith.constant 0 : i32
    %c0_i32_0 = arith.constant 0 : i32
    %c0_i32_1 = arith.constant 0 : i32
    return %c0_i32, %c0_i32_0 : i32, i32
  }
  func.func @transform_2(%arg0: i32) -> (i32, i32) {
    %c0_i32 = arith.constant 0 : i32
    %c0_i32_0 = arith.constant 0 : i32
    %c0_i32_1 = arith.constant 0 : i32
    return %c0_i32, %c0_i32_0 : i32, i32
  }
  func.func @transform_3(%arg0: i32) -> (i32, i32) {
    %c0_i32 = arith.constant 0 : i32
    %c0_i32_0 = arith.constant 0 : i32
    %c0_i32_1 = arith.constant 0 : i32
    return %c0_i32, %c0_i32_0 : i32, i32
  }
  func.func @transform_4(%arg0: i32) -> (i32, i32) {
    %c0_i32 = arith.constant 0 : i32
    %c0_i32_0 = arith.constant 0 : i32
    %c0_i32_1 = arith.constant 0 : i32
    return %c0_i32, %c0_i32_0 : i32, i32
  }
  func.func @transform_5(%arg0: i32) -> (i32, i32, i32) {
    %c0_i32 = arith.constant 0 : i32
    %c0_i32_0 = arith.constant 0 : i32
    %c0_i32_1 = arith.constant 0 : i32
    %c0_i32_2 = arith.constant 0 : i32
    return %c0_i32, %c0_i32_0, %c0_i32_1 : i32, i32, i32
  }
  func.func @transform_6(%arg0: i32) -> (i32, i32, i32) {
    %c0_i32 = arith.constant 0 : i32
    %c0_i32_0 = arith.constant 0 : i32
    %c0_i32_1 = arith.constant 0 : i32
    %c0_i32_2 = arith.constant 0 : i32
    return %c0_i32, %c0_i32_0, %c0_i32_1 : i32, i32, i32
  }
  func.func @transform_7(%arg0: i32) -> (i32, i32, i32) {
    %c0_i32 = arith.constant 0 : i32
    %c0_i32_0 = arith.constant 0 : i32
    %c0_i32_1 = arith.constant 0 : i32
    %c0_i32_2 = arith.constant 0 : i32
    return %c0_i32, %c0_i32_0, %c0_i32_1 : i32, i32, i32
  }
  func.func @transform_8(%arg0: i32) -> (i32, i32, i32) {
    %c0_i32 = arith.constant 0 : i32
    %c0_i32_0 = arith.constant 0 : i32
    %c0_i32_1 = arith.constant 0 : i32
    %c0_i32_2 = arith.constant 0 : i32
    return %c0_i32, %c0_i32_0, %c0_i32_1 : i32, i32, i32
  }
  func.func @transform_9(%arg0: i32) -> (i32, i32, i32) {
    %c0_i32 = arith.constant 0 : i32
    %c0_i32_0 = arith.constant 0 : i32
    %c0_i32_1 = arith.constant 0 : i32
    %c0_i32_2 = arith.constant 0 : i32
    return %c0_i32, %c0_i32_0, %c0_i32_1 : i32, i32, i32
  }
  func.func @transform_10(%arg0: i32) -> (i32, i32) {
    %c0_i32 = arith.constant 0 : i32
    %c0_i32_0 = arith.constant 0 : i32
    %c0_i32_1 = arith.constant 0 : i32
    return %c0_i32, %c0_i32_0 : i32, i32
  }
  func.func @transform_11(%arg0: i32) -> (i32, i32) {
    %c0_i32 = arith.constant 0 : i32
    %c0_i32_0 = arith.constant 0 : i32
    %c0_i32_1 = arith.constant 0 : i32
    return %c0_i32, %c0_i32_0 : i32, i32
  }
  func.func @transform_12(%arg0: i32) -> (i32, i32) {
    %c0_i32 = arith.constant 0 : i32
    %c0_i32_0 = arith.constant 0 : i32
    %c0_i32_1 = arith.constant 0 : i32
    return %c0_i32, %c0_i32_0 : i32, i32
  }
  func.func @transform_13(%arg0: i32) -> (i32, i32) {
    %c0_i32 = arith.constant 0 : i32
    %c0_i32_0 = arith.constant 0 : i32
    %c0_i32_1 = arith.constant 0 : i32
    return %c0_i32, %c0_i32_0 : i32, i32
  }
  func.func @transform_14(%arg0: i32) -> (i32, i32, i32) {
    %c0_i32 = arith.constant 0 : i32
    %c0_i32_0 = arith.constant 0 : i32
    %c0_i32_1 = arith.constant 0 : i32
    return %arg0, %c0_i32, %c0_i32_0 : i32, i32, i32
  }
}

</mosaic_0001>

<bundles_post_ra>
// kernel: rtstgcn_forward.1
= control target key start
LH: loop header
LB: loop body
LE: loop exit
PB: predicated region body
PF: predicated region fallthrough
CT: control target
= control target key end

     0   :  { %s4500_s29 = smov 0   ;;  %s6277_s0 = inlined_call_operand.vmem [shape: f32[2,4,512], index: 0, kind: input, shape index: {}]   ;;  %s6278_s1 = inlined_call_operand.vmem [shape: f32[4,128], index: 1, kind: input, shape index: {}]   ;;  %s6279_s2 = inlined_call_operand.vmem [shape: f32[4,128], index: 2, kind: input, shape index: {}]   ;;  %s6280_s3 = inlined_call_operand.vmem [shape: bf16[32,4], index: 3, kind: input, shape index: {}]   ;;  %s6281_s4 = inlined_call_operand.vmem [shape: f32[32,1], index: 4, kind: input, shape index: {}]   ;;  %s6282_s5 = inlined_call_operand.vmem [shape: bf16[2,96,32], index: 5, kind: input, shape index: {}]   ;;  %s6283_s6 = inlined_call_operand.vmem [shape: f32[2,96,1], index: 6, kind: input, shape index: {}]   ;;  %s6284_s7 = inlined_call_operand.vmem [shape: bf16[2,384,128], index: 7, kind: input, shape index: {}]   ;;  %s6285_s8 = inlined_call_operand.vmem [shape: f32[2,32,128], index: 8, kind: input, shape index: {}]   ;;  %s6286_s9 = inlined_call_operand.vmem [shape: f32[2,32,128], index: 9, kind: input, shape index: {}]   ;;  %s6287_s10 = inlined_call_operand.vmem [shape: bf16[128,128], index: 10, kind: input, shape index: {}]   ;;  %s6288_s11 = inlined_call_operand.vmem [shape: bf16[512,32], index: 11, kind: input, shape index: {}]   ;;  %s6289_s12 = inlined_call_operand.vmem [shape: bf16[10,32], index: 12, kind: input, shape index: {}]   ;;  %s6290_s13 = inlined_call_operand.vmem [shape: f32[10,1], index: 13, kind: input, shape index: {}]   ;;  %s6291_s14 = inlined_call_operand.vmem [shape: f32[2,10,32], index: 14, kind: output, shape index: {}]  }
   0x1 LB: > { %s3688_s30 = sadd.s32 4294967295, %s4420_s29   ;;  %p3692_p0 = scmp.ge.s32.totalorder %s4420_s29, 1  ;;  %s4420_s29 = sphi %s4500_s29, %s24_s29  }
   0x2   : > { %p412_p1 = scmp.lt.s32.totalorder %s4420_s29, 3 }
   0x4   : > { %p413_p2 = pnand %p3692_p0, %p412_p1 }
   0x6   : > { %416 = sbr.rel (%p413_p2) target bundleno = 2191 (0x88f), region = 76 }
   0xb   : > { %v4511_v0 = vld [vmem:[%s6287_s10 + $0x38] sm:$0xff]  ;;  %p458_p3 = scmp.lt.s32.totalorder %s3688_s30, 1  ;;  %v4518_v1 = vld [vmem:[%s6287_s10 + $0x30] sm:$0xff]  ;;  %v4537_v2 = vld [vmem:[%s6287_s10 + $0x28] sm:$0xff]  ;;  %vm495_vm0 = vcmask 1043456   ;;  %v4422_v30 = vmov 0  }
   0xc   : > { %546 = vmatpush.bf16.msra.mxu0 %v4511_v0  ;;  %617 = vmatpush.bf16.msra.mxu1 %v4511_v0  ;;  %v4551_v5 = vld [vmem:[%s6287_s10 + $0x20] sm:$0xff]  ;;  %v4560_v6 = vld [vmem:[%s6287_s10 + $0x18] sm:$0xff]  ;;  %v4573_v9 = vld [vmem:[%s6287_s10 + $0x10] sm:$0xff]  ;;  %v4423_v34 = vmov 64.0   ;;  %vm838_vm8 = vcmask 1041408   ;;  %vm831_vm9 = vcmask 31744  }
   0xd   : > { %s6400_s30 = smov (!%p458_p3, %s3688_s30), 1  ;;  %675 = vmatpush.bf16.msra.mxu2 %v4511_v0  ;;  %739 = vmatpush.bf16.msra.mxu3 %v4511_v0  ;;  %v4584_v11 = vld [vmem:[%s6287_s10 + $0x8] sm:$0xff]  ;;  %v4593_v13 = vld [vmem:[%s6287_s10] sm:$0xff]  ;;  %v799_v31 = vld [vmem:[%s6281_s4 + $0x10] sm:$0xff]  ;;  %4370 = vrcp.f32 %v4423_v34 }
   0xe   : > { %s4251_s19 = sshll.u32 %s6400_s30, 4  ;;  %4367 = vset.pattern.permute.xlu0 %v4422_v30  ;;  %4368 = vset.pattern.permute.xlu1 %v4422_v30  ;;  %v797_v32 = vld [vmem:[%s6281_s4] sm:$0xff]  ;;  %v800_v33 = vld [vmem:[%s6281_s4 + $0x18] sm:$0xff]  ;;  %v798_v35 = vld [vmem:[%s6281_s4 + $0x8] sm:$0xff] }
   0xf   : > { %s4530_s22 = scalar_lea.vmem %s6277_s0, %s4251_s19  ;;  %813 = vperm.xlu0 %4367, %v799_v31   ;;  %4369 = vset.pattern.permute.xlu2 %v4422_v30  ;;  %v947_v37 = vld [vmem:[%s6283_s6] sm:$0xff]  ;;  %v948_v39 = vld [vmem:[%s6283_s6 + $0x8] sm:$0xff]  ;;  %v957_v53 = vld [vmem:[%s6283_s6 + $0x50] sm:$0xff]  ;;  %s467_s18 = scalar_lea.vmem %s6291_s14, %s4251_s19 }
  0x10   : > { %547 = vmatpush.bf16.msra.mxu0 %v4518_v1  ;;  %618 = vmatpush.bf16.msra.mxu1 %v4518_v1  ;;  %v4540_v3 = vld [vmem:[%s4530_s22] sm:$0xff]  ;;  %v4598_v15 = vld [vmem:[%s4530_s22 + $0x8] sm:$0xff] }
  0x11   : > { %676 = vmatpush.bf16.msra.mxu2 %v4518_v1  ;;  %740 = vmatpush.bf16.msra.mxu3 %v4518_v1  ;;  %v489_v4 = vmul.f32 %v4540_v3, %v4540_v3  ;;  %v4565_v8 = vrot.slane %v4540_v3, 4  ;;  %v667_v17 = vmul.f32 %v4598_v15, %v4598_v15  ;;  %v4612_v23 = vrot.slane %v4598_v15, 4  ;;  %v952_v42 = vld [vmem:[%s6283_s6 + $0x28] sm:$0xff] }
  0x12   : > { %803 = vperm.xlu1 %4368, %v797_v32   ;;  %v954_v32 = vld [vmem:[%s6283_s6 + $0x38] sm:$0xff] }
  0x13   : > { %492 = vst [vmem:[#allocation1 + $0x1] ss:$2 sm:$0xff] %v489_v4  ;;  %v606_v10 = vmul.f32 %v4565_v8, %v4565_v8  ;;  %v728_v25 = vmul.f32 %v4612_v23, %v4612_v23  ;;  %v4371_v36 = vpop.eup %4370  ;;  %v949_v4 = vld [vmem:[%s6283_s6 + $0x10] sm:$0xff] }
  0x14   : > { %548 = vmatpush.bf16.msra.mxu0 %v4537_v2  ;;  %619 = vmatpush.bf16.msra.mxu1 %v4537_v2  ;;  %v567_v38 = vmul.f32 64.0, %v4371_v36  ;;  %vm571_vm1 = vweird.f32 %v4371_v36 }
  0x15   : > { %677 = vmatpush.bf16.msra.mxu2 %v4537_v2  ;;  %741 = vmatpush.bf16.msra.mxu3 %v4537_v2 }
  0x16   : > { %v568_v40 = vsub.f32 1.0, %v567_v38 }
  0x17   : > { %818 = vperm.xlu0 %4367, %v800_v33  }
  0x18   : > { %549 = vmatpush.bf16.msra.mxu0 %v4551_v5  ;;  %620 = vmatpush.bf16.msra.mxu1 %v4551_v5  ;;  %v569_v46 = vmul.f32 %v4371_v36, %v568_v40 }
  0x19   : > { %678 = vmatpush.bf16.msra.mxu2 %v4551_v5  ;;  %742 = vmatpush.bf16.msra.mxu3 %v4551_v5 }
  0x1a   : > { %v493_v7 = vld.sshfl [vmem:[#allocation1] sm:$0xff pattern:$0x75316420]  ;;  %808 = vperm.xlu1 %4368, %v798_v35   ;;  %v570_v58 = vadd.f32 %v4371_v36, %v569_v46 }
  0x1b   : > { %607 = vst [vmem:[#allocation1] ss:$2 sm:$0xff] %v4540_v3  ;;  %v496_v14 = vsel %vm495_vm0, %v4540_v3, %v493_v7 }
  0x1c   : > { %550 = vmatpush.bf16.msra.mxu0 %v4560_v6  ;;  %621 = vmatpush.bf16.msra.mxu1 %v4560_v6  ;;  %v497_v16 = vpack.c.bf16 %v496_v14, %v496_v14 }
  0x1d   : > { %679 = vmatpush.bf16.msra.mxu2 %v4560_v6  ;;  %743 = vmatpush.bf16.msra.mxu3 %v4560_v6 }
  0x1f   : > { %961 = vperm.xlu0 %4367, %v947_v37  }
  0x20   : > { %551 = vmatpush.bf16.msra.mxu0 %v4573_v9  ;;  %622 = vmatpush.bf16.msra.mxu1 %v4573_v9 }
  0x21   : > { %680 = vmatpush.bf16.msra.mxu2 %v4573_v9  ;;  %744 = vmatpush.bf16.msra.mxu3 %v4573_v9 }
  0x22   : > { %v608_v12 = vld.sshfl [vmem:[#allocation1 + $0x8] sm:$0xff pattern:$0x75316420]  ;;  %966 = vperm.xlu1 %4368, %v948_v39  }
  0x23   : > { %612 = vst [vmem:[#allocation1 + $0x1] ss:$2 sm:$0xff] %v606_v10 }
  0x24   : > { %552 = vmatpush.bf16.msra.mxu0 %v4584_v11  ;;  %623 = vmatpush.bf16.msra.mxu1 %v4584_v11 }
  0x25   : > { %681 = vmatpush.bf16.msra.mxu2 %v4584_v11  ;;  %745 = vmatpush.bf16.msra.mxu3 %v4584_v11 }
  0x27   : > { %986 = vperm.xlu0 %4367, %v952_v42  }
  0x28   : > { %553 = vmatpush.bf16.msra.mxu0 %v4593_v13  ;;  %624 = vmatpush.bf16.msra.mxu1 %v4593_v13 }
  0x29   : > { %682 = vmatpush.bf16.msra.mxu2 %v4593_v13  ;;  %746 = vmatpush.bf16.msra.mxu3 %v4593_v13 }
  0x2a   : > { %v613_v18 = vld.sshfl [vmem:[#allocation1] sm:$0xff pattern:$0x75316420]  ;;  %1011 = vperm.xlu1 %4368, %v957_v53  }
  0x2b   : > { %554 = vmatmul.bf16.vlgmr.msra.gmra.mxu0 %v497_v16  ;;  %v615_v19 = vsel %vm495_vm0, %v608_v12, %v613_v18  ;;  %670 = vst [vmem:[#allocation1 + $0x1] ss:$2 sm:$0xff] %v667_v17  ;;  %v4649_v16 = vsel %vm571_vm1, %v4371_v36, %v570_v58 }
  0x2c   : > { %v616_v20 = vpack.c.bf16 %v615_v19, %v615_v19 }
  0x2e   : > { %625 = vmatmul.bf16.vlgmr.msra.gmra.mxu1 %v616_v20 }
  0x2f   : > { %971 = vperm.xlu0 %4367, %v949_v4  }
  0x32   : > { %v671_v21 = vld.sshfl [vmem:[#allocation1] sm:$0xff pattern:$0x75316420] }
  0x33   : > { %v673_v22 = vsel %vm495_vm0, %v4598_v15, %v671_v21  ;;  %729 = vst [vmem:[#allocation1] ss:$2 sm:$0xff] %v4598_v15 }
  0x34   : > { %v674_v24 = vpack.c.bf16 %v673_v22, %v673_v22  ;;  %v950_v22 = vld [vmem:[%s6283_s6 + $0x18] sm:$0xff] }
  0x35   : > { %976 = vperm.xlu1 %4368, %v950_v22  }
  0x36   : > { %683 = vmatmul.bf16.vlgmr.msra.gmra.mxu2 %v674_v24 }
  0x37   : > { %996 = vperm.xlu0 %4367, %v954_v32  }
  0x3a   : > { %v730_v26 = vld.sshfl [vmem:[#allocation1 + $0x8] sm:$0xff pattern:$0x75316420] }
  0x3b   : > { %734 = vst [vmem:[#allocation1 + $0x1] ss:$2 sm:$0xff] %v728_v25 }
  0x42   : > { %v735_v27 = vld.sshfl [vmem:[#allocation1] sm:$0xff pattern:$0x75316420] }
  0x43   : > { %v737_v28 = vsel %vm495_vm0, %v730_v26, %v735_v27 }
  0x44   : > { %v738_v29 = vpack.c.bf16 %v737_v28, %v737_v28 }
  0x46   : > { %747 = vmatmul.bf16.vlgmr.msra.gmra.mxu3 %v738_v29 }
  0xa8   : > { %v555_v41 = vpop.f32.mrf.mxu0 }
  0xa9   : > { %v559_v43 = vsel %vm495_vm0, %v555_v41, 0.0  ;;  %v575_v44 = vrot.slane %v555_v41, 4 }
  0xaa   : > { %v560_v45 = vrot.slane %v559_v43, 4 }
  0xab   : > { %v577_v47 = vsel %vm495_vm0, %v575_v44, 0.0  ;;  %v626_v48 = vpop.f32.mrf.mxu1  ;;  %v3901_v44 = vld [vmem:[%s6283_s6 + $0x60] sm:$0xff] }
  0xac   : > { %v561_v49 = vadd.f32 %v560_v45, %v559_v43  ;;  %v578_v50 = vrot.slane %v577_v47, 4  ;;  %v630_v51 = vsel %vm495_vm0, %v626_v48, 0.0  ;;  %v639_v52 = vrot.slane %v626_v48, 4  ;;  %2115 = vperm.xlu1 %4368, %v3901_v44   ;;  %v3907_v44 = vld [vmem:[%s6283_s6 + $0x90] sm:$0xff] }
  0xad   : > { %v631_v54 = vrot.slane %v630_v51, 4 }
  0xae   : > { %v562_v55 = vrot.slane %v561_v49, 2  ;;  %v579_v56 = vadd.f32 %v578_v50, %v577_v47  ;;  %v641_v57 = vsel %vm495_vm0, %v639_v52, 0.0  ;;  %v3905_v52 = vld [vmem:[%s6283_s6 + $0x80] sm:$0xff] }
  0xaf   : > { %v632_v59 = vadd.f32 %v631_v54, %v630_v51  ;;  %v642_v60 = vrot.slane %v641_v57, 4  ;;  %2135 = vperm.xlu0 %4367, %v3905_v52  }
  0xb0   : > { %v563_v61 = vadd.f32 %v562_v55, %v561_v49  ;;  %v580_v62 = vrot.slane %v579_v56, 2  ;;  %v557_v63 = vpop.f32.mrf.mxu0 }
  0xb1   : > { %v633_v7 = vrot.slane %v632_v59, 2  ;;  %v643_v10 = vadd.f32 %v642_v60, %v641_v57  ;;  %v3906_v57 = vld [vmem:[%s6283_s6 + $0x88] sm:$0xff] }
  0xb2   : > { %v564_v12 = vrot.slane %v563_v61, 1  ;;  %v581_v14 = vadd.f32 %v580_v62, %v579_v56  ;;  %v3910_v63 = vld [vmem:[%s6283_s6 + $0xa8] sm:$0xff] }
  0xb3   : > { %v634_v17 = vadd.f32 %v633_v7, %v632_v59  ;;  %v644_v18 = vrot.slane %v643_v10, 2  ;;  %v628_v19 = vpop.f32.mrf.mxu1 }
  0xb4   : > { %v565_v20 = vadd.f32 %v564_v12, %v563_v61  ;;  %v582_v21 = vrot.slane %v581_v14, 1  ;;  %2140 = vperm.xlu1 %4368, %v3906_v57  }
  0xb5   : > { %v635_v24 = vrot.slane %v634_v17, 1  ;;  %v645_v25 = vadd.f32 %v644_v18, %v643_v10 }
  0xb6   : > { %v4655_v26 = vmul.f32 %v4649_v16, %v565_v20  ;;  %v583_v27 = vadd.f32 %v582_v21, %v581_v14 }
  0xb7   : > { %v636_v28 = vadd.f32 %v635_v24, %v634_v17  ;;  %v646_v29 = vrot.slane %v645_v25, 1  ;;  %2160 = vperm.xlu0 %4367, %v3910_v63  }
  0xb8   : > { %v584_v30 = vmul.f32 %v583_v27, %v4649_v16  ;;  %v585_v31 = vmul.f32 %v4655_v26, %v4655_v26 }
  0xb9   : > { %v4664_v33 = vmul.f32 %v636_v28, %v4649_v16  ;;  %v647_v34 = vadd.f32 %v646_v29, %v645_v25  ;;  %v684_v35 = vpop.f32.mrf.mxu2 }
  0xba   : > { %v586_v36 = vsub.f32 %v584_v30, %v585_v31  ;;  %v688_v37 = vsel %vm495_vm0, %v684_v35, 0.0  ;;  %v697_v38 = vrot.slane %v684_v35, 4  ;;  %v3903_v30 = vld [vmem:[%s6283_s6 + $0x70] sm:$0xff] }
  0xbb   : > { %v648_v39 = vmul.f32 %v647_v34, %v4649_v16  ;;  %v649_v40 = vmul.f32 %v4664_v33, %v4664_v33  ;;  %v689_v41 = vrot.slane %v688_v37, 4 }
  0xbc   : > { %v587_v42 = vmax.f32 %v586_v36, 0.0  ;;  %v699_v43 = vsel %vm495_vm0, %v697_v38, 0.0  ;;  %2125 = vperm.xlu1 %4368, %v3903_v30  }
  0xbd   : > { %v650_v45 = vsub.f32 %v648_v39, %v649_v40  ;;  %v690_v46 = vadd.f32 %v689_v41, %v688_v37  ;;  %v700_v47 = vrot.slane %v699_v43, 4  ;;  %v588_v41 = vsub.f32 %v4540_v3, %v4655_v26 }
  0xbe   : > { %v589_v48 = vadd.f32 1e-05, %v587_v42  ;;  %v652_v42 = vsub.f32 %v4565_v8, %v4664_v33  ;;  %v3908_v33 = vld [vmem:[%s6283_s6 + $0x98] sm:$0xff] }
  0xbf   : > { %v651_v49 = vmax.f32 %v650_v45, 0.0  ;;  %v691_v50 = vrot.slane %v690_v46, 2  ;;  %v701_v51 = vadd.f32 %v700_v47, %v699_v43  ;;  %v4705_v47 = vld [vmem:[%s6278_s1] sm:$0xf]  ;;  %2145 = vperm.xlu0 %4367, %v3907_v44  }
  0xc0   : > { %4372 = vrsqrt.f32 %v589_v48  ;;  %vm596_vm3 = vweird.f32 %v589_v48 }
  0xc1   : > { %v653_v53 = vadd.f32 1e-05, %v651_v49  ;;  %v692_v54 = vadd.f32 %v691_v50, %v690_v46  ;;  %v702_v55 = vrot.slane %v701_v51, 2  ;;  %v686_v56 = vpop.f32.mrf.mxu2 }
  0xc3   : > { %4374 = vrsqrt.f32 %v653_v53  ;;  %v693_v58 = vrot.slane %v692_v54, 1  ;;  %v703_v59 = vadd.f32 %v702_v55, %v701_v51  ;;  %vm660_vm4 = vweird.f32 %v653_v53  ;;  %v4715_v51 = vld [vmem:[%s6279_s2] sm:$0xf] }
  0xc4   : > { %2150 = vperm.xlu1 %4368, %v3908_v33  }
  0xc5   : > { %v694_v60 = vadd.f32 %v693_v58, %v692_v54  ;;  %v704_v61 = vrot.slane %v703_v59, 1  ;;  %v3912_v58 = vld [vmem:[%s6283_s6 + $0xb8] sm:$0xff] }
  0xc6   : > { %v4373_v62 = vpop.eup %4372 }
  0xc7   : > { %v4684_v4 = vmul.f32 %v694_v60, %v4649_v16  ;;  %v705_v7 = vadd.f32 %v704_v61, %v703_v59  ;;  %v591_v10 = vmul.f32 %v4373_v62, %v589_v48  ;;  %vm597_vm2 = vweird.f32 %v4373_v62  ;;  %2170 = vperm.xlu0 %4367, %v3912_v58  }
  0xc8   : > { %vm598_vm6 = vmor %vm596_vm3, %vm597_vm2 }
  0xc9   : > { %v4375_v12 = vpop.eup %4374  ;;  %v706_v14 = vmul.f32 %v705_v7, %v4649_v16  ;;  %v707_v17 = vmul.f32 %v4684_v4, %v4684_v4  ;;  %v748_v18 = vpop.f32.mrf.mxu3  ;;  %v592_v19 = vmul.f32 %v4373_v62, %v591_v10 }
  0xca   : > { %v752_v20 = vsel %vm495_vm0, %v748_v18, 0.0  ;;  %v761_v21 = vrot.slane %v748_v18, 4  ;;  %v655_v22 = vmul.f32 %v4375_v12, %v653_v53  ;;  %vm661_vm5 = vweird.f32 %v4375_v12  ;;  %v4261_v18 = vld [vmem:[%s6280_s3] sm:$0xff] }
  0xcb   : > { %v708_v24 = vsub.f32 %v706_v14, %v707_v17  ;;  %v753_v25 = vrot.slane %v752_v20, 4  ;;  %v593_v27 = vmul.f32 0.5, %v592_v19  ;;  %vm662_vm7 = vmor %vm660_vm4, %vm661_vm5 }
  0xcc   : > { %v763_v28 = vsel %vm495_vm0, %v761_v21, 0.0  ;;  %v656_v29 = vmul.f32 %v4375_v12, %v655_v22  ;;  %vm1049_vm0 = vcmask 261120  }
  0xcd   : > { %v709_v31 = vmax.f32 %v708_v24, 0.0  ;;  %v754_v32 = vadd.f32 %v753_v25, %v752_v20  ;;  %v764_v34 = vrot.slane %v763_v28, 4  ;;  %v594_v35 = vsub.f32 1.5, %v593_v27 }
  0xce   : > { %v657_v36 = vmul.f32 0.5, %v656_v29  ;;  %v710_v29 = vsub.f32 %v4598_v15, %v4684_v4 }
  0xcf   : > { %v711_v37 = vadd.f32 1e-05, %v709_v31  ;;  %v755_v38 = vrot.slane %v754_v32, 2  ;;  %v765_v39 = vadd.f32 %v764_v34, %v763_v28  ;;  %v595_v40 = vmul.f32 %v4373_v62, %v594_v35 }
  0xd0   : > { %v658_v43 = vsub.f32 1.5, %v657_v36 }
  0xd1   : > { %4376 = vrsqrt.f32 %v711_v37  ;;  %v756_v45 = vadd.f32 %v755_v38, %v754_v32  ;;  %v766_v46 = vrot.slane %v765_v39, 2  ;;  %v599_v48 = vsel %vm598_vm6, %v4373_v62, %v595_v40  ;;  %v750_v3 = vpop.f32.mrf.mxu3 }
  0xd2   : > { %v600_v8 = vmul.f32 %v599_v48, %v588_v41  ;;  %v659_v26 = vmul.f32 %v4375_v12, %v658_v43  ;;  %vm718_vm10 = vweird.f32 %v711_v37 }
  0xd3   : > { %v757_v49 = vrot.slane %v756_v45, 1  ;;  %v767_v50 = vadd.f32 %v766_v46, %v765_v39  ;;  %v4262_v39 = vld [vmem:[%s6280_s3 + $0x8] sm:$0xff] }
  0xd4   : > { %v601_v52 = vmul.f32 %v600_v8, %v4705_v47  ;;  %v663_v54 = vsel %vm662_vm7, %v4375_v12, %v659_v26 }
  0xd5   : > { %v758_v53 = vadd.f32 %v757_v49, %v756_v45  ;;  %v768_v55 = vrot.slane %v767_v50, 1  ;;  %v664_v56 = vmul.f32 %v663_v54, %v652_v42 }
  0xd6   : > { %v602_v57 = vadd.f32 %v601_v52, %v4715_v51  ;;  %v4754_v52 = vpop.permute.xlu1 %803 }
  0xd7   : > { %v4377_v59 = vpop.eup %4376  ;;  %v759_v60 = vmul.f32 %v758_v53, %v4649_v16  ;;  %v769_v61 = vadd.f32 %v768_v55, %v767_v50  ;;  %v665_v62 = vmul.f32 %v664_v56, %v4705_v47  ;;  %v814_v50 = vpop.permute.xlu0 %813 }
  0xd8   : > { %v793_v63 = vpack.c.bf16 %v602_v57, %v602_v57  ;;  %v713_v7 = vmul.f32 %v4377_v59, %v711_v37  ;;  %vm719_vm11 = vweird.f32 %v4377_v59 }
  0xd9   : > { %v770_v10 = vmul.f32 %v769_v61, %v4649_v16  ;;  %v771_v12 = vmul.f32 %v759_v60, %v759_v60  ;;  %v666_v14 = vadd.f32 %v665_v62, %v4715_v51  ;;  %v3370_v16 = vld [vmem:[%s6290_s13] sm:$0xff]  ;;  %vm720_vm12 = vmor %vm718_vm10, %vm719_vm11  ;;  %v774_v42 = vsub.f32 %v4612_v23, %v759_v60 }
  0xda   : > { %v840_v17 = vsel %vm838_vm8, %v793_v63, 0  ;;  %v714_v19 = vmul.f32 %v4377_v59, %v713_v7  ;;  %3374 = vperm.xlu1 %4368, %v3370_v16  }
  0xdb   : > { %v772_v20 = vsub.f32 %v770_v10, %v771_v12  ;;  %858 = vmatpush.bf16.msrb.mxu0 %v840_v17  ;;  %v794_v21 = vpack.c.bf16 %v666_v14, %v666_v14 }
  0xdc   : > { %v715_v22 = vmul.f32 0.5, %v714_v19 }
  0xdd   : > { %v773_v24 = vmax.f32 %v772_v20, 0.0  ;;  %v843_v25 = vsel %vm838_vm8, %v794_v21, 0  ;;  %v4263_v20 = vld [vmem:[%s6282_s5] sm:$0xff] }
  0xde   : > { %877 = vmatpush.bf16.msrb.mxu1 %v843_v25  ;;  %3737 = vmatmul.msk.bf16.vlgmr.msrb.gmra.mxu0 %vm831_vm9, %v4261_v18  ;;  %v716_v27 = vsub.f32 1.5, %v715_v22  ;;  %v809_v58 = vpop.permute.xlu1 %808  ;;  %v956_v22 = vld [vmem:[%s6283_s6 + $0x48] sm:$0xff]  ;;  %v951_v25 = vld [vmem:[%s6283_s6 + $0x20] sm:$0xff] }
  0xdf   : > { %v775_v28 = vadd.f32 1e-05, %v773_v24  ;;  %v819_v53 = vpop.permute.xlu0 %818 }
  0xe0   : > { %v717_v30 = vmul.f32 %v4377_v59, %v716_v27 }
  0xe1   : > { %4378 = vrsqrt.f32 %v775_v28  ;;  %3739 = vmatmul.msk.bf16.vlgmr.msrb.gmra.mxu1 %vm831_vm9, %v4261_v18  ;;  %vm782_vm13 = vweird.f32 %v775_v28 }
  0xe2   : > { %v721_v31 = vsel %vm720_vm12, %v4377_v59, %v717_v30  ;;  %v955_v59 = vld [vmem:[%s6283_s6 + $0x40] sm:$0xff] }
  0xe3   : > { %v722_v32 = vmul.f32 %v721_v31, %v710_v29  ;;  %1001 = vperm.xlu2 %4369, %v955_v59   ;;  %v4264_v31 = vld [vmem:[%s6282_s5 + $0x8] sm:$0xff]  ;;  %v4938_v59 = vld [vmem:[%s6284_s7 + $0x78] sm:$0xff] }
  0xe5   : > { %v723_v34 = vmul.f32 %v722_v32, %v4705_v47  ;;  %v958_v32 = vld [vmem:[%s6283_s6 + $0x58] sm:$0xff] }
  0xe7   : > { %v4379_v35 = vpop.eup %4378  ;;  %v724_v36 = vadd.f32 %v723_v34, %v4715_v51 }
  0xe8   : > { %v777_v37 = vmul.f32 %v4379_v35, %v775_v28  ;;  %vm783_vm14 = vweird.f32 %v4379_v35 }
  0xe9   : > { %v795_v38 = vpack.c.bf16 %v724_v36, %v724_v36  ;;  %vm784_vm15 = vmor %vm782_vm13, %vm783_vm14 }
  0xea   : > { %v778_v40 = vmul.f32 %v4379_v35, %v777_v37 }
  0xeb   : > { %v846_v15 = vsel %vm838_vm8, %v795_v38, 0  ;;  %1006 = vperm.xlu2 %4369, %v956_v22   ;;  %v4980_v22 = vpop.permute.xlu1 %966 }
  0xec   : > { %896 = vmatpush.bf16.msrb.mxu2 %v846_v15  ;;  %v779_v4 = vmul.f32 0.5, %v778_v40 }
  0xee   : > { %3738 = vmatmul.msk.bf16.gmra.mxu0 %vm831_vm9, %v4262_v39  ;;  %v780_v41 = vsub.f32 1.5, %v779_v4 }
  0xef   : > { %3741 = vmatmul.msk.bf16.vlgmr.msrb.gmra.mxu2 %vm831_vm9, %v4261_v18 }
  0xf0   : > { %v781_v43 = vmul.f32 %v4379_v35, %v780_v41  ;;  %v4265_v41 = vld [vmem:[%s6282_s5 + $0x10] sm:$0xff] }
  0xf1   : > { %3740 = vmatmul.msk.bf16.gmra.mxu1 %vm831_vm9, %v4262_v39 }
  0xf2   : > { %v785_v44 = vsel %vm784_vm15, %v4379_v35, %v781_v43 }
  0xf3   : > { %v786_v45 = vmul.f32 %v785_v44, %v774_v42  ;;  %981 = vperm.xlu2 %4369, %v951_v25   ;;  %v3902_v42 = vld [vmem:[%s6283_s6 + $0x68] sm:$0xff] }
  0xf5   : > { %v787_v46 = vmul.f32 %v786_v45, %v4705_v47 }
  0xf7   : > { %v788_v48 = vadd.f32 %v787_v46, %v4715_v51 }
  0xf9   : > { %v796_v3 = vpack.c.bf16 %v788_v48, %v788_v48  ;;  %v3909_v48 = vld [vmem:[%s6283_s6 + $0xa0] sm:$0xff] }
  0xfb   : > { %v849_v8 = vsel %vm838_vm8, %v796_v3, 0  ;;  %1016 = vperm.xlu2 %4369, %v958_v32   ;;  %v4266_v3 = vld [vmem:[%s6282_s5 + $0x18] sm:$0xff] }
  0xfc   : > { %915 = vmatpush.bf16.msrb.mxu3 %v849_v8  ;;  %v3904_v8 = vld [vmem:[%s6283_s6 + $0x78] sm:$0xff] }
  0xff   : > { %3742 = vmatmul.msk.bf16.gmra.mxu2 %vm831_vm9, %v4262_v39  ;;  %3743 = vmatmul.msk.bf16.vlgmr.msrb.gmra.mxu3 %vm831_vm9, %v4261_v18 }
 0x10f   : > { %3744 = vmatmul.msk.bf16.gmra.mxu3 %vm831_vm9, %v4262_v39  ;;  %v953_v39 = vld [vmem:[%s6283_s6 + $0x30] sm:$0xff] }
 0x110   : > { %991 = vperm.xlu2 %4369, %v953_v39  }
 0x118   : > { %2120 = vperm.xlu2 %4369, %v3902_v42   ;;  %v4291_v42 = vld [vmem:[%s6284_s7 + $0xb0] sm:$0xff] }
 0x120   : > { %2155 = vperm.xlu2 %4369, %v3909_v48  }
 0x128   : > { %2130 = vperm.xlu2 %4369, %v3904_v8  }
 0x13d   : > { %v5013_v39 = vpop.permute.xlu2 %1001 }
 0x15b   : > { %v860_v23 = vpop.f32.mrf.mxu0 }
 0x15c   : > { %v4772_v10 = vadd.f32 %v860_v23, %v4754_v52  ;;  %v3911_v23 = vld [vmem:[%s6283_s6 + $0xb0] sm:$0xff] }
 0x15d   : > { %2165 = vperm.xlu2 %4369, %v3911_v23  }
 0x15e   : > { %v879_v26 = vpop.f32.mrf.mxu1 }
 0x15f   : > { %v4775_v12 = vadd.f32 %v879_v26, %v4754_v52  ;;  %v4267_v26 = vld [vmem:[%s6282_s5 + $0x20] sm:$0xff] }
 0x163   : > { %v862_v33 = vpop.f32.mrf.mxu0 }
 0x164   : > { %v4763_v60 = vadd.f32 %v862_v33, %v809_v58  ;;  %v3371_v33 = vld [vmem:[%s6290_s13 + $0x8] sm:$0x3] }
 0x165   : > { %3379 = vperm.xlu2 %4369, %v3371_v33   ;;  %v4288_v33 = vld [vmem:[%s6284_s7 + $0x98] sm:$0xff] }
 0x166   : > { %v881_v49 = vpop.f32.mrf.mxu1  ;;  %v939_v18 = vpack.c.bf16 %v4763_v60, %v4772_v10 }
 0x167   : > { %v4777_v14 = vadd.f32 %v881_v49, %v809_v58  ;;  %v4881_v49 = vld [vmem:[%s6284_s7 + $0x38] sm:$0xff] }
 0x169   : > { %v940_v21 = vpack.c.bf16 %v4777_v14, %v4775_v12 }
 0x16b   : > { %v865_v47 = vpop.f32.mrf.mxu0 }
 0x16c   : > { %v4756_v56 = vadd.f32 %v865_v47, %v814_v50  ;;  %v4896_v47 = vld [vmem:[%s6284_s7 + $0x28] sm:$0xff] }
 0x16e   : > { %v884_v54 = vpop.f32.mrf.mxu1 }
 0x16f   : > { %v4767_v63 = vadd.f32 %v884_v54, %v814_v50  ;;  %v4904_v54 = vld [vmem:[%s6284_s7 + $0x20] sm:$0xff] }
 0x172   : > { %v898_v51 = vpop.f32.mrf.mxu2 }
 0x173   : > { %v867_v55 = vpop.f32.mrf.mxu0  ;;  %v4811_v36 = vadd.f32 %v898_v51, %v4754_v52  ;;  %v4912_v51 = vld [vmem:[%s6284_s7 + $0x18] sm:$0xff] }
 0x174   : > { %v4758_v57 = vadd.f32 %v867_v55, %v819_v53  ;;  %v4924_v55 = vld [vmem:[%s6284_s7 + $0x8] sm:$0xff] }
 0x176   : > { %v943_v61 = vpack.c.bf16 %v4758_v57, %v4756_v56  ;;  %v886_v62 = vpop.f32.mrf.mxu1 }
 0x177   : > { %v4769_v7 = vadd.f32 %v886_v62, %v819_v53  ;;  %v4952_v62 = vld [vmem:[%s6284_s7 + $0x68] sm:$0xff] }
 0x178   : > { %1074 = vmatpush.bf16.msra.mxu0 %v943_v61  ;;  %v4945_v61 = vld [vmem:[%s6284_s7 + $0x70] sm:$0xff] }
 0x179   : > { %v944_v17 = vpack.c.bf16 %v4769_v7, %v4767_v63 }
 0x17a   : > { %v900_v19 = vpop.f32.mrf.mxu2 }
 0x17b   : > { %1113 = vmatpush.bf16.msra.mxu1 %v944_v17  ;;  %v4806_v34 = vadd.f32 %v900_v19, %v809_v58  ;;  %v4959_v17 = vld [vmem:[%s6284_s7 + $0x60] sm:$0xff] }
 0x17c   : > { %1075 = vmatpush.bf16.msra.mxu0 %v939_v18  ;;  %v4967_v18 = vld [vmem:[%s6284_s7 + $0x58] sm:$0xff] }
 0x17d   : > { %v941_v37 = vpack.c.bf16 %v4806_v34, %v4811_v36 }
 0x17f   : > { %1114 = vmatpush.bf16.msra.mxu1 %v940_v21  ;;  %3769 = vmatmul.msk.bf16.vlgmr.msra.gmra.mxu0 %vm1049_vm0, %v4263_v20  ;;  %v4978_v21 = vpop.permute.xlu0 %961 }
 0x180   : > { %1422 = vmatpush.bf16.msrb.mxu0 %v4881_v49 }
 0x182   : > { %v903_v16 = vpop.f32.mrf.mxu2  ;;  %v917_v24 = vpop.f32.mrf.mxu3  ;;  %3775 = vmatmul.msk.bf16.vlgmr.msra.gmra.mxu1 %vm1049_vm0, %v4263_v20 }
 0x183   : > { %v4796_v29 = vadd.f32 %v903_v16, %v814_v50  ;;  %v4836_v45 = vadd.f32 %v917_v24, %v4754_v52  ;;  %v4268_v52 = vld [vmem:[%s6282_s5 + $0x28] sm:$0xff]  ;;  %1441 = vmatpush.bf16.msrb.mxu1 %v4938_v59 }
 0x184   : > { %v4985_v16 = vld [vmem:[%s6284_s7 + $0x48] sm:$0xff] }
 0x185   : > { %6340 = vst [vmem:[#allocation3_spill] sm:$0xff] %v4836_v45 }
 0x187   : > { %1442 = vmatpush.bf16.msrb.mxu1 %v4945_v61 }
 0x18a   : > { %v905_v27 = vpop.f32.mrf.mxu2  ;;  %v919_v28 = vpop.f32.mrf.mxu3 }
 0x18b   : > { %v4798_v30 = vadd.f32 %v905_v27, %v819_v53  ;;  %v4831_v43 = vadd.f32 %v919_v28, %v809_v58  ;;  %v4930_v58 = vld [vmem:[%s6284_s7] sm:$0xff]  ;;  %1443 = vmatpush.bf16.msrb.mxu1 %v4952_v62  ;;  %v4994_v27 = vld [vmem:[%s6284_s7 + $0xb8] sm:$0xff] }
 0x18c   : > { %v4999_v28 = vld [vmem:[%s6284_s7 + $0x40] sm:$0xff] }
 0x18d   : > { %v945_v35 = vpack.c.bf16 %v4798_v30, %v4796_v29  ;;  %6339 = vst [vmem:[#allocation2_spill] sm:$0xff] %v4831_v43  ;;  %v942_v46 = vpack.c.bf16 %v4831_v43, %v4836_v45 }
 0x18f   : > { %1152 = vmatpush.bf16.msra.mxu2 %v945_v35  ;;  %3770 = vmatmul.msk.bf16.gmra.mxu0 %vm1049_vm0, %v4264_v31 }
 0x190   : > { %1444 = vmatpush.bf16.msrb.mxu1 %v4959_v17 }
 0x192   : > { %v922_v38 = vpop.f32.mrf.mxu3  ;;  %3776 = vmatmul.msk.bf16.gmra.mxu1 %vm1049_vm0, %v4264_v31 }
 0x193   : > { %1153 = vmatpush.bf16.msra.mxu2 %v941_v37  ;;  %v4821_v15 = vadd.f32 %v922_v38, %v814_v50  ;;  %v4887_v50 = vld [vmem:[%s6284_s7 + $0x30] sm:$0xff]  ;;  %v5008_v37 = vpop.permute.xlu0 %986  ;;  %v5010_v38 = vpop.permute.xlu1 %1011 }
 0x194   : > { %1423 = vmatpush.bf16.msrb.mxu0 %v4887_v50  ;;  %1445 = vmatpush.bf16.msrb.mxu1 %v4967_v18 }
 0x196   : > { %3781 = vmatmul.msk.bf16.vlgmr.msra.gmra.mxu2 %vm1049_vm0, %v4263_v20 }
 0x197   : > { %1460 = vmatpush.bf16.msrb.mxu2 %v4994_v27 }
 0x198   : > { %1424 = vmatpush.bf16.msrb.mxu0 %v4896_v47 }
 0x19a   : > { %v924_v40 = vpop.f32.mrf.mxu3 }
 0x19b   : > { %v4823_v4 = vadd.f32 %v924_v40, %v819_v53  ;;  %v4918_v53 = vld [vmem:[%s6284_s7 + $0x10] sm:$0xff]  ;;  %1461 = vmatpush.bf16.msrb.mxu2 %v4291_v42 }
 0x19c   : > { %1425 = vmatpush.bf16.msrb.mxu0 %v4904_v54 }
 0x19d   : > { %v946_v44 = vpack.c.bf16 %v4823_v4, %v4821_v15 }
 0x19f   : > { %1191 = vmatpush.bf16.msra.mxu3 %v946_v44  ;;  %3771 = vmatmul.msk.bf16.gmra.mxu0 %vm1049_vm0, %v4265_v41  ;;  %v5025_v44 = vpop.permute.xlu0 %971 }
 0x1a0   : > { %1426 = vmatpush.bf16.msrb.mxu0 %v4912_v51 }
 0x1a2   : > { %3777 = vmatmul.msk.bf16.gmra.mxu1 %vm1049_vm0, %v4265_v41 }
 0x1a3   : > { %1192 = vmatpush.bf16.msra.mxu3 %v942_v46  ;;  %v5028_v46 = vpop.permute.xlu1 %976 }
 0x1a4   : > { %1427 = vmatpush.bf16.msrb.mxu0 %v4918_v53 }
 0x1a6   : > { %3782 = vmatmul.msk.bf16.gmra.mxu2 %vm1049_vm0, %v4264_v31  ;;  %3787 = vmatmul.msk.bf16.vlgmr.msra.gmra.mxu3 %vm1049_vm0, %v4263_v20  ;;  %v4974_v20 = vld [vmem:[%s6284_s7 + $0x50] sm:$0xff] }
 0x1a7   : > { %1495 = vmatpush.bf16.msrb.mxu3 %v4511_v0  ;;  %1446 = vmatpush.bf16.msrb.mxu1 %v4974_v20 }
 0x1a8   : > { %1428 = vmatpush.bf16.msrb.mxu0 %v4924_v55 }
 0x1ab   : > { %1496 = vmatpush.bf16.msrb.mxu3 %v4518_v1  ;;  %1447 = vmatpush.bf16.msrb.mxu1 %v4985_v16 }
 0x1ac   : > { %1429 = vmatpush.bf16.msrb.mxu0 %v4930_v58 }
 0x1af   : > { %1497 = vmatpush.bf16.msrb.mxu3 %v4537_v2  ;;  %3772 = vmatmul.msk.bf16.gmra.mxu0 %vm1049_vm0, %v4266_v3 }
 0x1b0   : > { %1587 = vmatpush.bf16.msra.mxu0 %v4881_v49  ;;  %1448 = vmatpush.bf16.msrb.mxu1 %v4999_v28 }
 0x1b2   : > { %3778 = vmatmul.msk.bf16.gmra.mxu1 %vm1049_vm0, %v4266_v3 }
 0x1b3   : > { %1498 = vmatpush.bf16.msrb.mxu3 %v4551_v5 }
 0x1b4   : > { %1588 = vmatpush.bf16.msra.mxu0 %v4887_v50  ;;  %1606 = vmatpush.bf16.msra.mxu1 %v4938_v59 }
 0x1b6   : > { %3783 = vmatmul.msk.bf16.gmra.mxu2 %vm1049_vm0, %v4265_v41  ;;  %3788 = vmatmul.msk.bf16.gmra.mxu3 %vm1049_vm0, %v4264_v31 }
 0x1b7   : > { %1499 = vmatpush.bf16.msrb.mxu3 %v4560_v6 }
 0x1b8   : > { %1589 = vmatpush.bf16.msra.mxu0 %v4896_v47  ;;  %1607 = vmatpush.bf16.msra.mxu1 %v4945_v61 }
 0x1bb   : > { %1500 = vmatpush.bf16.msrb.mxu3 %v4573_v9 }
 0x1bc   : > { %1590 = vmatpush.bf16.msra.mxu0 %v4904_v54  ;;  %1608 = vmatpush.bf16.msra.mxu1 %v4952_v62 }
 0x1bf   : > { %1501 = vmatpush.bf16.msrb.mxu3 %v4584_v11  ;;  %3773 = vmatmul.msk.bf16.gmra.mxu0 %vm1049_vm0, %v4267_v26 }
 0x1c0   : > { %1591 = vmatpush.bf16.msra.mxu0 %v4912_v51  ;;  %1609 = vmatpush.bf16.msra.mxu1 %v4959_v17 }
 0x1c2   : > { %3779 = vmatmul.msk.bf16.gmra.mxu1 %vm1049_vm0, %v4267_v26 }
 0x1c3   : > { %1502 = vmatpush.bf16.msrb.mxu3 %v4593_v13 }
 0x1c4   : > { %1592 = vmatpush.bf16.msra.mxu0 %v4918_v53  ;;  %1610 = vmatpush.bf16.msra.mxu1 %v4967_v18 }
 0x1c6   : > { %3784 = vmatmul.msk.bf16.gmra.mxu2 %vm1049_vm0, %v4266_v3  ;;  %3789 = vmatmul.msk.bf16.gmra.mxu3 %vm1049_vm0, %v4265_v41 }
 0x1c7   : > { %1775 = vmatpush.bf16.msra.mxu3 %v4994_v27 }
 0x1c8   : > { %1593 = vmatpush.bf16.msra.mxu0 %v4924_v55  ;;  %1611 = vmatpush.bf16.msra.mxu1 %v4974_v20 }
 0x1cb   : > { %1776 = vmatpush.bf16.msra.mxu3 %v4291_v42 }
 0x1cc   : > { %1594 = vmatpush.bf16.msra.mxu0 %v4930_v58  ;;  %1612 = vmatpush.bf16.msra.mxu1 %v4985_v16 }
 0x1cf   : > { %3774 = vmatmul.msk.bf16.gmra.mxu0 %vm1049_vm0, %v4268_v52 }
 0x1d0   : > { %1613 = vmatpush.bf16.msra.mxu1 %v4999_v28 }
 0x1d2   : > { %3780 = vmatmul.msk.bf16.gmra.mxu1 %vm1049_vm0, %v4268_v52 }
 0x1d6   : > { %3785 = vmatmul.msk.bf16.gmra.mxu2 %vm1049_vm0, %v4267_v26  ;;  %3790 = vmatmul.msk.bf16.gmra.mxu3 %vm1049_vm0, %v4266_v3  ;;  %v5035_v3 = vpop.permute.xlu2 %1006 }
 0x1e6   : > { %3786 = vmatmul.msk.bf16.gmra.mxu2 %vm1049_vm0, %v4268_v52  ;;  %3791 = vmatmul.msk.bf16.gmra.mxu3 %vm1049_vm0, %v4267_v26 }
 0x1f6   : > { %3792 = vmatmul.msk.bf16.gmra.mxu3 %vm1049_vm0, %v4268_v52 }
 0x1fc   : > { %v1077_v19 = vpop.f32.mrf.mxu0 }
 0x1fd   : > { %v1078_v31 = vadd.f32 %v1077_v19, %v4978_v21  ;;  %v5052_v19 = vpop.permute.xlu2 %981 }
 0x1ff   : > { %v4988_v24 = vpop.f32.mrf.mxu1 }
 0x204   : > { %v1079_v25 = vpop.f32.mrf.mxu0 }
 0x205   : > { %v1080_v32 = vadd.f32 %v1079_v25, %v4980_v22 }
 0x207   : > { %v1272_v35 = vpack.c.bf16 %v1080_v32, %v1078_v31  ;;  %v1118_v40 = vpop.f32.mrf.mxu1 }
 0x208   : > { %v1119_v31 = vadd.f32 %v1118_v40, %v4980_v22 }
 0x209   : > { %1430 = vmatmul.bf16.vlgmr.msrb.gmra.mxu0 %v1272_v35  ;;  %v1117_v35 = vadd.f32 %v4988_v24, %v4978_v21 }
 0x20a   : > { %1652 = vmatpush.bf16.msrb.mxu0 %v4511_v0  ;;  %v4290_v0 = vld [vmem:[%s6284_s7 + $0xa8] sm:$0xff] }
 0x20b   : > { %1462 = vmatpush.bf16.msrb.mxu2 %v4290_v0  ;;  %1777 = vmatpush.bf16.msra.mxu3 %v4290_v0 }
 0x20c   : > { %v1082_v41 = vpop.f32.mrf.mxu0 }
 0x20d   : > { %v1083_v8 = vadd.f32 %v1082_v41, %v5025_v44 }
 0x20e   : > { %1653 = vmatpush.bf16.msrb.mxu0 %v4518_v1  ;;  %v5033_v1 = vld [vmem:[%s6284_s7 + $0xa0] sm:$0xff] }
 0x20f   : > { %1463 = vmatpush.bf16.msrb.mxu2 %v5033_v1  ;;  %1778 = vmatpush.bf16.msra.mxu3 %v5033_v1 }
 0x212   : > { %1654 = vmatpush.bf16.msrb.mxu0 %v4537_v2  ;;  %v1121_v2 = vpop.f32.mrf.mxu1 }
 0x213   : > { %1464 = vmatpush.bf16.msrb.mxu2 %v4288_v33  ;;  %1779 = vmatpush.bf16.msra.mxu3 %v4288_v33 }
 0x214   : > { %v1084_v48 = vpop.f32.mrf.mxu0 }
 0x215   : > { %v1085_v23 = vadd.f32 %v1084_v48, %v5028_v46 }
 0x216   : > { %1655 = vmatpush.bf16.msrb.mxu0 %v4551_v5  ;;  %v4287_v5 = vld [vmem:[%s6284_s7 + $0x90] sm:$0xff] }
 0x217   : > { %v1275_v26 = vpack.c.bf16 %v1085_v23, %v1083_v8  ;;  %1465 = vmatpush.bf16.msrb.mxu2 %v4287_v5  ;;  %1780 = vmatpush.bf16.msra.mxu3 %v4287_v5  ;;  %v5070_v8 = vpop.permute.xlu2 %1016 }
 0x219   : > { %1435 = vmatmul.bf16.gmra.mxu0 %v1275_v26 }
 0x21a   : > { %1656 = vmatpush.bf16.msrb.mxu0 %v4560_v6  ;;  %v1123_v25 = vpop.f32.mrf.mxu1  ;;  %v4286_v6 = vld [vmem:[%s6284_s7 + $0x88] sm:$0xff] }
 0x21b   : > { %1466 = vmatpush.bf16.msrb.mxu2 %v4286_v6  ;;  %1781 = vmatpush.bf16.msra.mxu3 %v4286_v6 }
 0x21c   : > { %v1087_v52 = vpop.f32.mrf.mxu0 }
 0x21d   : > { %v1088_v41 = vadd.f32 %v1087_v52, %v5052_v19  ;;  %v1124_v52 = vadd.f32 %v1123_v25, %v5028_v46 }
 0x21e   : > { %1657 = vmatpush.bf16.msrb.mxu0 %v4573_v9  ;;  %v4285_v9 = vld [vmem:[%s6284_s7 + $0x80] sm:$0xff] }
 0x21f   : > { %1467 = vmatpush.bf16.msrb.mxu2 %v4285_v9  ;;  %1782 = vmatpush.bf16.msra.mxu3 %v4285_v9  ;;  %v5078_v26 = vpop.permute.xlu2 %991 }
 0x222   : > { %1658 = vmatpush.bf16.msrb.mxu0 %v4584_v11  ;;  %v1581_v11 = vpack.c.bf16 %v1119_v31, %v1117_v35  ;;  %v1126_v23 = vpop.f32.mrf.mxu1 }
 0x223   : > { %1625 = vmatpush.bf16.msra.mxu2 %v4994_v27 }
 0x224   : > { %v1089_v32 = vpop.f32.mrf.mxu0 }
 0x225   : > { %v1090_v48 = vadd.f32 %v1089_v32, %v5008_v37 }
 0x226   : > { %1659 = vmatpush.bf16.msrb.mxu0 %v4593_v13  ;;  %v5076_v13 = vpop.permute.xlu0 %996 }
 0x227   : > { %v1273_v40 = vpack.c.bf16 %v1090_v48, %v1088_v41  ;;  %1626 = vmatpush.bf16.msra.mxu2 %v4291_v42 }
 0x229   : > { %1449 = vmatmul.bf16.vlgmr.msrb.gmra.mxu1 %v1273_v40  ;;  %1595 = vmatmul.bf16.vlgmr.msra.gmra.mxu0 %v1581_v11 }
 0x22a   : > { %1737 = vmatpush.bf16.msrb.mxu1 %v4881_v49  ;;  %1925 = vmatpush.bf16.msra.mxu0 %v4994_v27  ;;  %v1128_v31 = vpop.f32.mrf.mxu1  ;;  %v1122_v27 = vadd.f32 %v1121_v2, %v5025_v44 }
 0x22b   : > { %1627 = vmatpush.bf16.msra.mxu2 %v4290_v0  ;;  %v1129_v2 = vadd.f32 %v1128_v31, %v5008_v37 }
 0x22c   : > { %v1092_v24 = vpop.f32.mrf.mxu0 }
 0x22d   : > { %v1093_v35 = vadd.f32 %v1092_v24, %v5078_v26 }
 0x22e   : > { %1738 = vmatpush.bf16.msrb.mxu1 %v4887_v50  ;;  %1926 = vmatpush.bf16.msra.mxu0 %v4291_v42 }
 0x22f   : > { %1628 = vmatpush.bf16.msra.mxu2 %v5033_v1 }
 0x232   : > { %1739 = vmatpush.bf16.msrb.mxu1 %v4896_v47  ;;  %1927 = vmatpush.bf16.msra.mxu0 %v4290_v0  ;;  %v1584_v0 = vpack.c.bf16 %v1124_v52, %v1122_v27  ;;  %v1131_v48 = vpop.f32.mrf.mxu1  ;;  %v5113_v27 = vld [vmem:[%s6287_s10 + $0x28] sm:$0xff] }
 0x233   : > { %1629 = vmatpush.bf16.msra.mxu2 %v4288_v33 }
 0x234   : > { %v1094_v32 = vpop.f32.mrf.mxu0 }
 0x235   : > { %v1095_v42 = vadd.f32 %v1094_v32, %v5076_v13  ;;  %v1155_v32 = vpop.f32.mrf.mxu2 }
 0x236   : > { %1740 = vmatpush.bf16.msrb.mxu1 %v4904_v54  ;;  %1928 = vmatpush.bf16.msra.mxu0 %v5033_v1  ;;  %v1127_v1 = vadd.f32 %v1126_v23, %v5052_v19 }
 0x237   : > { %v1276_v41 = vpack.c.bf16 %v1095_v42, %v1093_v35  ;;  %1630 = vmatpush.bf16.msra.mxu2 %v4287_v5  ;;  %v1132_v35 = vadd.f32 %v1131_v48, %v5078_v26  ;;  %v5131_v48 = vld [vmem:[%s6287_s10 + $0x18] sm:$0xff] }
 0x238   : > { %v1582_v24 = vpack.c.bf16 %v1129_v2, %v1127_v1  ;;  %v5124_v2 = vld [vmem:[%s6287_s10 + $0x20] sm:$0xff] }
 0x239   : > { %1454 = vmatmul.bf16.gmra.mxu1 %v1276_v41  ;;  %1600 = vmatmul.bf16.gmra.mxu0 %v1584_v0 }
 0x23a   : > { %1741 = vmatpush.bf16.msrb.mxu1 %v4912_v51  ;;  %1929 = vmatpush.bf16.msra.mxu0 %v4288_v33 }
 0x23b   : > { %1631 = vmatpush.bf16.msra.mxu2 %v4286_v6 }
 0x23c   : > { %v1097_v25 = vpop.f32.mrf.mxu0 }
 0x23d   : > { %v1098_v40 = vadd.f32 %v1097_v25, %v5013_v39  ;;  %v1157_v0 = vpop.f32.mrf.mxu2 }
 0x23e   : > { %1742 = vmatpush.bf16.msrb.mxu1 %v4918_v53  ;;  %1930 = vmatpush.bf16.msra.mxu0 %v4287_v5  ;;  %v1133_v5 = vpop.f32.mrf.mxu1 }
 0x23f   : > { %1632 = vmatpush.bf16.msra.mxu2 %v4285_v9  ;;  %v1134_v42 = vadd.f32 %v1133_v5, %v5076_v13  ;;  %v5145_v5 = vld [vmem:[%s6287_s10 + $0x8] sm:$0xff] }
 0x242   : > { %1743 = vmatpush.bf16.msrb.mxu1 %v4924_v55  ;;  %1931 = vmatpush.bf16.msra.mxu0 %v4286_v6  ;;  %v5099_v6 = vld [vmem:[%s6287_s10 + $0x38] sm:$0xff] }
 0x244   : > { %v1099_v11 = vpop.f32.mrf.mxu0 }
 0x245   : > { %v1100_v33 = vadd.f32 %v1099_v11, %v5035_v3  ;;  %v1585_v11 = vpack.c.bf16 %v1134_v42, %v1132_v35  ;;  %v1156_v42 = vadd.f32 %v1155_v32, %v4978_v21 }
 0x246   : > { %1744 = vmatpush.bf16.msrb.mxu1 %v4930_v58  ;;  %1932 = vmatpush.bf16.msra.mxu0 %v4285_v9  ;;  %v5106_v9 = vld [vmem:[%s6287_s10 + $0x30] sm:$0xff]  ;;  %v1136_v31 = vpop.f32.mrf.mxu1 }
 0x247   : > { %v1274_v52 = vpack.c.bf16 %v1100_v33, %v1098_v40 }
 0x249   : > { %1468 = vmatmul.bf16.vlgmr.msrb.gmra.mxu2 %v1274_v52  ;;  %1614 = vmatmul.bf16.vlgmr.msra.gmra.mxu1 %v1582_v24  ;;  %v1160_v24 = vpop.f32.mrf.mxu2  ;;  %v5138_v52 = vld [vmem:[%s6287_s10 + $0x10] sm:$0xff] }
 0x24a   : > { %1756 = vmatpush.bf16.msrb.mxu2 %v4938_v59  ;;  %1802 = vmatpush.bf16.msra.mxu1 %v5099_v6  ;;  %v1161_v45 = vadd.f32 %v1160_v24, %v5025_v44 }
 0x24c   : > { %v1102_v23 = vpop.f32.mrf.mxu0 }
 0x24d   : > { %v1103_v25 = vadd.f32 %v1102_v23, %v5010_v38  ;;  %v1158_v23 = vadd.f32 %v1157_v0, %v4980_v22 }
 0x24e   : > { %1757 = vmatpush.bf16.msrb.mxu2 %v4945_v61  ;;  %1803 = vmatpush.bf16.msra.mxu1 %v5106_v9  ;;  %v1138_v33 = vpop.f32.mrf.mxu1 }
 0x24f   : > { %v1139_v35 = vadd.f32 %v1138_v33, %v5035_v3 }
 0x251   : > { %v1162_v43 = vpop.f32.mrf.mxu2 }
 0x252   : > { %1758 = vmatpush.bf16.msrb.mxu2 %v4952_v62  ;;  %1804 = vmatpush.bf16.msra.mxu1 %v5113_v27  ;;  %v1163_v0 = vadd.f32 %v1162_v43, %v5028_v46 }
 0x254   : > { %v1104_v41 = vpop.f32.mrf.mxu0 }
 0x255   : > { %v1105_v1 = vadd.f32 %v1104_v41, %v5070_v8  ;;  %v1137_v41 = vadd.f32 %v1136_v31, %v5013_v39 }
 0x256   : > { %1759 = vmatpush.bf16.msrb.mxu2 %v4959_v17  ;;  %1805 = vmatpush.bf16.msra.mxu1 %v5124_v2 }
 0x257   : > { %v1277_v40 = vpack.c.bf16 %v1105_v1, %v1103_v25  ;;  %v1141_v25 = vpop.f32.mrf.mxu1  ;;  %v5156_v1 = vld [vmem:[%s6287_s10] sm:$0xff] }
 0x259   : > { %1473 = vmatmul.bf16.gmra.mxu2 %v1277_v40  ;;  %1619 = vmatmul.bf16.gmra.mxu1 %v1585_v11  ;;  %v1731_v11 = vpack.c.bf16 %v1158_v23, %v1156_v42  ;;  %v1583_v40 = vpack.c.bf16 %v1139_v35, %v1137_v41  ;;  %v1165_v31 = vpop.f32.mrf.mxu2  ;;  %v1142_v23 = vadd.f32 %v1141_v25, %v5010_v38 }
 0x25a   : > { %1760 = vmatpush.bf16.msrb.mxu2 %v4967_v18  ;;  %1806 = vmatpush.bf16.msra.mxu1 %v5131_v48  ;;  %v1734_v35 = vpack.c.bf16 %v1163_v0, %v1161_v45 }
 0x25e   : > { %1761 = vmatpush.bf16.msrb.mxu2 %v4974_v20  ;;  %1807 = vmatpush.bf16.msra.mxu1 %v5138_v52 }
 0x25f   : > { %v1143_v32 = vpop.f32.mrf.mxu1 }
 0x260   : > { %v1144_v33 = vadd.f32 %v1143_v32, %v5070_v8 }
 0x262   : > { %1762 = vmatpush.bf16.msrb.mxu2 %v4985_v16  ;;  %1808 = vmatpush.bf16.msra.mxu1 %v5145_v5  ;;  %v1586_v42 = vpack.c.bf16 %v1144_v33, %v1142_v23 }
 0x266   : > { %1763 = vmatpush.bf16.msrb.mxu2 %v4999_v28  ;;  %1809 = vmatpush.bf16.msra.mxu1 %v5156_v1 }
 0x269   : > { %1633 = vmatmul.bf16.vlgmr.msra.gmra.mxu2 %v1583_v40  ;;  %1745 = vmatmul.bf16.vlgmr.msrb.gmra.mxu1 %v1731_v11 }
 0x26a   : > { %1887 = vmatpush.bf16.msra.mxu2 %v4881_v49  ;;  %v1167_v49 = vpop.f32.mrf.mxu2 }
 0x26b   : > { %v1168_v43 = vadd.f32 %v1167_v49, %v5008_v37 }
 0x26e   : > { %1888 = vmatpush.bf16.msra.mxu2 %v4887_v50  ;;  %v1166_v50 = vadd.f32 %v1165_v31, %v5052_v19 }
 0x270   : > { %v1732_v24 = vpack.c.bf16 %v1168_v43, %v1166_v50 }
 0x272   : > { %1889 = vmatpush.bf16.msra.mxu2 %v4896_v47  ;;  %v1170_v47 = vpop.f32.mrf.mxu2 }
 0x276   : > { %1890 = vmatpush.bf16.msra.mxu2 %v4904_v54  ;;  %v1194_v54 = vpop.f32.mrf.mxu3 }
 0x277   : > { %v1195_v25 = vadd.f32 %v1194_v54, %v4978_v21 }
 0x279   : > { %1638 = vmatmul.bf16.gmra.mxu2 %v1586_v42  ;;  %1750 = vmatmul.bf16.gmra.mxu1 %v1734_v35 }
 0x27a   : > { %1891 = vmatpush.bf16.msra.mxu2 %v4912_v51  ;;  %v1172_v45 = vpop.f32.mrf.mxu2 }
 0x27b   : > { %v1173_v51 = vadd.f32 %v1172_v45, %v5076_v13 }
 0x27e   : > { %1892 = vmatpush.bf16.msra.mxu2 %v4918_v53  ;;  %v1171_v53 = vadd.f32 %v1170_v47, %v5078_v26 }
 0x282   : > { %1893 = vmatpush.bf16.msra.mxu2 %v4924_v55  ;;  %v1735_v55 = vpack.c.bf16 %v1173_v51, %v1171_v53  ;;  %v5184_v40 = vpop.f32.mrf.mxu2 }
 0x286   : > { %1894 = vmatpush.bf16.msra.mxu2 %v4930_v58  ;;  %v1196_v58 = vpop.f32.mrf.mxu3  ;;  %v1431_v21 = vpop.f32.mrf.mxu0 }
 0x287   : > { %v1197_v41 = vadd.f32 %v1196_v58, %v4980_v22 }
 0x289   : > { %1764 = vmatmul.bf16.vlgmr.msrb.gmra.mxu2 %v1732_v24  ;;  %v1881_v32 = vpack.c.bf16 %v1197_v41, %v1195_v25 }
 0x28a   : > { %1952 = vmatpush.bf16.msrb.mxu2 %v5099_v6  ;;  %v5187_v0 = vpop.f32.mrf.mxu2 }
 0x28e   : > { %1953 = vmatpush.bf16.msrb.mxu2 %v5106_v9  ;;  %v1199_v11 = vpop.f32.mrf.mxu3  ;;  %v1433_v50 = vpop.f32.mrf.mxu0 }
 0x28f   : > { %v1200_v23 = vadd.f32 %v1199_v11, %v5025_v44 }
 0x292   : > { %1954 = vmatpush.bf16.msrb.mxu2 %v5113_v27  ;;  %v5191_v42 = vpop.f32.mrf.mxu2 }
 0x296   : > { %1955 = vmatpush.bf16.msrb.mxu2 %v5124_v2  ;;  %v1201_v31 = vpop.f32.mrf.mxu3  ;;  %v1436_v45 = vpop.f32.mrf.mxu0 }
 0x297   : > { %v1202_v33 = vadd.f32 %v1201_v31, %v5028_v46 }
 0x299   : > { %1769 = vmatmul.bf16.gmra.mxu2 %v1735_v55  ;;  %v1884_v35 = vpack.c.bf16 %v1202_v33, %v1200_v23 }
 0x29a   : > { %1956 = vmatpush.bf16.msrb.mxu2 %v5131_v48  ;;  %v5193_v49 = vpop.f32.mrf.mxu2 }
 0x29e   : > { %1957 = vmatpush.bf16.msrb.mxu2 %v5138_v52  ;;  %v1438_v41 = vpop.f32.mrf.mxu0 }
 0x2a2   : > { %1958 = vmatpush.bf16.msrb.mxu2 %v5145_v5 }
 0x2a6   : > { %1959 = vmatpush.bf16.msrb.mxu2 %v5156_v1  ;;  %v1450_v22 = vpop.f32.mrf.mxu1  ;;  %v1596_v33 = vpop.f32.mrf.mxu0 }
 0x2a7   : > { %v1451_v54 = vadd.f32 %v1450_v22, %v1431_v21 }
 0x2a9   : > { %1895 = vmatmul.bf16.vlgmr.msra.gmra.mxu2 %v1881_v32 }
 0x2ae   : > { %v1452_v43 = vpop.f32.mrf.mxu1 }
 0x2af   : > { %v1453_v51 = vadd.f32 %v1452_v43, %v1433_v50  ;;  %v1598_v43 = vpop.f32.mrf.mxu0 }
 0x2b6   : > { %v1455_v24 = vpop.f32.mrf.mxu1 }
 0x2b7   : > { %v1456_v32 = vadd.f32 %v1455_v24, %v1436_v45 }
 0x2b9   : > { %1900 = vmatmul.bf16.gmra.mxu2 %v1884_v35 }
 0x2be   : > { %v1457_v58 = vpop.f32.mrf.mxu1 }
 0x2bf   : > { %v1458_v31 = vadd.f32 %v1457_v58, %v1438_v41 }
 0x2c6   : > { %v1615_v11 = vpop.f32.mrf.mxu1 }
 0x2cc   : > { %v1469_v47 = vpop.f32.mrf.mxu2 }
 0x2cd   : > { %v5195_v55 = vadd.f32 %v1469_v47, %v1451_v54 }
 0x2d4   : > { %v1471_v53 = vpop.f32.mrf.mxu2 }
 0x2d5   : > { %v5197_v46 = vadd.f32 %v1471_v53, %v1453_v51  ;;  %v1601_v51 = vpop.f32.mrf.mxu0  ;;  %v1204_v53 = vpop.f32.mrf.mxu3 }
 0x2d7   : > { %v1491_v44 = vpack.c.bf16 %v5197_v46, %v5195_v55  ;;  %v1488_v47 = vmul.f32 %v5197_v46, %v5197_v46 }
 0x2d9   : > { %1503 = vmatmul.bf16.vlgmr.msrb.gmra.mxu3 %v1491_v44 }
 0x2da   : > { %1906 = vmatpush.bf16.msrb.mxu3 %v4938_v59  ;;  %v1617_v59 = vpop.f32.mrf.mxu1 }
 0x2db   : > { %v1618_v50 = vadd.f32 %v1617_v59, %v1598_v43 }
 0x2dc   : > { %v1474_v25 = vpop.f32.mrf.mxu2 }
 0x2dd   : > { %v5204_v35 = vadd.f32 %v1474_v25, %v1456_v32  ;;  %v1603_v41 = vpop.f32.mrf.mxu0 }
 0x2de   : > { %1907 = vmatpush.bf16.msrb.mxu3 %v4945_v61 }
 0x2e2   : > { %1908 = vmatpush.bf16.msrb.mxu3 %v4952_v62  ;;  %v1616_v62 = vadd.f32 %v1615_v11, %v1596_v33  ;;  %v1620_v54 = vpop.f32.mrf.mxu1 }
 0x2e3   : > { %v1621_v25 = vadd.f32 %v1620_v54, %v1601_v51  ;;  %v1183_v51 = vadd.f32 %v5193_v49, %v5070_v8  ;;  %v1205_v49 = vadd.f32 %v1204_v53, %v5052_v19 }
 0x2e4   : > { %v1476_v23 = vpop.f32.mrf.mxu2 }
 0x2e5   : > { %v5206_v22 = vadd.f32 %v1476_v23, %v1458_v31  ;;  %v1206_v31 = vpop.f32.mrf.mxu3 }
 0x2e6   : > { %1909 = vmatpush.bf16.msrb.mxu3 %v4959_v17 }
 0x2e7   : > { %v1492_v21 = vpack.c.bf16 %v5206_v22, %v5204_v35  ;;  %v1490_v32 = vmul.f32 %v5206_v22, %v5206_v22 }
 0x2e9   : > { %1508 = vmatmul.bf16.gmra.mxu3 %v1492_v21 }
 0x2ea   : > { %1910 = vmatpush.bf16.msrb.mxu3 %v4967_v18  ;;  %v1487_v18 = vmul.f32 %v5195_v55, %v5195_v55  ;;  %v1622_v58 = vpop.f32.mrf.mxu1 }
 0x2eb   : > { %v1623_v11 = vadd.f32 %v1622_v58, %v1603_v41 }
 0x2ec   : > { %v1634_v61 = vpop.f32.mrf.mxu2 }
 0x2ed   : > { %v5216_v17 = vadd.f32 %v1634_v61, %v1616_v62  ;;  %v1209_v43 = vpop.f32.mrf.mxu3  ;;  %v1178_v62 = vadd.f32 %v5187_v0, %v5035_v3 }
 0x2ee   : > { %1911 = vmatpush.bf16.msrb.mxu3 %v4974_v20 }
 0x2f2   : > { %1912 = vmatpush.bf16.msrb.mxu3 %v4985_v16  ;;  %v1493_v16 = vpack.c.bf16 %v1488_v47, %v1487_v18  ;;  %v1176_v47 = vadd.f32 %v5184_v40, %v5013_v39 }
 0x2f4   : > { %v1636_v24 = vpop.f32.mrf.mxu2  ;;  %v1733_v18 = vpack.c.bf16 %v1178_v62, %v1176_v47  ;;  %v1210_v47 = vadd.f32 %v1209_v43, %v5078_v26 }
 0x2f5   : > { %v5218_v45 = vadd.f32 %v1636_v24, %v1618_v50  ;;  %v1644_v24 = vmul.f32 %v5216_v17, %v5216_v17 }
 0x2f6   : > { %1913 = vmatpush.bf16.msrb.mxu3 %v4999_v28  ;;  %v1489_v28 = vmul.f32 %v5204_v35, %v5204_v35 }
 0x2f7   : > { %v1648_v20 = vpack.c.bf16 %v5218_v45, %v5216_v17  ;;  %v1645_v50 = vmul.f32 %v5218_v45, %v5218_v45 }
 0x2f8   : > { %v1494_v59 = vpack.c.bf16 %v1490_v32, %v1489_v28 }
 0x2f9   : > { %1513 = vmatmul.bf16.gmra.mxu3 %v1493_v16  ;;  %1660 = vmatmul.bf16.vlgmr.msrb.gmra.mxu0 %v1648_v20  ;;  %v1650_v54 = vpack.c.bf16 %v1645_v50, %v1644_v24  ;;  %v1211_v20 = vpop.f32.mrf.mxu3 }
 0x2fa   : > { %v1212_v62 = vadd.f32 %v1211_v20, %v5076_v13  ;;  %v4424_v20 = vmov 512.0  }
 0x2fb   : > { %4380 = vrcp.f32 %v4424_v20 }
 0x2fc   : > { %v1639_v44 = vpop.f32.mrf.mxu2 }
 0x2fd   : > { %v5229_v23 = vadd.f32 %v1639_v44, %v1621_v25  ;;  %v1181_v44 = vadd.f32 %v5191_v42, %v5010_v38 }
 0x2ff   : > { %v1646_v40 = vmul.f32 %v5229_v23, %v5229_v23  ;;  %v1736_v58 = vpack.c.bf16 %v1183_v51, %v1181_v44 }
 0x301   : > { %v1214_v16 = vpop.f32.mrf.mxu3 }
 0x304   : > { %v1641_v33 = vpop.f32.mrf.mxu2 }
 0x305   : > { %v5231_v21 = vadd.f32 %v1641_v33, %v1623_v11  ;;  %v1207_v11 = vadd.f32 %v1206_v31, %v5008_v37  ;;  %v1215_v33 = vadd.f32 %v1214_v16, %v5013_v39  ;;  %v1885_v31 = vpack.c.bf16 %v1212_v62, %v1210_v47 }
 0x307   : > { %v1649_v61 = vpack.c.bf16 %v5231_v21, %v5229_v23  ;;  %v1647_v0 = vmul.f32 %v5231_v21, %v5231_v21 }
 0x309   : > { %1518 = vmatmul.bf16.gmra.mxu3 %v1494_v59  ;;  %1665 = vmatmul.bf16.gmra.mxu0 %v1649_v61  ;;  %v1651_v41 = vpack.c.bf16 %v1647_v0, %v1646_v40  ;;  %v1216_v25 = vpop.f32.mrf.mxu3  ;;  %v1882_v59 = vpack.c.bf16 %v1207_v11, %v1205_v49 }
 0x30a   : > { %v1217_v32 = vadd.f32 %v1216_v25, %v5035_v3 }
 0x30c   : > { %v1883_v61 = vpack.c.bf16 %v1217_v32, %v1215_v33 }
 0x311   : > { %v1219_v28 = vpop.f32.mrf.mxu3 }
 0x312   : > { %v1220_v37 = vadd.f32 %v1219_v28, %v5010_v38  ;;  %v4381_v38 = vpop.eup %4380 }
 0x313   : > { %v1534_v40 = vmul.f32 512.0, %v4381_v38  ;;  %vm1538_vm1 = vweird.f32 %v4381_v38 }
 0x315   : > { %v1535_v32 = vsub.f32 1.0, %v1534_v40 }
 0x319   : > { %1670 = vmatmul.bf16.gmra.mxu0 %v1650_v54  ;;  %1783 = vmatmul.bf16.vlgmr.msra.gmra.mxu3 %v1733_v18  ;;  %v1221_v42 = vpop.f32.mrf.mxu3 }
 0x31a   : > { %v1222_v50 = vadd.f32 %v1221_v42, %v5070_v8 }
 0x31c   : > { %v1886_v3 = vpack.c.bf16 %v1222_v50, %v1220_v37 }
 0x329   : > { %1675 = vmatmul.bf16.gmra.mxu0 %v1651_v41  ;;  %1788 = vmatmul.bf16.gmra.mxu3 %v1736_v58  ;;  %v1765_v41 = vpop.f32.mrf.mxu2 }
 0x339   : > { %1914 = vmatmul.bf16.vlgmr.msrb.gmra.mxu3 %v1882_v59  ;;  %1933 = vmatmul.bf16.vlgmr.msra.gmra.mxu0 %v1883_v61  ;;  %v1746_v59 = vpop.f32.mrf.mxu1  ;;  %v1536_v61 = vmul.f32 %v4381_v38, %v1535_v32 }
 0x349   : > { %1919 = vmatmul.bf16.gmra.mxu3 %v1885_v31  ;;  %1938 = vmatmul.bf16.gmra.mxu0 %v1886_v3  ;;  %v1767_v31 = vpop.f32.mrf.mxu2  ;;  %v1537_v3 = vadd.f32 %v4381_v38, %v1536_v61 }
 0x351   : > { %v1770_v32 = vpop.f32.mrf.mxu2 }
 0x35c   : > { %v1504_v19 = vpop.f32.mrf.mxu3 }
 0x364   : > { %v1506_v39 = vpop.f32.mrf.mxu3 }
 0x365   : > { %v1524_v51 = vadd.f32 %v1506_v39, %v1504_v19 }
 0x36c   : > { %v1509_v53 = vpop.f32.mrf.mxu3 }
 0x36d   : > { %v1525_v0 = vadd.f32 %v1524_v51, %v1509_v53 }
 0x374   : > { %v1511_v24 = vpop.f32.mrf.mxu3 }
 0x375   : > { %v1526_v13 = vadd.f32 %v1525_v0, %v1511_v24  ;;  %v5259_v0 = vsel %vm1538_vm1, %v4381_v38, %v1537_v3  ;;  %v1772_v3 = vpop.f32.mrf.mxu2 }
 0x376   : > { %v1661_v18 = vpop.f32.mrf.mxu0 }
 0x377   : > { %v1527_v43 = vrot.slane %v1526_v13, 4 }
 0x379   : > { %v1528_v44 = vadd.f32 %v1527_v43, %v1526_v13 }
 0x37b   : > { %v1529_v11 = vrot.slane %v1528_v44, 2 }
 0x37c   : > { %v1514_v54 = vpop.f32.mrf.mxu3 }
 0x37d   : > { %v1530_v33 = vadd.f32 %v1529_v11, %v1528_v44 }
 0x37e   : > { %v1663_v16 = vpop.f32.mrf.mxu0 }
 0x37f   : > { %v1531_v47 = vrot.slane %v1530_v33, 1  ;;  %v1681_v19 = vadd.f32 %v1663_v16, %v1661_v18 }
 0x381   : > { %v1532_v53 = vadd.f32 %v1531_v47, %v1530_v33 }
 0x383   : > { %v5262_v44 = vmul.f32 %v5259_v0, %v1532_v53 }
 0x384   : > { %v1516_v8 = vpop.f32.mrf.mxu3 }
 0x385   : > { %v1541_v49 = vadd.f32 %v1516_v8, %v1514_v54  ;;  %v1748_v8 = vpop.f32.mrf.mxu1 }
 0x386   : > { %v1666_v26 = vpop.f32.mrf.mxu0  ;;  %v1768_v18 = vadd.f32 %v1767_v31, %v1748_v8 }
 0x387   : > { %v1682_v24 = vadd.f32 %v1681_v19, %v1666_v26  ;;  %v1551_v26 = vmul.f32 %v5262_v44, %v5262_v44 }
 0x38c   : > { %v1519_v58 = vpop.f32.mrf.mxu3 }
 0x38d   : > { %v1542_v28 = vadd.f32 %v1541_v49, %v1519_v58  ;;  %v1766_v49 = vadd.f32 %v1765_v41, %v1746_v59 }
 0x38e   : > { %v1668_v25 = vpop.f32.mrf.mxu0 }
 0x38f   : > { %v1683_v13 = vadd.f32 %v1682_v24, %v1668_v25 }
 0x391   : > { %v1684_v58 = vrot.slane %v1683_v13, 4 }
 0x393   : > { %v1685_v33 = vadd.f32 %v1684_v58, %v1683_v13 }
 0x394   : > { %v1521_v42 = vpop.f32.mrf.mxu3 }
 0x395   : > { %v1543_v62 = vadd.f32 %v1542_v28, %v1521_v42  ;;  %v1686_v41 = vrot.slane %v1685_v33, 2 }
 0x396   : > { %v1671_v50 = vpop.f32.mrf.mxu0 }
 0x397   : > { %v1544_v37 = vrot.slane %v1543_v62, 4 }
 0x399   : > { %v1545_v39 = vadd.f32 %v1544_v37, %v1543_v62  ;;  %v1751_v37 = vpop.f32.mrf.mxu1 }
 0x39a   : > { %v1771_v58 = vadd.f32 %v1770_v32, %v1751_v37 }
 0x39b   : > { %v1546_v51 = vrot.slane %v1545_v39, 2 }
 0x39c   : > { %v1784_v54 = vpop.f32.mrf.mxu3 }
 0x39d   : > { %v1547_v20 = vadd.f32 %v1546_v51, %v1545_v39  ;;  %v5267_v28 = vadd.f32 %v1784_v54, %v1766_v49  ;;  %v1687_v39 = vadd.f32 %v1686_v41, %v1685_v33  ;;  %v1896_v33 = vpop.f32.mrf.mxu2 }
 0x39e   : > { %v1673_v43 = vpop.f32.mrf.mxu0 }
 0x39f   : > { %v1548_v40 = vrot.slane %v1547_v20, 1  ;;  %v1691_v31 = vadd.f32 %v1673_v43, %v1671_v50  ;;  %v1688_v13 = vrot.slane %v1687_v39, 1 }
 0x3a1   : > { %v1549_v11 = vadd.f32 %v1548_v40, %v1547_v20  ;;  %v1753_v8 = vpop.f32.mrf.mxu1 }
 0x3a3   : > { %v1550_v16 = vmul.f32 %v1549_v11, %v5259_v0  ;;  %v1773_v11 = vadd.f32 %v1772_v3, %v1753_v8 }
 0x3a4   : > { %v1786_v38 = vpop.f32.mrf.mxu3 }
 0x3a5   : > { %v1552_v25 = vsub.f32 %v1550_v16, %v1551_v26  ;;  %v5269_v61 = vadd.f32 %v1786_v38, %v1768_v18  ;;  %v1689_v26 = vadd.f32 %v1688_v13, %v1687_v39  ;;  %v1557_v39 = vsub.f32 %v5206_v22, %v5262_v44 }
 0x3a6   : > { %v1676_v42 = vpop.f32.mrf.mxu0  ;;  %v1554_v13 = vsub.f32 %v5195_v55, %v5262_v44  ;;  %v5316_v55 = vld [vmem:[%s6286_s9 + $0x10] sm:$0xff] }
 0x3a7   : > { %v1553_v62 = vmax.f32 %v1552_v25, 0.0  ;;  %v1798_v47 = vpack.c.bf16 %v5269_v61, %v5267_v28  ;;  %v1692_v53 = vadd.f32 %v1691_v31, %v1676_v42  ;;  %v5280_v32 = vmul.f32 %v1689_v26, %v5259_v0  ;;  %v5328_v26 = vld [vmem:[%s6286_s9] sm:$0xff] }
 0x3a9   : > { %v1558_v59 = vadd.f32 1e-05, %v1553_v62  ;;  %1810 = vmatmul.bf16.vlgmr.msra.gmra.mxu1 %v1798_v47 }
 0x3ab   : > { %4382 = vrsqrt.f32 %v1558_v59  ;;  %vm1565_vm3 = vweird.f32 %v1558_v59 }
 0x3ac   : > { %v1789_v19 = vpop.f32.mrf.mxu3 }
 0x3ad   : > { %v5273_v38 = vadd.f32 %v1789_v19, %v1771_v58  ;;  %v1556_v19 = vsub.f32 %v5204_v35, %v5262_v44  ;;  %v1555_v35 = vsub.f32 %v5197_v46, %v5262_v44  ;;  %v5306_v58 = vld [vmem:[%s6285_s8] sm:$0xff]  ;;  %v5321_v46 = vld [vmem:[%s6286_s9 + $0x18] sm:$0xff] }
 0x3ae   : > { %v1678_v24 = vpop.f32.mrf.mxu0 }
 0x3af   : > { %v1693_v51 = vadd.f32 %v1692_v53, %v1678_v24  ;;  %v5289_v24 = vld [vmem:[%s6285_s8 + $0x10] sm:$0xff] }
 0x3b1   : > { %v4383_v54 = vpop.eup %4382  ;;  %v1694_v20 = vrot.slane %v1693_v51, 4 }
 0x3b2   : > { %v1560_v40 = vmul.f32 %v4383_v54, %v1558_v59  ;;  %vm1566_vm2 = vweird.f32 %v4383_v54 }
 0x3b3   : > { %v1695_v49 = vadd.f32 %v1694_v20, %v1693_v51  ;;  %vm1567_vm4 = vmor %vm1565_vm3, %vm1566_vm2  ;;  %v5294_v51 = vld [vmem:[%s6285_s8 + $0x18] sm:$0xff]  ;;  %v1701_v20 = vmul.f32 %v5280_v32, %v5280_v32 }
 0x3b4   : > { %v1561_v18 = vmul.f32 %v4383_v54, %v1560_v40  ;;  %v1791_v16 = vpop.f32.mrf.mxu3 }
 0x3b5   : > { %v1696_v50 = vrot.slane %v1695_v49, 2  ;;  %v5275_v43 = vadd.f32 %v1791_v16, %v1773_v11 }
 0x3b6   : > { %v1562_v25 = vmul.f32 0.5, %v1561_v18  ;;  %v1934_v41 = vpop.f32.mrf.mxu0 }
 0x3b7   : > { %v1697_v42 = vadd.f32 %v1696_v50, %v1695_v49  ;;  %v1799_v62 = vpack.c.bf16 %v5275_v43, %v5273_v38  ;;  %v5333_v50 = vld [vmem:[%s6286_s9 + $0x8] sm:$0xff] }
 0x3b8   : > { %v1563_v47 = vsub.f32 1.5, %v1562_v25  ;;  %v1898_v25 = vpop.f32.mrf.mxu2 }
 0x3b9   : > { %v1698_v37 = vrot.slane %v1697_v42, 1  ;;  %1815 = vmatmul.bf16.gmra.mxu1 %v1799_v62 }
 0x3ba   : > { %v1564_v31 = vmul.f32 %v4383_v54, %v1563_v47 }
 0x3bb   : > { %v1699_v3 = vadd.f32 %v1698_v37, %v1697_v42 }
 0x3bc   : > { %v1915_v53 = vpop.f32.mrf.mxu3  ;;  %v1568_v59 = vsel %vm1567_vm4, %v4383_v54, %v1564_v31  ;;  %v5311_v54 = vld [vmem:[%s6285_s8 + $0x8] sm:$0xff] }
 0x3bd   : > { %v1700_v22 = vmul.f32 %v1699_v3, %v5259_v0  ;;  %v1571_v8 = vmul.f32 %v1568_v59, %v1556_v19  ;;  %v1572_v40 = vmul.f32 %v1568_v59, %v1557_v39  ;;  %v1569_v44 = vmul.f32 %v1568_v59, %v1554_v13 }
 0x3be   : > { %v1570_v11 = vmul.f32 %v1568_v59, %v1555_v35  ;;  %v1936_v3 = vpop.f32.mrf.mxu0  ;;  %v1795_v19 = vmul.f32 %v5269_v61, %v5269_v61  ;;  %v1916_v35 = vadd.f32 %v1915_v53, %v1896_v33 }
 0x3bf   : > { %v1702_v49 = vsub.f32 %v1700_v22, %v1701_v20  ;;  %v1575_v18 = vmul.f32 %v1571_v8, %v5289_v24  ;;  %v1576_v16 = vmul.f32 %v1572_v40, %v5294_v51  ;;  %v1573_v42 = vmul.f32 %v1569_v44, %v5306_v58 }
 0x3c0   : > { %v1574_v62 = vmul.f32 %v1570_v11, %v5311_v54  ;;  %v1794_v11 = vmul.f32 %v5267_v28, %v5267_v28  ;;  %v5357_v53 = vadd.f32 %v1934_v41, %v1916_v35 }
 0x3c1   : > { %v1703_v47 = vmax.f32 %v1702_v49, 0.0  ;;  %v1579_v37 = vadd.f32 %v1575_v18, %v5316_v55  ;;  %v1580_v31 = vadd.f32 %v1576_v16, %v5321_v46  ;;  %v1577_v39 = vadd.f32 %v1573_v42, %v5328_v26 }
 0x3c2   : > { %v1578_v59 = vadd.f32 %v1574_v62, %v5333_v50 }
 0x3c3   : > { %v1708_v13 = vadd.f32 1e-05, %v1703_v47  ;;  %v2039_v22 = vmax.f32 %v1579_v37, 0.0  ;;  %v2043_v20 = vmax.f32 %v1580_v31, 0.0  ;;  %v2031_v40 = vmax.f32 %v1577_v39, 0.0 }
 0x3c4   : > { %v1917_v8 = vpop.f32.mrf.mxu3  ;;  %v2035_v44 = vmax.f32 %v1578_v59, 0.0  ;;  %v1800_v47 = vpack.c.bf16 %v1795_v19, %v1794_v11 }
 0x3c5   : > { %4384 = vrsqrt.f32 %v1708_v13  ;;  %v1918_v49 = vadd.f32 %v1917_v8, %v1898_v25  ;;  %v5346_v18 = vadd.f32 %v2039_v22, %v4756_v56  ;;  %v5349_v16 = vadd.f32 %v2043_v20, %v4758_v57  ;;  %v1901_v57 = vpop.f32.mrf.mxu2  ;;  %v5378_v22 = vld [vmem:[%s6282_s5 + $0x30] sm:$0xff] }
 0x3c6   : > { %v5352_v42 = vadd.f32 %v2031_v40, %v4772_v10  ;;  %v5355_v33 = vadd.f32 %v2035_v44, %v4763_v60  ;;  %v1939_v19 = vpop.f32.mrf.mxu0  ;;  %v1797_v44 = vmul.f32 %v5275_v43, %v5275_v43  ;;  %vm1715_vm6 = vweird.f32 %v1708_v13 }
 0x3c7   : > { %6341 = vst [vmem:[#allocation4_spill] sm:$0xff] %v5346_v18  ;;  %v5359_v62 = vadd.f32 %v1936_v3, %v1918_v49  ;;  %v6301_v37 = vmax.f32 %v5346_v18, 0.0  ;;  %v6300_v25 = vmax.f32 %v5349_v16, 0.0  ;;  %v1796_v49 = vmul.f32 %v5273_v38, %v5273_v38 }
 0x3c8   : > { %6342 = vst [vmem:[#allocation5_spill] sm:$0xff] %v5349_v16  ;;  %v6295_v10 = vmax.f32 %v5352_v42, 0.0  ;;  %v6294_v41 = vmax.f32 %v5355_v33, 0.0 }
 0x3c9   : > { %6343 = vst [vmem:[#allocation6_spill] sm:$0xff] %v5352_v42  ;;  %v1948_v56 = vpack.c.bf16 %v5359_v62, %v5357_v53  ;;  %1820 = vmatmul.bf16.gmra.mxu1 %v1800_v47  ;;  %v2096_v60 = vpack.c.bf16 %v6300_v25, %v6301_v37 }
 0x3ca   : > { %6344 = vst [vmem:[#allocation7_spill] sm:$0xff] %v5355_v33  ;;  %v2092_v35 = vpack.c.bf16 %v6294_v41, %v6295_v10 }
 0x3cb   : > { %v4385_v31 = vpop.eup %4384  ;;  %1960 = vmatmul.bf16.vlgmr.msrb.gmra.mxu2 %v1948_v56  ;;  %2227 = vmatpush.bf16.msra.mxu3 %v2096_v60 }
 0x3cc   : > { %v1710_v3 = vmul.f32 %v4385_v31, %v1708_v13  ;;  %v1920_v39 = vpop.f32.mrf.mxu3  ;;  %vm1716_vm5 = vweird.f32 %v4385_v31  ;;  %v1705_v13 = vsub.f32 %v5218_v45, %v5280_v32 }
 0x3cd   : > { %v1921_v40 = vadd.f32 %v1920_v39, %v1901_v57  ;;  %v1903_v11 = vpop.f32.mrf.mxu2  ;;  %vm1717_vm7 = vmor %vm1715_vm6, %vm1716_vm5  ;;  %v1707_v57 = vsub.f32 %v5231_v21, %v5280_v32  ;;  %v1704_v39 = vsub.f32 %v5216_v17, %v5280_v32 }
 0x3ce   : > { %v1711_v59 = vmul.f32 %v4385_v31, %v1710_v3  ;;  %v1706_v3 = vsub.f32 %v5229_v23, %v5280_v32 }
 0x3cf   : > { %2228 = vmatpush.bf16.msra.mxu3 %v2092_v35  ;;  %v1941_v35 = vpop.f32.mrf.mxu0 }
 0x3d0   : > { %v1712_v20 = vmul.f32 0.5, %v1711_v59  ;;  %v5392_v59 = vadd.f32 %v1939_v19, %v1921_v40 }
 0x3d2   : > { %v1713_v8 = vsub.f32 1.5, %v1712_v20  ;;  %3937 = vmatmul.msk.bf16.vlgmr.msra.gmra.mxu3 %vm1049_vm0, %v5378_v22  ;;  %v1801_v20 = vpack.c.bf16 %v1797_v44, %v1796_v49 }
 0x3d4   : > { %v1714_v47 = vmul.f32 %v4385_v31, %v1713_v8  ;;  %v1922_v56 = vpop.f32.mrf.mxu3 }
 0x3d5   : > { %v1923_v60 = vadd.f32 %v1922_v56, %v1903_v11 }
 0x3d6   : > { %v1718_v41 = vsel %vm1717_vm7, %v4385_v31, %v1714_v47 }
 0x3d7   : > { %v5396_v8 = vadd.f32 %v1941_v35, %v1923_v60  ;;  %v1721_v11 = vmul.f32 %v1718_v41, %v1706_v3  ;;  %v1722_v56 = vmul.f32 %v1718_v41, %v1707_v57  ;;  %v1719_v10 = vmul.f32 %v1718_v41, %v1704_v39  ;;  %v5411_v57 = vld [vmem:[%s6282_s5 + $0x38] sm:$0xff] }
 0x3d8   : > { %v1720_v23 = vmul.f32 %v1718_v41, %v1705_v13 }
 0x3d9   : > { %1825 = vmatmul.bf16.gmra.mxu1 %v1801_v20  ;;  %v1949_v21 = vpack.c.bf16 %v5396_v8, %v5392_v59  ;;  %v1725_v17 = vmul.f32 %v1721_v11, %v5289_v24  ;;  %v1726_v19 = vmul.f32 %v1722_v56, %v5294_v51  ;;  %v1723_v40 = vmul.f32 %v1719_v10, %v5306_v58 }
 0x3da   : > { %v1724_v31 = vmul.f32 %v1720_v23, %v5311_v54  ;;  %v1944_v23 = vmul.f32 %v5357_v53, %v5357_v53 }
 0x3db   : > { %1965 = vmatmul.bf16.gmra.mxu2 %v1949_v21  ;;  %v1729_v45 = vadd.f32 %v1725_v17, %v5316_v55  ;;  %v1730_v32 = vadd.f32 %v1726_v19, %v5321_v46  ;;  %v1727_v44 = vadd.f32 %v1723_v40, %v5328_v26  ;;  %v5448_v17 = vld [vmem:[%s6282_s5 + $0x40] sm:$0xff]  ;;  %v1947_v19 = vmul.f32 %v5396_v8, %v5396_v8 }
 0x3dc   : > { %v1728_v41 = vadd.f32 %v1724_v31, %v5333_v50  ;;  %v1946_v40 = vmul.f32 %v5392_v59, %v5392_v59 }
 0x3dd   : > { %v2040_v49 = vmax.f32 %v1729_v45, 0.0  ;;  %v2044_v47 = vmax.f32 %v1730_v32, 0.0  ;;  %v2032_v60 = vmax.f32 %v1727_v44, 0.0  ;;  %v5461_v45 = vld [vmem:[%s6282_s5 + $0x48] sm:$0xff]  ;;  %v5470_v32 = vld [vmem:[%s6282_s5 + $0x50] sm:$0xff]  ;;  %v5479_v44 = vld [vmem:[%s6282_s5 + $0x58] sm:$0xff] }
 0x3de   : > { %v2036_v3 = vmax.f32 %v1728_v41, 0.0  ;;  %v1951_v31 = vpack.c.bf16 %v1947_v19, %v1946_v40  ;;  %v5484_v41 = vld [vmem:[%s6284_s7 + $0xf8] sm:$0xff]  ;;  %v5532_v40 = vld [vmem:[%s6284_s7 + $0xc0] sm:$0xff] }
 0x3df   : > { %v5414_v10 = vadd.f32 %v2040_v49, %v4767_v63  ;;  %v5417_v39 = vadd.f32 %v2044_v47, %v4769_v7  ;;  %v5420_v35 = vadd.f32 %v2032_v60, %v4775_v12  ;;  %6349 = vst [vmem:[#allocation12_spill] sm:$0xff] %v5484_v41  ;;  %2576 = vmatpush.bf16.msrb.mxu3 %v5484_v41  ;;  %v5492_v47 = vld [vmem:[%s6284_s7 + $0xf0] sm:$0xff]  ;;  %v5498_v60 = vld [vmem:[%s6284_s7 + $0xe8] sm:$0xff] }
 0x3e0   : > { %v5423_v20 = vadd.f32 %v2036_v3, %v4777_v14  ;;  %v1945_v14 = vmul.f32 %v5359_v62, %v5359_v62  ;;  %6350 = vst [vmem:[#allocation13_spill] sm:$0xff] %v5492_v47 }
 0x3e1   : > { %6345 = vst [vmem:[#allocation8_spill] sm:$0xff] %v5414_v10  ;;  %v6299_v13 = vmax.f32 %v5414_v10, 0.0  ;;  %v6298_v11 = vmax.f32 %v5417_v39, 0.0  ;;  %v6297_v7 = vmax.f32 %v5420_v35, 0.0 }
 0x3e2   : > { %6346 = vst [vmem:[#allocation9_spill] sm:$0xff] %v5417_v39  ;;  %3938 = vmatmul.msk.bf16.gmra.mxu3 %vm1049_vm0, %v5411_v57  ;;  %v6296_v12 = vmax.f32 %v5423_v20, 0.0  ;;  %v1950_v21 = vpack.c.bf16 %v1945_v14, %v1944_v23  ;;  %v5512_v14 = vld [vmem:[%s6284_s7 + $0xd8] sm:$0xff]  ;;  %v5518_v23 = vld [vmem:[%s6284_s7 + $0xd0] sm:$0xff] }
 0x3e3   : > { %6347 = vst [vmem:[#allocation10_spill] sm:$0xff] %v5420_v35  ;;  %v2097_v63 = vpack.c.bf16 %v6298_v11, %v6299_v13  ;;  %2577 = vmatpush.bf16.msrb.mxu3 %v5492_v47  ;;  %v5582_v35 = vpop.permute.xlu2 %2120 }
 0x3e4   : > { %6348 = vst [vmem:[#allocation11_spill] sm:$0xff] %v5423_v20  ;;  %v2093_v56 = vpack.c.bf16 %v6296_v12, %v6297_v7  ;;  %v5546_v7 = vld [vmem:[%s6284_s7 + $0x130] sm:$0xff] }
 0x3e5   : > { %2266 = vmatpush.bf16.msrb.mxu0 %v2097_v63  ;;  %6351 = vst [vmem:[#allocation14_spill] sm:$0xff] %v5498_v60  ;;  %v5506_v63 = vld [vmem:[%s6284_s7 + $0xe0] sm:$0xff] }
 0x3e6   : > { %6352 = vst [vmem:[#allocation15_spill] sm:$0xff] %v5506_v63 }
 0x3e7   : > { %2578 = vmatpush.bf16.msrb.mxu3 %v5498_v60  ;;  %6353 = vst [vmem:[#allocation16_spill] sm:$0xff] %v5512_v14 }
 0x3e8   : > { %6354 = vst [vmem:[#allocation17_spill] sm:$0xff] %v5518_v23 }
 0x3e9   : > { %2267 = vmatpush.bf16.msrb.mxu0 %v2093_v56 }
 0x3eb   : > { %1970 = vmatmul.bf16.gmra.mxu2 %v1950_v21  ;;  %2579 = vmatpush.bf16.msrb.mxu3 %v5506_v63  ;;  %v5524_v21 = vld [vmem:[%s6284_s7 + $0xc8] sm:$0xff] }
 0x3ec   : > { %3943 = vmatmul.msk.bf16.vlgmr.msrb.gmra.mxu0 %vm1049_vm0, %v5378_v22  ;;  %6355 = vst [vmem:[#allocation18_spill] sm:$0xff] %v5524_v21 }
 0x3ef   : > { %2580 = vmatpush.bf16.msrb.mxu3 %v5512_v14 }
 0x3f2   : > { %3939 = vmatmul.msk.bf16.gmra.mxu3 %vm1049_vm0, %v5448_v17 }
 0x3f3   : > { %2581 = vmatpush.bf16.msrb.mxu3 %v5518_v23 }
 0x3f7   : > { %2582 = vmatpush.bf16.msrb.mxu3 %v5524_v21 }
 0x3fb   : > { %1975 = vmatmul.bf16.gmra.mxu2 %v1951_v31  ;;  %2583 = vmatpush.bf16.msrb.mxu3 %v5532_v40  ;;  %v5539_v31 = vld [vmem:[%s6284_s7 + $0x138] sm:$0xff] }
 0x3fc   : > { %3944 = vmatmul.msk.bf16.gmra.mxu0 %vm1049_vm0, %v5411_v57 }
 0x3fd   : > { %2595 = vmatpush.bf16.msra.mxu0 %v5539_v31 }
 0x3ff   : > { %2651 = vmatpush.bf16.msra.mxu3 %v5099_v6  ;;  %v5553_v6 = vld [vmem:[%s6284_s7 + $0x128] sm:$0xff] }
 0x401   : > { %2596 = vmatpush.bf16.msra.mxu0 %v5546_v7 }
 0x402   : > { %3940 = vmatmul.msk.bf16.gmra.mxu3 %vm1049_vm0, %v5461_v45 }
 0x403   : > { %2652 = vmatpush.bf16.msra.mxu3 %v5106_v9 }
 0x405   : > { %2597 = vmatpush.bf16.msra.mxu0 %v5553_v6 }
 0x407   : > { %2653 = vmatpush.bf16.msra.mxu3 %v5113_v27 }
 0x40b   : > { %2654 = vmatpush.bf16.msra.mxu3 %v5124_v2 }
 0x40c   : > { %3945 = vmatmul.msk.bf16.gmra.mxu0 %vm1049_vm0, %v5448_v17 }
 0x40f   : > { %2655 = vmatpush.bf16.msra.mxu3 %v5131_v48  ;;  %v5579_v48 = vpop.permute.xlu1 %2115 }
 0x412   : > { %3941 = vmatmul.msk.bf16.gmra.mxu3 %vm1049_vm0, %v5470_v32 }
 0x413   : > { %2656 = vmatpush.bf16.msra.mxu3 %v5138_v52  ;;  %v5587_v52 = vld [vmem:[%s6284_s7 + $0x108] sm:$0xff] }
 0x414   : > { %6357 = vst [vmem:[#allocation20_spill] sm:$0xff] %v5587_v52 }
 0x417   : > { %2657 = vmatpush.bf16.msra.mxu3 %v5145_v5  ;;  %v5594_v5 = vld [vmem:[%s6284_s7 + $0x100] sm:$0xff] }
 0x418   : > { %6358 = vst [vmem:[#allocation21_spill] sm:$0xff] %v5594_v5 }
 0x41b   : > { %2658 = vmatpush.bf16.msra.mxu3 %v5156_v1  ;;  %v5600_v1 = vpop.permute.xlu1 %2140 }
 0x41c   : > { %3946 = vmatmul.msk.bf16.gmra.mxu0 %vm1049_vm0, %v5461_v45 }
 0x422   : > { %3942 = vmatmul.msk.bf16.gmra.mxu3 %vm1049_vm0, %v5479_v44 }
 0x426   : > { %v1811_v49 = vpop.f32.mrf.mxu1 }
 0x42c   : > { %3947 = vmatmul.msk.bf16.gmra.mxu0 %vm1049_vm0, %v5470_v32 }
 0x42e   : > { %v1813_v3 = vpop.f32.mrf.mxu1 }
 0x42f   : > { %v1831_v11 = vadd.f32 %v1813_v3, %v1811_v49  ;;  %v5562_v49 = vld [vmem:[%s6284_s7 + $0x120] sm:$0xff] }
 0x430   : > { %2598 = vmatpush.bf16.msra.mxu0 %v5562_v49 }
 0x436   : > { %v1816_v56 = vpop.f32.mrf.mxu1 }
 0x437   : > { %v1832_v13 = vadd.f32 %v1831_v11, %v1816_v56  ;;  %v5569_v11 = vld [vmem:[%s6284_s7 + $0x118] sm:$0xff]  ;;  %v5576_v56 = vld [vmem:[%s6284_s7 + $0x110] sm:$0xff] }
 0x438   : > { %2599 = vmatpush.bf16.msra.mxu0 %v5569_v11  ;;  %6356 = vst [vmem:[#allocation19_spill] sm:$0xff] %v5576_v56 }
 0x43c   : > { %3948 = vmatmul.msk.bf16.gmra.mxu0 %vm1049_vm0, %v5479_v44 }
 0x43d   : > { %2600 = vmatpush.bf16.msra.mxu0 %v5576_v56 }
 0x43e   : > { %v1818_v19 = vpop.f32.mrf.mxu1 }
 0x43f   : > { %v1833_v9 = vadd.f32 %v1832_v13, %v1818_v19 }
 0x441   : > { %v1834_v27 = vrot.slane %v1833_v9, 4  ;;  %2601 = vmatpush.bf16.msra.mxu0 %v5587_v52 }
 0x443   : > { %v1835_v2 = vadd.f32 %v1834_v27, %v1833_v9 }
 0x445   : > { %v1836_v20 = vrot.slane %v1835_v2, 2  ;;  %2602 = vmatpush.bf16.msra.mxu0 %v5594_v5 }
 0x446   : > { %v1821_v12 = vpop.f32.mrf.mxu1 }
 0x447   : > { %v1837_v27 = vadd.f32 %v1836_v20, %v1835_v2 }
 0x449   : > { %2736 = vmatpush.bf16.msrb.mxu0 %v5484_v41  ;;  %v5609_v41 = vpop.permute.xlu1 %2125 }
 0x44d   : > { %2737 = vmatpush.bf16.msrb.mxu0 %v5492_v47 }
 0x44e   : > { %v1823_v25 = vpop.f32.mrf.mxu1  ;;  %v5557_v37 = vpop.f32.mrf.mxu2 }
 0x44f   : > { %v1841_v9 = vadd.f32 %v1823_v25, %v1821_v12  ;;  %v1838_v25 = vrot.slane %v1837_v27, 1 }
 0x451   : > { %2738 = vmatpush.bf16.msrb.mxu0 %v5498_v60 }
 0x455   : > { %v2230_v13 = vpop.f32.mrf.mxu3  ;;  %2739 = vmatpush.bf16.msrb.mxu0 %v5506_v63 }
 0x456   : > { %v1826_v3 = vpop.f32.mrf.mxu1  ;;  %v1963_v19 = vpop.f32.mrf.mxu2  ;;  %v2231_v42 = vadd.f32 %v2230_v13, %v5579_v48 }
 0x457   : > { %v1842_v39 = vadd.f32 %v1841_v9, %v1826_v3  ;;  %v5602_v3 = vpop.permute.xlu2 %2155  ;;  %v1839_v9 = vadd.f32 %v1838_v25, %v1837_v27 }
 0x459   : > { %v5606_v13 = vmul.f32 %v1839_v9, %v5259_v0  ;;  %2740 = vmatpush.bf16.msrb.mxu0 %v5512_v14 }
 0x45b   : > { %v1851_v27 = vmul.f32 %v5606_v13, %v5606_v13 }
 0x45d   : > { %v2232_v10 = vpop.f32.mrf.mxu3  ;;  %2741 = vmatpush.bf16.msrb.mxu0 %v5518_v23 }
 0x45e   : > { %v1828_v33 = vpop.f32.mrf.mxu1  ;;  %v2233_v16 = vadd.f32 %v2232_v10, %v5582_v35  ;;  %v1966_v56 = vpop.f32.mrf.mxu2 }
 0x45f   : > { %v1843_v18 = vadd.f32 %v1842_v39, %v1828_v33  ;;  %v5615_v25 = vpop.permute.xlu2 %2130 }
 0x460   : > { %v2426_v20 = vpack.c.bf16 %v2233_v16, %v2231_v42 }
 0x461   : > { %v1844_v12 = vrot.slane %v1843_v18, 4  ;;  %2742 = vmatpush.bf16.msrb.mxu0 %v5524_v21 }
 0x462   : > { %2584 = vmatmul.bf16.vlgmr.msrb.gmra.mxu3 %v2426_v20 }
 0x463   : > { %v1845_v2 = vadd.f32 %v1844_v12, %v1843_v18 }
 0x465   : > { %v1846_v52 = vrot.slane %v1845_v2, 2  ;;  %v2235_v10 = vpop.f32.mrf.mxu3  ;;  %2743 = vmatpush.bf16.msrb.mxu0 %v5532_v40 }
 0x466   : > { %v1968_v39 = vpop.f32.mrf.mxu2  ;;  %v2236_v12 = vadd.f32 %v2235_v10, %v5609_v41 }
 0x467   : > { %v1847_v33 = vadd.f32 %v1846_v52, %v1845_v2 }
 0x469   : > { %v1848_v16 = vrot.slane %v1847_v33, 1 }
 0x46b   : > { %v1849_v42 = vadd.f32 %v1848_v16, %v1847_v33  ;;  %v1981_v16 = vadd.f32 %v1963_v19, %v5557_v37 }
 0x46d   : > { %v1850_v18 = vmul.f32 %v1849_v42, %v5259_v0  ;;  %v2237_v52 = vpop.f32.mrf.mxu3  ;;  %v1982_v47 = vadd.f32 %v1981_v16, %v1966_v56 }
 0x46e   : > { %v2238_v2 = vadd.f32 %v2237_v52, %v5615_v25  ;;  %v1971_v9 = vpop.f32.mrf.mxu2 }
 0x46f   : > { %v1852_v20 = vsub.f32 %v1850_v18, %v1851_v27  ;;  %v1983_v63 = vadd.f32 %v1982_v47, %v1968_v39  ;;  %v5622_v27 = vpop.permute.xlu0 %2135 }
 0x470   : > { %v2429_v33 = vpack.c.bf16 %v2238_v2, %v2236_v12 }
 0x471   : > { %v1853_v60 = vmax.f32 %v1852_v20, 0.0  ;;  %v1984_v10 = vrot.slane %v1983_v63, 4 }
 0x472   : > { %2589 = vmatmul.bf16.gmra.mxu3 %v2429_v33 }
 0x473   : > { %v1858_v42 = vadd.f32 1e-05, %v1853_v60  ;;  %v1985_v37 = vadd.f32 %v1984_v10, %v1983_v63  ;;  %v5633_v63 = vld [vmem:[%s6287_s10 + $0x38] sm:$0xff]  ;;  %v1857_v10 = vsub.f32 %v5275_v43, %v5606_v13 }
 0x474   : > { %6359 = vst [vmem:[#allocation22_spill] sm:$0xff] %v5633_v63 }
 0x475   : > { %4386 = vrsqrt.f32 %v1858_v42  ;;  %v2240_v5 = vpop.f32.mrf.mxu3  ;;  %v1986_v16 = vrot.slane %v1985_v37, 2  ;;  %vm1865_vm9 = vweird.f32 %v1858_v42 }
 0x476   : > { %v1973_v18 = vpop.f32.mrf.mxu2  ;;  %v2241_v56 = vadd.f32 %v2240_v5, %v5622_v27  ;;  %v1856_v5 = vsub.f32 %v5273_v38, %v5606_v13  ;;  %v5647_v38 = vld [vmem:[%s6287_s10 + $0x30] sm:$0xff] }
 0x477   : > { %v5628_v23 = vpop.permute.xlu0 %2160  ;;  %v1991_v14 = vadd.f32 %v1973_v18, %v1971_v9 }
 0x47b   : > { %v4387_v52 = vpop.eup %4386 }
 0x47c   : > { %v1860_v20 = vmul.f32 %v4387_v52, %v1858_v42  ;;  %vm1866_vm8 = vweird.f32 %v4387_v52 }
 0x47d   : > { %v2242_v60 = vpop.f32.mrf.mxu3  ;;  %vm1867_vm10 = vmor %vm1865_vm9, %vm1866_vm8 }
 0x47e   : > { %v1861_v12 = vmul.f32 %v4387_v52, %v1860_v20  ;;  %v2243_v19 = vadd.f32 %v2242_v60, %v5600_v1  ;;  %v1976_v2 = vpop.f32.mrf.mxu2  ;;  %v1854_v20 = vsub.f32 %v5267_v28, %v5606_v13  ;;  %v1855_v60 = vsub.f32 %v5269_v61, %v5606_v13 }
 0x47f   : > { %v1992_v42 = vadd.f32 %v1991_v14, %v1976_v2 }
 0x480   : > { %v1862_v47 = vmul.f32 0.5, %v1861_v12  ;;  %v2427_v39 = vpack.c.bf16 %v2243_v19, %v2241_v56  ;;  %v1987_v12 = vadd.f32 %v1986_v16, %v1985_v37  ;;  %v2269_v16 = vpop.f32.mrf.mxu0 }
 0x482   : > { %v1863_v33 = vsub.f32 1.5, %v1862_v47  ;;  %2603 = vmatmul.bf16.vlgmr.msra.gmra.mxu0 %v2427_v39  ;;  %v1988_v61 = vrot.slane %v1987_v12, 1 }
 0x483   : > { %2801 = vmatpush.bf16.msra.mxu0 %v5633_v63 }
 0x484   : > { %v1864_v21 = vmul.f32 %v4387_v52, %v1863_v33 }
 0x485   : > { %v2245_v9 = vpop.f32.mrf.mxu3 }
 0x486   : > { %v1868_v18 = vsel %vm1867_vm10, %v4387_v52, %v1864_v21  ;;  %v1978_v56 = vpop.f32.mrf.mxu2 }
 0x487   : > { %v1871_v19 = vmul.f32 %v1868_v18, %v1856_v5  ;;  %v1872_v47 = vmul.f32 %v1868_v18, %v1857_v10  ;;  %v1869_v39 = vmul.f32 %v1868_v18, %v1854_v20  ;;  %v1993_v33 = vadd.f32 %v1992_v42, %v1978_v56  ;;  %2802 = vmatpush.bf16.msra.mxu0 %v5647_v38  ;;  %v5661_v20 = vld [vmem:[%s6287_s10 + $0x28] sm:$0xff]  ;;  %v5664_v42 = vpop.permute.xlu0 %2145  ;;  %v5666_v56 = vpop.permute.xlu1 %2150 }
 0x488   : > { %v1870_v63 = vmul.f32 %v1868_v18, %v1855_v60 }
 0x489   : > { %v1875_v28 = vmul.f32 %v1871_v19, %v5289_v24  ;;  %v1876_v43 = vmul.f32 %v1872_v47, %v5294_v51  ;;  %v1873_v14 = vmul.f32 %v1869_v39, %v5306_v58  ;;  %v1994_v21 = vrot.slane %v1993_v33, 4 }
 0x48a   : > { %v1874_v13 = vmul.f32 %v1870_v63, %v5311_v54  ;;  %v1989_v19 = vadd.f32 %v1988_v61, %v1987_v12  ;;  %v2246_v47 = vadd.f32 %v2245_v9, %v5664_v42  ;;  %v5685_v12 = vld [vmem:[%s6287_s10 + $0x20] sm:$0xff] }
 0x48b   : > { %v1879_v52 = vadd.f32 %v1875_v28, %v5316_v55  ;;  %v1880_v37 = vadd.f32 %v1876_v43, %v5321_v46  ;;  %v1877_v2 = vadd.f32 %v1873_v14, %v5328_v26  ;;  %v1995_v5 = vadd.f32 %v1994_v21, %v1993_v33  ;;  %2803 = vmatpush.bf16.msra.mxu0 %v5661_v20 }
 0x48c   : > { %v1878_v10 = vadd.f32 %v1874_v13, %v5333_v50  ;;  %v1990_v61 = vmul.f32 %v1989_v19, %v5259_v0 }
 0x48d   : > { %v2041_v63 = vmax.f32 %v1879_v52, 0.0  ;;  %v2045_v18 = vmax.f32 %v1880_v37, 0.0  ;;  %v2033_v60 = vmax.f32 %v1877_v2, 0.0  ;;  %v1996_v39 = vrot.slane %v1995_v5, 2  ;;  %v2247_v33 = vpop.f32.mrf.mxu3 }
 0x48e   : > { %v2037_v28 = vmax.f32 %v1878_v10, 0.0  ;;  %v2248_v43 = vadd.f32 %v2247_v33, %v5666_v56  ;;  %v2001_v19 = vmul.f32 %v1990_v61, %v1990_v61  ;;  %v5711_v33 = vld [vmem:[%s6287_s10 + $0x10] sm:$0xff] }
 0x48f   : > { %v5671_v14 = vadd.f32 %v2041_v63, %v4796_v29  ;;  %v5674_v21 = vadd.f32 %v2045_v18, %v4798_v30  ;;  %v5677_v13 = vadd.f32 %v2033_v60, %v4811_v36  ;;  %v1997_v52 = vadd.f32 %v1996_v39, %v1995_v5  ;;  %2804 = vmatpush.bf16.msra.mxu0 %v5685_v12  ;;  %v5700_v63 = vld [vmem:[%s6287_s10 + $0x18] sm:$0xff]  ;;  %v2271_v18 = vpop.f32.mrf.mxu0 }
 0x490   : > { %v5680_v37 = vadd.f32 %v2037_v28, %v4806_v34  ;;  %v2430_v9 = vpack.c.bf16 %v2248_v43, %v2246_v47 }
 0x491   : > { %6360 = vst [vmem:[#allocation23_spill] sm:$0xff] %v5674_v21  ;;  %v6335_v29 = vmax.f32 %v5671_v14, 0.0  ;;  %v6334_v30 = vmax.f32 %v5674_v21, 0.0  ;;  %v1998_v36 = vrot.slane %v1997_v52, 1  ;;  %v6333_v2 = vmax.f32 %v5677_v13, 0.0 }
 0x492   : > { %6361 = vst [vmem:[#allocation24_spill] sm:$0xff] %v5677_v13  ;;  %2608 = vmatmul.bf16.gmra.mxu0 %v2430_v9  ;;  %v6332_v5 = vmax.f32 %v5680_v37, 0.0  ;;  %v2272_v9 = vadd.f32 %v2271_v18, %v5582_v35 }
 0x493   : > { %6362 = vst [vmem:[#allocation25_spill] sm:$0xff] %v5680_v37  ;;  %v2098_v34 = vpack.c.bf16 %v6334_v30, %v6335_v29  ;;  %v1999_v10 = vadd.f32 %v1998_v36, %v1997_v52  ;;  %2805 = vmatpush.bf16.msra.mxu0 %v5700_v63  ;;  %v5719_v52 = vld [vmem:[%s6287_s10 + $0x8] sm:$0xff]  ;;  %v2270_v36 = vadd.f32 %v2269_v16, %v5579_v48 }
 0x494   : > { %v2094_v47 = vpack.c.bf16 %v6332_v5, %v6333_v2  ;;  %v2006_v30 = vsub.f32 %v5392_v59, %v1990_v61 }
 0x495   : > { %2305 = vmatpush.bf16.msrb.mxu1 %v2098_v34  ;;  %v2000_v60 = vmul.f32 %v1999_v10, %v5259_v0  ;;  %v5727_v10 = vld [vmem:[%s6287_s10] sm:$0xff] }
 0x497   : > { %v2002_v39 = vsub.f32 %v2000_v60, %v2001_v19  ;;  %2806 = vmatpush.bf16.msra.mxu0 %v5711_v33  ;;  %v2274_v34 = vpop.f32.mrf.mxu0  ;;  %v2730_v60 = vpack.c.bf16 %v2272_v9, %v2270_v36  ;;  %v2007_v9 = vsub.f32 %v5396_v8, %v1990_v61  ;;  %v2004_v36 = vsub.f32 %v5357_v53, %v1990_v61 }
 0x499   : > { %2306 = vmatpush.bf16.msrb.mxu1 %v2094_v47  ;;  %v2003_v28 = vmax.f32 %v2002_v39, 0.0 }
 0x49b   : > { %v2008_v43 = vadd.f32 1e-05, %v2003_v28  ;;  %2807 = vmatpush.bf16.msra.mxu0 %v5719_v52 }
 0x49c   : > { %3949 = vmatmul.msk.bf16.vlgmr.msrb.gmra.mxu1 %vm1049_vm0, %v5378_v22 }
 0x49d   : > { %4388 = vrsqrt.f32 %v2008_v43  ;;  %vm2015_vm12 = vweird.f32 %v2008_v43 }
 0x49f   : > { %2808 = vmatpush.bf16.msra.mxu0 %v5727_v10  ;;  %v2276_v5 = vpop.f32.mrf.mxu0 }
 0x4a0   : > { %v2277_v16 = vadd.f32 %v2276_v5, %v5615_v25 }
 0x4a2   : > { %2744 = vmatmul.bf16.vlgmr.msrb.gmra.mxu0 %v2730_v60  ;;  %v2005_v60 = vsub.f32 %v5359_v62, %v1990_v61 }
 0x4a3   : > { %v4389_v19 = vpop.eup %4388 }
 0x4a4   : > { %v2010_v47 = vmul.f32 %v4389_v19, %v2008_v43  ;;  %vm2016_vm11 = vweird.f32 %v4389_v19  ;;  %v4322_v43 = vld [vmem:[%s6284_s7 + $0x178] sm:$0xff] }
 0x4a5   : > { %vm2017_vm13 = vmor %vm2015_vm12, %vm2016_vm11  ;;  %2614 = vmatpush.bf16.msra.mxu1 %v4322_v43  ;;  %2924 = vmatpush.bf16.msrb.mxu3 %v4322_v43  ;;  %vm3631_vm11 = vcmask 254976  }
 0x4a6   : > { %v2011_v39 = vmul.f32 %v4389_v19, %v2010_v47  ;;  %v2275_v47 = vadd.f32 %v2274_v34, %v5609_v41  ;;  %3074 = vmatpush.bf16.msrb.mxu0 %v4322_v43 }
 0x4a8   : > { %v2012_v28 = vmul.f32 0.5, %v2011_v39  ;;  %v2733_v21 = vpack.c.bf16 %v2277_v16, %v2275_v47  ;;  %v4315_v47 = vld [vmem:[%s6284_s7 + $0x140] sm:$0xff] }
 0x4aa   : > { %v2013_v2 = vsub.f32 1.5, %v2012_v28 }
 0x4ac   : > { %3950 = vmatmul.msk.bf16.gmra.mxu1 %vm1049_vm0, %v5411_v57  ;;  %v2014_v18 = vmul.f32 %v4389_v19, %v2013_v2 }
 0x4ae   : > { %v2018_v39 = vsel %vm2017_vm13, %v4389_v19, %v2014_v18  ;;  %v4321_v19 = vld [vmem:[%s6284_s7 + $0x170] sm:$0xff]  ;;  %v4320_v18 = vld [vmem:[%s6284_s7 + $0x168] sm:$0xff] }
 0x4af   : > { %v2021_v28 = vmul.f32 %v2018_v39, %v2006_v30  ;;  %v2022_v29 = vmul.f32 %v2018_v39, %v2007_v9  ;;  %v2019_v37 = vmul.f32 %v2018_v39, %v2004_v36  ;;  %v2020_v13 = vmul.f32 %v2018_v39, %v2005_v60  ;;  %2615 = vmatpush.bf16.msra.mxu1 %v4321_v19  ;;  %v4319_v9 = vld [vmem:[%s6284_s7 + $0x160] sm:$0xff]  ;;  %v4317_v36 = vld [vmem:[%s6284_s7 + $0x150] sm:$0xff]  ;;  %v4316_v60 = vld [vmem:[%s6284_s7 + $0x148] sm:$0xff]  ;;  %v2279_v39 = vpop.f32.mrf.mxu0 }
 0x4b0   : > { %2925 = vmatpush.bf16.msrb.mxu3 %v4321_v19  ;;  %3075 = vmatpush.bf16.msrb.mxu0 %v4321_v19 }
 0x4b1   : > { %v2025_v2 = vmul.f32 %v2021_v28, %v5289_v24  ;;  %v2026_v5 = vmul.f32 %v2022_v29, %v5294_v51  ;;  %v2023_v59 = vmul.f32 %v2019_v37, %v5306_v58  ;;  %v2024_v8 = vmul.f32 %v2020_v13, %v5311_v54 }
 0x4b2   : > { %2749 = vmatmul.bf16.gmra.mxu0 %v2733_v21 }
 0x4b3   : > { %v2029_v53 = vadd.f32 %v2025_v2, %v5316_v55  ;;  %v2030_v62 = vadd.f32 %v2026_v5, %v5321_v46  ;;  %v2027_v61 = vadd.f32 %v2023_v59, %v5328_v26  ;;  %v2028_v30 = vadd.f32 %v2024_v8, %v5333_v50  ;;  %v6363_v55 = vld [vmem:[#allocation3_spill] sm:$0xff]  ;;  %v6364_v26 = vld [vmem:[#allocation2_spill] sm:$0xff]  ;;  %2616 = vmatpush.bf16.msra.mxu1 %v4320_v18 }
 0x4b4   : > { %2926 = vmatpush.bf16.msrb.mxu3 %v4320_v18  ;;  %3076 = vmatpush.bf16.msrb.mxu0 %v4320_v18  ;;  %v6365_v5 = vld [vmem:[#allocation19_spill] sm:$0xff] }
 0x4b5   : > { %v2042_v24 = vmax.f32 %v2029_v53, 0.0  ;;  %v2046_v34 = vmax.f32 %v2030_v62, 0.0  ;;  %v2034_v51 = vmax.f32 %v2027_v61, 0.0  ;;  %v2038_v29 = vmax.f32 %v2028_v30, 0.0  ;;  %v6367_v62 = vld [vmem:[#allocation21_spill] sm:$0xff] }
 0x4b7   : > { %v5750_v58 = vadd.f32 %v2042_v24, %v4821_v15  ;;  %v5753_v54 = vadd.f32 %v2046_v34, %v4823_v4  ;;  %v5756_v46 = vadd.f32 %v2034_v51, %v6363_v55  ;;  %v5759_v50 = vadd.f32 %v2038_v29, %v6364_v26  ;;  %2617 = vmatpush.bf16.msra.mxu1 %v4319_v9  ;;  %v2281_v2 = vpop.f32.mrf.mxu0  ;;  %v6369_v24 = vld [vmem:[#allocation13_spill] sm:$0xff]  ;;  %v5830_v51 = vpop.permute.xlu0 %2170  ;;  %v6370_v29 = vld [vmem:[#allocation14_spill] sm:$0xff] }
 0x4b8   : > { %2927 = vmatpush.bf16.msrb.mxu3 %v4319_v9  ;;  %3077 = vmatpush.bf16.msrb.mxu0 %v4319_v9  ;;  %v5836_v26 = vpop.permute.xlu2 %2165 }
 0x4b9   : > { %v2074_v21 = vmax.f32 %v5750_v58, 0.0  ;;  %v2078_v13 = vmax.f32 %v5753_v54, 0.0  ;;  %v2066_v4 = vmax.f32 %v5756_v46, 0.0  ;;  %v2070_v37 = vmax.f32 %v5759_v50, 0.0  ;;  %v4347_v58 = vld [vmem:[%s6288_s11 + $0xb8] sm:$0xff]  ;;  %v4346_v54 = vld [vmem:[%s6288_s11 + $0xb0] sm:$0xff] }
 0x4ba   : > { %v4345_v46 = vld [vmem:[%s6288_s11 + $0xa8] sm:$0xff]  ;;  %v4344_v50 = vld [vmem:[%s6288_s11 + $0xa0] sm:$0xff] }
 0x4bb   : > { %v2099_v15 = vpack.c.bf16 %v2078_v13, %v2074_v21  ;;  %v2095_v16 = vpack.c.bf16 %v2070_v37, %v2066_v4 }
 0x4bc   : > { %3951 = vmatmul.msk.bf16.gmra.mxu1 %vm1049_vm0, %v5448_v17 }
 0x4bd   : > { %2344 = vmatpush.bf16.msra.mxu2 %v2099_v15 }
 0x4bf   : > { %v2284_v61 = vpop.f32.mrf.mxu0 }
 0x4c1   : > { %2345 = vmatpush.bf16.msra.mxu2 %v2095_v16 }
 0x4c4   : > { %3955 = vmatmul.msk.bf16.vlgmr.msra.gmra.mxu2 %vm1049_vm0, %v5378_v22  ;;  %v4318_v22 = vld [vmem:[%s6284_s7 + $0x158] sm:$0xff] }
 0x4c5   : > { %2774 = vmatpush.bf16.msrb.mxu2 %v4322_v43  ;;  %2618 = vmatpush.bf16.msra.mxu1 %v4318_v22  ;;  %v6368_v43 = vld [vmem:[#allocation12_spill] sm:$0xff] }
 0x4c6   : > { %2928 = vmatpush.bf16.msrb.mxu3 %v4318_v22  ;;  %3078 = vmatpush.bf16.msrb.mxu0 %v4318_v22 }
 0x4c7   : > { %v2286_v34 = vpop.f32.mrf.mxu0 }
 0x4c9   : > { %2775 = vmatpush.bf16.msrb.mxu2 %v4321_v19  ;;  %2619 = vmatpush.bf16.msra.mxu1 %v4317_v36  ;;  %v6371_v19 = vld [vmem:[#allocation15_spill] sm:$0xff] }
 0x4ca   : > { %2929 = vmatpush.bf16.msrb.mxu3 %v4317_v36  ;;  %3079 = vmatpush.bf16.msrb.mxu0 %v4317_v36 }
 0x4cc   : > { %3952 = vmatmul.msk.bf16.gmra.mxu1 %vm1049_vm0, %v5461_v45 }
 0x4cd   : > { %2776 = vmatpush.bf16.msrb.mxu2 %v4320_v18  ;;  %2620 = vmatpush.bf16.msra.mxu1 %v4316_v60  ;;  %v6372_v18 = vld [vmem:[#allocation16_spill] sm:$0xff] }
 0x4ce   : > { %2930 = vmatpush.bf16.msrb.mxu3 %v4316_v60  ;;  %3080 = vmatpush.bf16.msrb.mxu0 %v4316_v60 }
 0x4d1   : > { %2777 = vmatpush.bf16.msrb.mxu2 %v4319_v9  ;;  %2621 = vmatpush.bf16.msra.mxu1 %v4315_v47  ;;  %v2289_v9 = vpop.f32.mrf.mxu0 }
 0x4d2   : > { %2931 = vmatpush.bf16.msrb.mxu3 %v4315_v47  ;;  %3081 = vmatpush.bf16.msrb.mxu0 %v4315_v47 }
 0x4d4   : > { %3956 = vmatmul.msk.bf16.gmra.mxu2 %vm1049_vm0, %v5411_v57  ;;  %v2250_v57 = vpop.f32.mrf.mxu3 }
 0x4d5   : > { %2778 = vmatpush.bf16.msrb.mxu2 %v4318_v22  ;;  %2755 = vmatpush.bf16.msrb.mxu1 %v5539_v31  ;;  %v2251_v8 = vadd.f32 %v2250_v57, %v5602_v3  ;;  %v6373_v22 = vld [vmem:[#allocation17_spill] sm:$0xff] }
 0x4d9   : > { %2779 = vmatpush.bf16.msrb.mxu2 %v4317_v36  ;;  %2756 = vmatpush.bf16.msrb.mxu1 %v5546_v7  ;;  %v2282_v36 = vadd.f32 %v2281_v2, %v5600_v1  ;;  %v2285_v2 = vadd.f32 %v2284_v61, %v5664_v42 }
 0x4dc   : > { %3953 = vmatmul.msk.bf16.gmra.mxu1 %vm1049_vm0, %v5470_v32  ;;  %v2252_v28 = vpop.f32.mrf.mxu3 }
 0x4dd   : > { %2780 = vmatpush.bf16.msrb.mxu2 %v4316_v60  ;;  %2757 = vmatpush.bf16.msrb.mxu1 %v5553_v6  ;;  %v2253_v59 = vadd.f32 %v2252_v28, %v5628_v23  ;;  %v2280_v60 = vadd.f32 %v2279_v39, %v5622_v27  ;;  %v2287_v39 = vadd.f32 %v2286_v34, %v5666_v56 }
 0x4df   : > { %v2428_v30 = vpack.c.bf16 %v2253_v59, %v2251_v8  ;;  %v2731_v28 = vpack.c.bf16 %v2282_v36, %v2280_v60  ;;  %v6375_v59 = vld [vmem:[#allocation22_spill] sm:$0xff] }
 0x4e1   : > { %2781 = vmatpush.bf16.msrb.mxu2 %v4315_v47  ;;  %2758 = vmatpush.bf16.msrb.mxu1 %v5562_v49  ;;  %v2291_v47 = vpop.f32.mrf.mxu0 }
 0x4e2   : > { %v2292_v8 = vadd.f32 %v2291_v47, %v5628_v23 }
 0x4e4   : > { %3957 = vmatmul.msk.bf16.gmra.mxu2 %vm1049_vm0, %v5448_v17  ;;  %v6366_v17 = vld [vmem:[#allocation20_spill] sm:$0xff]  ;;  %v2255_v53 = vpop.f32.mrf.mxu3 }
 0x4e5   : > { %2905 = vmatpush.bf16.msra.mxu2 %v5539_v31  ;;  %2759 = vmatpush.bf16.msrb.mxu1 %v5569_v11  ;;  %v2256_v15 = vadd.f32 %v2255_v53, %v5836_v26  ;;  %v2290_v53 = vadd.f32 %v2289_v9, %v5602_v3 }
 0x4e9   : > { %2906 = vmatpush.bf16.msra.mxu2 %v5546_v7  ;;  %2760 = vmatpush.bf16.msrb.mxu1 %v6365_v5 }
 0x4ec   : > { %3954 = vmatmul.msk.bf16.gmra.mxu1 %vm1049_vm0, %v5479_v44 }
 0x4ed   : > { %2907 = vmatpush.bf16.msra.mxu2 %v5553_v6  ;;  %2761 = vmatpush.bf16.msrb.mxu1 %v6366_v17 }
 0x4f1   : > { %2908 = vmatpush.bf16.msra.mxu2 %v5562_v49  ;;  %2762 = vmatpush.bf16.msrb.mxu1 %v6367_v62 }
 0x4f4   : > { %3958 = vmatmul.msk.bf16.gmra.mxu2 %vm1049_vm0, %v5461_v45  ;;  %v2257_v45 = vpop.f32.mrf.mxu3 }
 0x4f5   : > { %2909 = vmatpush.bf16.msra.mxu2 %v5569_v11  ;;  %v2258_v55 = vadd.f32 %v2257_v45, %v5830_v51  ;;  %v2732_v45 = vpack.c.bf16 %v2292_v8, %v2290_v53 }
 0x4f7   : > { %v2431_v16 = vpack.c.bf16 %v2258_v55, %v2256_v15  ;;  %v2734_v15 = vpack.c.bf16 %v2287_v39, %v2285_v2 }
 0x4f9   : > { %2910 = vmatpush.bf16.msra.mxu2 %v6365_v5 }
 0x4fc   : > { %2622 = vmatmul.bf16.vlgmr.msra.gmra.mxu1 %v2428_v30 }
 0x4fd   : > { %2911 = vmatpush.bf16.msra.mxu2 %v6366_v17  ;;  %2886 = vmatpush.bf16.msra.mxu1 %v6368_v43 }
 0x501   : > { %2912 = vmatpush.bf16.msra.mxu2 %v6367_v62  ;;  %2887 = vmatpush.bf16.msra.mxu1 %v6369_v24 }
 0x504   : > { %3959 = vmatmul.msk.bf16.gmra.mxu2 %vm1049_vm0, %v5470_v32  ;;  %v6374_v32 = vld [vmem:[#allocation18_spill] sm:$0xff] }
 0x505   : > { %2888 = vmatpush.bf16.msra.mxu1 %v6370_v29 }
 0x509   : > { %2889 = vmatpush.bf16.msra.mxu1 %v6371_v19 }
 0x50c   : > { %2627 = vmatmul.bf16.gmra.mxu1 %v2431_v16 }
 0x50d   : > { %2890 = vmatpush.bf16.msra.mxu1 %v6372_v18 }
 0x511   : > { %2891 = vmatpush.bf16.msra.mxu1 %v6373_v22 }
 0x514   : > { %3960 = vmatmul.msk.bf16.gmra.mxu2 %vm1049_vm0, %v5479_v44  ;;  %v2294_v44 = vpop.f32.mrf.mxu0 }
 0x515   : > { %2892 = vmatpush.bf16.msra.mxu1 %v6374_v32  ;;  %v2295_v34 = vadd.f32 %v2294_v44, %v5836_v26 }
 0x519   : > { %v2308_v57 = vpop.f32.mrf.mxu1  ;;  %2893 = vmatpush.bf16.msra.mxu1 %v5532_v40 }
 0x51c   : > { %2763 = vmatmul.bf16.vlgmr.msrb.gmra.mxu1 %v2731_v28  ;;  %v2296_v16 = vpop.f32.mrf.mxu0 }
 0x51d   : > { %2951 = vmatpush.bf16.msrb.mxu1 %v6375_v59  ;;  %v2297_v9 = vadd.f32 %v2296_v16, %v5830_v51 }
 0x51f   : > { %v2735_v61 = vpack.c.bf16 %v2297_v9, %v2295_v34 }
 0x521   : > { %v2310_v30 = vpop.f32.mrf.mxu1  ;;  %2952 = vmatpush.bf16.msrb.mxu1 %v5647_v38 }
 0x524   : > { %2782 = vmatmul.bf16.vlgmr.msrb.gmra.mxu2 %v2732_v45  ;;  %v2604_v9 = vpop.f32.mrf.mxu0 }
 0x525   : > { %2953 = vmatpush.bf16.msrb.mxu1 %v5661_v20  ;;  %3036 = vmatpush.bf16.msrb.mxu2 %v6368_v43  ;;  %v2311_v43 = vadd.f32 %v2310_v30, %v5582_v35 }
 0x529   : > { %v2313_v55 = vpop.f32.mrf.mxu1  ;;  %2954 = vmatpush.bf16.msrb.mxu1 %v5685_v12  ;;  %3037 = vmatpush.bf16.msrb.mxu2 %v6369_v24  ;;  %v2309_v24 = vadd.f32 %v2308_v57, %v5579_v48 }
 0x52a   : > { %v2314_v57 = vadd.f32 %v2313_v55, %v5609_v41 }
 0x52b   : > { %v2880_v60 = vpack.c.bf16 %v2311_v43, %v2309_v24 }
 0x52c   : > { %2768 = vmatmul.bf16.gmra.mxu1 %v2734_v15 }
 0x52d   : > { %2955 = vmatpush.bf16.msrb.mxu1 %v5700_v63  ;;  %3038 = vmatpush.bf16.msrb.mxu2 %v6370_v29 }
 0x531   : > { %v2315_v36 = vpop.f32.mrf.mxu1  ;;  %2956 = vmatpush.bf16.msrb.mxu1 %v5711_v33  ;;  %3039 = vmatpush.bf16.msrb.mxu2 %v6371_v19 }
 0x534   : > { %2787 = vmatmul.bf16.gmra.mxu2 %v2735_v61 }
 0x535   : > { %2957 = vmatpush.bf16.msrb.mxu1 %v5719_v52  ;;  %3040 = vmatpush.bf16.msrb.mxu2 %v6372_v18  ;;  %v2316_v18 = vadd.f32 %v2315_v36, %v5615_v25 }
 0x537   : > { %v2883_v30 = vpack.c.bf16 %v2316_v18, %v2314_v57 }
 0x539   : > { %v2318_v29 = vpop.f32.mrf.mxu1  ;;  %2958 = vmatpush.bf16.msrb.mxu1 %v5727_v10  ;;  %3041 = vmatpush.bf16.msrb.mxu2 %v6373_v22 }
 0x53a   : > { %v2319_v47 = vadd.f32 %v2318_v29, %v5622_v27 }
 0x53c   : > { %2894 = vmatmul.bf16.vlgmr.msra.gmra.mxu1 %v2880_v60 }
 0x53d   : > { %3042 = vmatpush.bf16.msrb.mxu2 %v6374_v32 }
 0x541   : > { %v2320_v19 = vpop.f32.mrf.mxu1  ;;  %3043 = vmatpush.bf16.msrb.mxu2 %v5532_v40 }
 0x542   : > { %v2321_v28 = vadd.f32 %v2320_v19, %v5600_v1 }
 0x544   : > { %v2881_v8 = vpack.c.bf16 %v2321_v28, %v2319_v47 }
 0x546   : > { %2913 = vmatmul.bf16.vlgmr.msra.gmra.mxu2 %v2881_v8 }
 0x547   : > { %3101 = vmatpush.bf16.msra.mxu2 %v6375_v59  ;;  %v2347_v53 = vpop.f32.mrf.mxu2 }
 0x548   : > { %v2348_v15 = vadd.f32 %v2347_v53, %v5579_v48 }
 0x549   : > { %v2323_v22 = vpop.f32.mrf.mxu1 }
 0x54a   : > { %v2324_v40 = vadd.f32 %v2323_v22, %v5664_v42 }
 0x54b   : > { %3102 = vmatpush.bf16.msra.mxu2 %v5647_v38 }
 0x54c   : > { %2899 = vmatmul.bf16.gmra.mxu1 %v2883_v30 }
 0x54f   : > { %3103 = vmatpush.bf16.msra.mxu2 %v5661_v20  ;;  %v2349_v32 = vpop.f32.mrf.mxu2 }
 0x550   : > { %v2350_v38 = vadd.f32 %v2349_v32, %v5582_v35 }
 0x551   : > { %v2325_v44 = vpop.f32.mrf.mxu1 }
 0x552   : > { %v2326_v45 = vadd.f32 %v2325_v44, %v5666_v56 }
 0x553   : > { %3104 = vmatpush.bf16.msra.mxu2 %v5685_v12  ;;  %v3030_v12 = vpack.c.bf16 %v2350_v38, %v2348_v15 }
 0x554   : > { %v2884_v39 = vpack.c.bf16 %v2326_v45, %v2324_v40 }
 0x556   : > { %2918 = vmatmul.bf16.gmra.mxu2 %v2884_v39 }
 0x557   : > { %3105 = vmatpush.bf16.msra.mxu2 %v5700_v63  ;;  %v2352_v59 = vpop.f32.mrf.mxu2 }
 0x558   : > { %v2353_v36 = vadd.f32 %v2352_v59, %v5609_v41 }
 0x559   : > { %v5883_v2 = vpop.f32.mrf.mxu1 }
 0x55b   : > { %3106 = vmatpush.bf16.msra.mxu2 %v5711_v33 }
 0x55f   : > { %3107 = vmatpush.bf16.msra.mxu2 %v5719_v52  ;;  %v2354_v20 = vpop.f32.mrf.mxu2  ;;  %v2585_v52 = vpop.f32.mrf.mxu3 }
 0x560   : > { %v2355_v33 = vadd.f32 %v2354_v20, %v5615_v25  ;;  %v2605_v29 = vadd.f32 %v2604_v9, %v2585_v52 }
 0x561   : > { %v5888_v55 = vpop.f32.mrf.mxu1 }
 0x562   : > { %v3033_v61 = vpack.c.bf16 %v2355_v33, %v2353_v36 }
 0x563   : > { %3108 = vmatpush.bf16.msra.mxu2 %v5727_v10  ;;  %v2606_v10 = vpop.f32.mrf.mxu0 }
 0x566   : > { %3044 = vmatmul.bf16.vlgmr.msrb.gmra.mxu2 %v3030_v12 }
 0x567   : > { %v5892_v16 = vpop.f32.mrf.mxu2  ;;  %v2587_v24 = vpop.f32.mrf.mxu3 }
 0x568   : > { %v2607_v60 = vadd.f32 %v2606_v10, %v2587_v24 }
 0x569   : > { %v5894_v63 = vpop.f32.mrf.mxu1 }
 0x56b   : > { %v2609_v8 = vpop.f32.mrf.mxu0 }
 0x56f   : > { %v5897_v34 = vpop.f32.mrf.mxu2  ;;  %v2590_v18 = vpop.f32.mrf.mxu3 }
 0x570   : > { %v2610_v32 = vadd.f32 %v2609_v8, %v2590_v18 }
 0x571   : > { %v5899_v35 = vpop.f32.mrf.mxu1 }
 0x573   : > { %v2611_v22 = vpop.f32.mrf.mxu0 }
 0x576   : > { %3049 = vmatmul.bf16.gmra.mxu2 %v3033_v61 }
 0x577   : > { %v5902_v48 = vpop.f32.mrf.mxu2  ;;  %v2592_v30 = vpop.f32.mrf.mxu3 }
 0x578   : > { %v2612_v44 = vadd.f32 %v2611_v22, %v2592_v30 }
 0x579   : > { %v2623_v43 = vpop.f32.mrf.mxu1 }
 0x57a   : > { %v5906_v25 = vadd.f32 %v2623_v43, %v2605_v29 }
 0x57b   : > { %v2745_v38 = vpop.f32.mrf.mxu0 }
 0x57c   : > { %v2643_v9 = vmul.f32 %v5906_v25, %v5906_v25 }
 0x57f   : > { %v5904_v19 = vpop.f32.mrf.mxu2 }
 0x581   : > { %v2625_v47 = vpop.f32.mrf.mxu1 }
 0x582   : > { %v5908_v28 = vadd.f32 %v2625_v47, %v2607_v60 }
 0x584   : > { %v2647_v41 = vpack.c.bf16 %v5908_v28, %v5906_v25  ;;  %v2644_v20 = vmul.f32 %v5908_v28, %v5908_v28 }
 0x586   : > { %2659 = vmatmul.bf16.vlgmr.msra.gmra.mxu3 %v2647_v41 }
 0x587   : > { %3055 = vmatpush.bf16.msra.mxu3 %v5539_v31  ;;  %v5913_v57 = vpop.f32.mrf.mxu2 }
 0x589   : > { %v2628_v53 = vpop.f32.mrf.mxu1 }
 0x58a   : > { %v5919_v39 = vadd.f32 %v2628_v53, %v2610_v32 }
 0x58b   : > { %3056 = vmatpush.bf16.msra.mxu3 %v5546_v7 }
 0x58c   : > { %v2645_v60 = vmul.f32 %v5919_v39, %v5919_v39 }
 0x58f   : > { %3057 = vmatpush.bf16.msra.mxu3 %v5553_v6  ;;  %v5917_v40 = vpop.f32.mrf.mxu2 }
 0x591   : > { %v2630_v45 = vpop.f32.mrf.mxu1 }
 0x592   : > { %v5921_v59 = vadd.f32 %v2630_v45, %v2612_v44  ;;  %v2331_v44 = vadd.f32 %v5888_v55, %v5628_v23  ;;  %v2336_v55 = vadd.f32 %v5899_v35, %v5830_v51 }
 0x593   : > { %3058 = vmatpush.bf16.msra.mxu3 %v5562_v49 }
 0x594   : > { %v2648_v31 = vpack.c.bf16 %v5921_v59, %v5919_v39  ;;  %v2646_v10 = vmul.f32 %v5921_v59, %v5921_v59 }
 0x596   : > { %2664 = vmatmul.bf16.gmra.mxu3 %v2648_v31  ;;  %v2650_v41 = vpack.c.bf16 %v2646_v10, %v2645_v60 }
 0x597   : > { %3059 = vmatpush.bf16.msra.mxu3 %v5569_v11  ;;  %v2372_v7 = vpop.f32.mrf.mxu2  ;;  %v2649_v11 = vpack.c.bf16 %v2644_v20, %v2643_v9 }
 0x598   : > { %v2373_v12 = vadd.f32 %v2372_v7, %v5836_v26 }
 0x599   : > { %v2764_v6 = vpop.f32.mrf.mxu1 }
 0x59a   : > { %v2765_v36 = vadd.f32 %v2764_v6, %v2745_v38  ;;  %v2329_v6 = vadd.f32 %v5883_v2, %v5602_v3 }
 0x59b   : > { %3060 = vmatpush.bf16.msra.mxu3 %v6365_v5 }
 0x59c   : > { %v2882_v20 = vpack.c.bf16 %v2331_v44, %v2329_v6 }
 0x59f   : > { %3061 = vmatpush.bf16.msra.mxu3 %v6366_v17  ;;  %v2374_v15 = vpop.f32.mrf.mxu2  ;;  %v2747_v17 = vpop.f32.mrf.mxu0 }
 0x5a0   : > { %v2375_v49 = vadd.f32 %v2374_v15, %v5830_v51  ;;  %v2358_v51 = vadd.f32 %v5892_v16, %v5622_v27 }
 0x5a1   : > { %v2766_v5 = vpop.f32.mrf.mxu1 }
 0x5a2   : > { %v3035_v33 = vpack.c.bf16 %v2375_v49, %v2373_v12  ;;  %v2767_v61 = vadd.f32 %v2766_v5, %v2747_v17  ;;  %v2334_v49 = vadd.f32 %v5894_v63, %v5836_v26  ;;  %v2360_v5 = vadd.f32 %v5897_v34, %v5600_v1 }
 0x5a3   : > { %3062 = vmatpush.bf16.msra.mxu3 %v6367_v62  ;;  %v2370_v26 = vadd.f32 %v5917_v40, %v5628_v23  ;;  %v2365_v63 = vadd.f32 %v5904_v19, %v5666_v56  ;;  %v2363_v1 = vadd.f32 %v5902_v48, %v5664_v42 }
 0x5a4   : > { %v2885_v2 = vpack.c.bf16 %v2336_v55, %v2334_v49  ;;  %v3031_v17 = vpack.c.bf16 %v2360_v5, %v2358_v51 }
 0x5a6   : > { %2669 = vmatmul.bf16.gmra.mxu3 %v2649_v11 }
 0x5a7   : > { %v2783_v52 = vpop.f32.mrf.mxu2  ;;  %v2750_v8 = vpop.f32.mrf.mxu0 }
 0x5a8   : > { %v5938_v24 = vadd.f32 %v2783_v52, %v2765_v36  ;;  %v2368_v36 = vadd.f32 %v5913_v57, %v5602_v3 }
 0x5a9   : > { %v2769_v47 = vpop.f32.mrf.mxu1 }
 0x5aa   : > { %v2770_v30 = vadd.f32 %v2769_v47, %v2750_v8  ;;  %v2793_v12 = vmul.f32 %v5938_v24, %v5938_v24  ;;  %v3032_v34 = vpack.c.bf16 %v2370_v26, %v2368_v36 }
 0x5af   : > { %v2785_v43 = vpop.f32.mrf.mxu2  ;;  %v2752_v22 = vpop.f32.mrf.mxu0 }
 0x5b0   : > { %v5940_v29 = vadd.f32 %v2785_v43, %v2767_v61  ;;  %v3034_v61 = vpack.c.bf16 %v2365_v63, %v2363_v1 }
 0x5b1   : > { %v2771_v53 = vpop.f32.mrf.mxu1 }
 0x5b2   : > { %v2797_v62 = vpack.c.bf16 %v5940_v29, %v5938_v24  ;;  %v2772_v32 = vadd.f32 %v2771_v53, %v2752_v22  ;;  %v2794_v15 = vmul.f32 %v5940_v29, %v5940_v29 }
 0x5b4   : > { %2809 = vmatmul.bf16.vlgmr.msra.gmra.mxu0 %v2797_v62  ;;  %v2799_v9 = vpack.c.bf16 %v2794_v15, %v2793_v12 }
 0x5b6   : > { %2674 = vmatmul.bf16.gmra.mxu3 %v2650_v41 }
 0x5b7   : > { %v2788_v18 = vpop.f32.mrf.mxu2 }
 0x5b8   : > { %v5948_v31 = vadd.f32 %v2788_v18, %v2770_v30 }
 0x5ba   : > { %v2795_v52 = vmul.f32 %v5948_v31, %v5948_v31 }
 0x5bf   : > { %v2790_v45 = vpop.f32.mrf.mxu2 }
 0x5c0   : > { %v5950_v7 = vadd.f32 %v2790_v45, %v2772_v32 }
 0x5c2   : > { %v2798_v38 = vpack.c.bf16 %v5950_v7, %v5948_v31  ;;  %v2796_v11 = vmul.f32 %v5950_v7, %v5950_v7 }
 0x5c4   : > { %2814 = vmatmul.bf16.gmra.mxu0 %v2798_v38  ;;  %v2800_v35 = vpack.c.bf16 %v2796_v11, %v2795_v52 }
 0x5c6   : > { %2932 = vmatmul.bf16.vlgmr.msrb.gmra.mxu3 %v2882_v20 }
 0x5c9   : > { %v2914_v41 = vpop.f32.mrf.mxu2 }
 0x5d1   : > { %v2916_v15 = vpop.f32.mrf.mxu2 }
 0x5d4   : > { %2819 = vmatmul.bf16.gmra.mxu0 %v2799_v9 }
 0x5d6   : > { %2937 = vmatmul.bf16.gmra.mxu3 %v2885_v2 }
 0x5e4   : > { %2824 = vmatmul.bf16.gmra.mxu0 %v2800_v35 }
 0x5e6   : > { %3063 = vmatmul.bf16.vlgmr.msra.gmra.mxu3 %v3031_v17 }
 0x5f4   : > { %3082 = vmatmul.bf16.vlgmr.msrb.gmra.mxu0 %v3032_v34 }
 0x5f6   : > { %3068 = vmatmul.bf16.gmra.mxu3 %v3034_v61  ;;  %v2919_v61 = vpop.f32.mrf.mxu2 }
 0x604   : > { %3087 = vmatmul.bf16.gmra.mxu0 %v3035_v33  ;;  %v2895_v33 = vpop.f32.mrf.mxu1 }
 0x605   : > { %v2915_v52 = vadd.f32 %v2914_v41, %v2895_v33 }
 0x609   : > { %v2660_v27 = vpop.f32.mrf.mxu3 }
 0x60c   : > { %v2897_v9 = vpop.f32.mrf.mxu1 }
 0x60d   : > { %v2917_v51 = vadd.f32 %v2916_v15, %v2897_v9 }
 0x611   : > { %v2662_v16 = vpop.f32.mrf.mxu3 }
 0x612   : > { %v2680_v23 = vadd.f32 %v2662_v16, %v2660_v27 }
 0x619   : > { %v2665_v10 = vpop.f32.mrf.mxu3 }
 0x61a   : > { %v2681_v40 = vadd.f32 %v2680_v23, %v2665_v10  ;;  %v2900_v10 = vpop.f32.mrf.mxu1 }
 0x61b   : > { %v2920_v41 = vadd.f32 %v2919_v61, %v2900_v10 }
 0x621   : > { %v2667_v43 = vpop.f32.mrf.mxu3 }
 0x622   : > { %v2682_v47 = vadd.f32 %v2681_v40, %v2667_v43 }
 0x624   : > { %v2683_v62 = vrot.slane %v2682_v47, 4 }
 0x626   : > { %v2684_v3 = vadd.f32 %v2683_v62, %v2682_v47  ;;  %v2921_v62 = vpop.f32.mrf.mxu2 }
 0x628   : > { %v2685_v42 = vrot.slane %v2684_v3, 2 }
 0x629   : > { %v2670_v60 = vpop.f32.mrf.mxu3 }
 0x62a   : > { %v2686_v18 = vadd.f32 %v2685_v42, %v2684_v3  ;;  %v2902_v42 = vpop.f32.mrf.mxu1 }
 0x62c   : > { %v2687_v44 = vrot.slane %v2686_v18, 1 }
 0x62e   : > { %v2688_v38 = vadd.f32 %v2687_v44, %v2686_v18  ;;  %v2922_v18 = vadd.f32 %v2921_v62, %v2902_v42 }
 0x630   : > { %v5981_v2 = vmul.f32 %v2688_v38, %v5259_v0 }
 0x631   : > { %v2672_v56 = vpop.f32.mrf.mxu3  ;;  %v2810_v19 = vpop.f32.mrf.mxu0 }
 0x632   : > { %v2690_v48 = vadd.f32 %v2672_v56, %v2670_v60  ;;  %v2700_v17 = vmul.f32 %v5981_v2, %v5981_v2  ;;  %v2705_v15 = vsub.f32 %v5919_v39, %v5981_v2  ;;  %v6017_v39 = vld [vmem:[%s6285_s8 + $0x20] sm:$0xff] }
 0x639   : > { %v2675_v57 = vpop.f32.mrf.mxu3  ;;  %v2812_v8 = vpop.f32.mrf.mxu0 }
 0x63a   : > { %v2691_v53 = vadd.f32 %v2690_v48, %v2675_v57  ;;  %v2830_v43 = vadd.f32 %v2812_v8, %v2810_v19 }
 0x641   : > { %v2677_v22 = vpop.f32.mrf.mxu3  ;;  %v2815_v32 = vpop.f32.mrf.mxu0 }
 0x642   : > { %v2692_v30 = vadd.f32 %v2691_v53, %v2677_v22  ;;  %v2831_v23 = vadd.f32 %v2830_v43, %v2815_v32 }
 0x644   : > { %v2693_v45 = vrot.slane %v2692_v30, 4 }
 0x646   : > { %v2694_v6 = vadd.f32 %v2693_v45, %v2692_v30 }
 0x648   : > { %v2695_v20 = vrot.slane %v2694_v6, 2 }
 0x649   : > { %v2933_v55 = vpop.f32.mrf.mxu3  ;;  %v2817_v49 = vpop.f32.mrf.mxu0 }
 0x64a   : > { %v2696_v12 = vadd.f32 %v2695_v20, %v2694_v6  ;;  %v5986_v36 = vadd.f32 %v2933_v55, %v2915_v52  ;;  %v2832_v40 = vadd.f32 %v2831_v23, %v2817_v49  ;;  %v2706_v55 = vsub.f32 %v5921_v59, %v5981_v2  ;;  %v6007_v52 = vld [vmem:[%s6285_s8 + $0x30] sm:$0xff]  ;;  %v3045_v59 = vpop.f32.mrf.mxu2 }
 0x64c   : > { %v2697_v11 = vrot.slane %v2696_v12, 1  ;;  %v2833_v3 = vrot.slane %v2832_v40, 4 }
 0x64e   : > { %v2698_v5 = vadd.f32 %v2697_v11, %v2696_v12  ;;  %v2834_v33 = vadd.f32 %v2833_v3, %v2832_v40  ;;  %v2703_v12 = vsub.f32 %v5906_v25, %v5981_v2  ;;  %v2704_v25 = vsub.f32 %v5908_v28, %v5981_v2  ;;  %v6034_v28 = vld [vmem:[%s6286_s9 + $0x38] sm:$0xff]  ;;  %v6039_v2 = vld [vmem:[%s6286_s9 + $0x20] sm:$0xff] }
 0x650   : > { %v2699_v35 = vmul.f32 %v2698_v5, %v5259_v0  ;;  %v2835_v6 = vrot.slane %v2834_v33, 2 }
 0x651   : > { %v2935_v26 = vpop.f32.mrf.mxu3  ;;  %v2820_v1 = vpop.f32.mrf.mxu0 }
 0x652   : > { %v2701_v63 = vsub.f32 %v2699_v35, %v2700_v17  ;;  %v5988_v34 = vadd.f32 %v2935_v26, %v2917_v51  ;;  %v2836_v9 = vadd.f32 %v2835_v6, %v2834_v33  ;;  %v6012_v51 = vld [vmem:[%s6285_s8 + $0x38] sm:$0xff] }
 0x654   : > { %v2702_v27 = vmax.f32 %v2701_v63, 0.0  ;;  %v2947_v16 = vpack.c.bf16 %v5988_v34, %v5986_v36  ;;  %v6024_v63 = vld [vmem:[%s6285_s8 + $0x28] sm:$0xff]  ;;  %v2837_v40 = vrot.slane %v2836_v9, 1 }
 0x656   : > { %v2707_v60 = vadd.f32 1e-05, %v2702_v27  ;;  %2959 = vmatmul.bf16.vlgmr.msrb.gmra.mxu1 %v2947_v16  ;;  %v6029_v27 = vld [vmem:[%s6286_s9 + $0x30] sm:$0xff] }
 0x658   : > { %4390 = vrsqrt.f32 %v2707_v60  ;;  %vm2714_vm15 = vweird.f32 %v2707_v60 }
 0x659   : > { %v2938_v47 = vpop.f32.mrf.mxu3  ;;  %v2822_v56 = vpop.f32.mrf.mxu0 }
 0x65a   : > { %v5992_v30 = vadd.f32 %v2938_v47, %v2920_v41  ;;  %v2840_v20 = vadd.f32 %v2822_v56, %v2820_v1  ;;  %v2944_v41 = vmul.f32 %v5988_v34, %v5988_v34 }
 0x65e   : > { %v4391_v57 = vpop.eup %4390 }
 0x65f   : > { %v2709_v48 = vmul.f32 %v4391_v57, %v2707_v60  ;;  %vm2715_vm14 = vweird.f32 %v4391_v57  ;;  %v6046_v60 = vld [vmem:[%s6286_s9 + $0x28] sm:$0xff] }
 0x660   : > { %vm2716_vm1 = vmor %vm2714_vm15, %vm2715_vm14 }
 0x661   : > { %v2710_v53 = vmul.f32 %v4391_v57, %v2709_v48  ;;  %v2940_v22 = vpop.f32.mrf.mxu3  ;;  %v2825_v19 = vpop.f32.mrf.mxu0 }
 0x662   : > { %v5994_v8 = vadd.f32 %v2940_v22, %v2922_v18  ;;  %v2841_v11 = vadd.f32 %v2840_v20, %v2825_v19  ;;  %v2838_v22 = vadd.f32 %v2837_v40, %v2836_v9 }
 0x663   : > { %v2711_v32 = vmul.f32 0.5, %v2710_v53 }
 0x664   : > { %v2948_v44 = vpack.c.bf16 %v5994_v8, %v5992_v30 }
 0x665   : > { %v2712_v45 = vsub.f32 1.5, %v2711_v32 }
 0x666   : > { %2964 = vmatmul.bf16.gmra.mxu1 %v2948_v44  ;;  %v2943_v44 = vmul.f32 %v5986_v36, %v5986_v36 }
 0x667   : > { %v2713_v38 = vmul.f32 %v4391_v57, %v2712_v45 }
 0x669   : > { %v2717_v49 = vsel %vm2716_vm1, %v4391_v57, %v2713_v38  ;;  %v3064_v5 = vpop.f32.mrf.mxu3  ;;  %v2827_v35 = vpop.f32.mrf.mxu0  ;;  %v6376_v38 = vld [vmem:[#allocation4_spill] sm:$0xff] }
 0x66a   : > { %v2720_v17 = vmul.f32 %v2717_v49, %v2705_v15  ;;  %v2721_v26 = vmul.f32 %v2717_v49, %v2706_v55  ;;  %v2718_v1 = vmul.f32 %v2717_v49, %v2703_v12  ;;  %v2842_v61 = vadd.f32 %v2841_v11, %v2827_v35  ;;  %v6378_v55 = vld [vmem:[#allocation5_spill] sm:$0xff]  ;;  %v6380_v11 = vld [vmem:[#allocation6_spill] sm:$0xff] }
 0x66b   : > { %v2719_v16 = vmul.f32 %v2717_v49, %v2704_v25  ;;  %v6377_v20 = vmax.f32 %v6376_v38, 0.0  ;;  %v6379_v12 = vmax.f32 %v6378_v55, 0.0  ;;  %v6381_v25 = vmax.f32 %v6380_v11, 0.0 }
 0x66c   : > { %v2724_v10 = vmul.f32 %v6007_v52, %v2720_v17  ;;  %v2725_v43 = vmul.f32 %v6012_v51, %v2721_v26  ;;  %v2722_v23 = vmul.f32 %v6017_v39, %v2718_v1  ;;  %v2843_v47 = vrot.slane %v2842_v61, 4  ;;  %v6382_v26 = vld [vmem:[#allocation7_spill] sm:$0xff] }
 0x66d   : > { %v2723_v56 = vmul.f32 %v6024_v63, %v2719_v16  ;;  %v6383_v1 = vmax.f32 %v6382_v26, 0.0  ;;  %v2949_v16 = vpack.c.bf16 %v2944_v41, %v2943_v44 }
 0x66e   : > { %v2728_v62 = vadd.f32 %v6029_v27, %v2724_v10  ;;  %v2729_v3 = vadd.f32 %v6034_v28, %v2725_v43  ;;  %v2726_v57 = vadd.f32 %v6039_v2, %v2722_v23  ;;  %v2844_v42 = vadd.f32 %v2843_v47, %v2842_v61  ;;  %v3047_v61 = vpop.f32.mrf.mxu2 }
 0x66f   : > { %v2727_v48 = vadd.f32 %v6046_v60, %v2723_v56  ;;  %v2839_v23 = vmul.f32 %v2838_v22, %v5259_v0 }
 0x670   : > { %v3188_v18 = vmax.f32 %v2728_v62, 0.0  ;;  %v3192_v53 = vmax.f32 %v2729_v3, 0.0  ;;  %v3180_v33 = vmax.f32 %v2726_v57, 0.0  ;;  %v2845_v19 = vrot.slane %v2844_v42, 2  ;;  %v4115_v57 = vld [vmem:[%s6289_s12] sm:$0xf] }
 0x671   : > { %v3184_v32 = vmax.f32 %v2727_v48, 0.0  ;;  %v3066_v45 = vpop.f32.mrf.mxu3  ;;  %v3083_v6 = vpop.f32.mrf.mxu0  ;;  %v2850_v41 = vmul.f32 %v2839_v23, %v2839_v23 }
 0x672   : > { %v3204_v15 = vadd.f32 %v3188_v18, %v6377_v20  ;;  %v3208_v49 = vadd.f32 %v3192_v53, %v6379_v12  ;;  %v3196_v35 = vadd.f32 %v3180_v33, %v6381_v25  ;;  %v2846_v17 = vadd.f32 %v2845_v19, %v2844_v42  ;;  %v4323_v42 = vld [vmem:[%s6289_s12] sm:$0x10] }
 0x673   : > { %v3200_v9 = vadd.f32 %v3184_v32, %v6383_v1  ;;  %v3065_v18 = vadd.f32 %v3064_v5, %v3045_v59  ;;  %v3067_v53 = vadd.f32 %v3066_v45, %v3047_v61  ;;  %v6078_v38 = vor.u32 %v4323_v42, %v4115_v57 }
 0x674   : > { %v3220_v10 = vmax.f32 %v3204_v15, 0.0  ;;  %v3224_v43 = vmax.f32 %v3208_v49, 0.0  ;;  %v2847_v40 = vrot.slane %v2846_v17, 1  ;;  %v3212_v56 = vmax.f32 %v3196_v35, 0.0 }
 0x675   : > { %v3216_v62 = vmax.f32 %v3200_v9, 0.0  ;;  %v6074_v32 = vadd.f32 %v3083_v6, %v3065_v18  ;;  %v2946_v5 = vmul.f32 %v5994_v8, %v5994_v8  ;;  %v2945_v59 = vmul.f32 %v5992_v30, %v5992_v30 }
 0x676   : > { %2969 = vmatmul.bf16.gmra.mxu1 %v2949_v16  ;;  %v3234_v47 = vpack.c.bf16 %v3224_v43, %v3220_v10  ;;  %v2848_v3 = vadd.f32 %v2847_v40, %v2846_v17  ;;  %v3050_v12 = vpop.f32.mrf.mxu2  ;;  %v2853_v57 = vsub.f32 %v5938_v24, %v2839_v23  ;;  %v2854_v42 = vsub.f32 %v5940_v29, %v2839_v23 }
 0x677   : > { %v3230_v22 = vpack.c.bf16 %v3216_v62, %v3212_v56  ;;  %v2950_v6 = vpack.c.bf16 %v2946_v5, %v2945_v59  ;;  %v2855_v62 = vsub.f32 %v5948_v31, %v2839_v23  ;;  %v3093_v59 = vmul.f32 %v6074_v32, %v6074_v32 }
 0x678   : > { %3252 = vmatpush.bf16.msrb.mxu3 %v3234_v47  ;;  %v2849_v48 = vmul.f32 %v2848_v3, %v5259_v0  ;;  %v2856_v3 = vsub.f32 %v5950_v7, %v2839_v23 }
 0x679   : > { %v3085_v33 = vpop.f32.mrf.mxu0  ;;  %v3069_v20 = vpop.f32.mrf.mxu3 }
 0x67a   : > { %v2851_v19 = vsub.f32 %v2849_v48, %v2850_v41  ;;  %v6076_v44 = vadd.f32 %v3085_v33, %v3067_v53  ;;  %v3070_v26 = vadd.f32 %v3069_v20, %v3050_v12 }
 0x67c   : > { %3253 = vmatpush.bf16.msrb.mxu3 %v3230_v22  ;;  %v2852_v15 = vmax.f32 %v2851_v19, 0.0  ;;  %v3097_v55 = vpack.c.bf16 %v6076_v44, %v6074_v32  ;;  %v3094_v23 = vmul.f32 %v6076_v44, %v6076_v44 }
 0x67e   : > { %v2857_v49 = vadd.f32 1e-05, %v2852_v15  ;;  %3109 = vmatmul.bf16.vlgmr.msra.gmra.mxu2 %v3097_v55  ;;  %v3052_v35 = vpop.f32.mrf.mxu2 }
 0x67f   : > { %4117 = vmatmul.msk.bf16.vlgmr.msrb.gmra.mxu3 %vm1049_vm0, %v6078_v38 }
 0x680   : > { %4392 = vrsqrt.f32 %v2857_v49  ;;  %vm2864_vm3 = vweird.f32 %v2857_v49 }
 0x681   : > { %v3088_v45 = vpop.f32.mrf.mxu0  ;;  %v3071_v11 = vpop.f32.mrf.mxu3 }
 0x682   : > { %v3072_v1 = vadd.f32 %v3071_v11, %v3052_v35  ;;  %v6088_v16 = vadd.f32 %v3088_v45, %v3070_v26  ;;  %v6384_v45 = vld [vmem:[#allocation8_spill] sm:$0xff]  ;;  %v6388_v26 = vld [vmem:[#allocation10_spill] sm:$0xff] }
 0x686   : > { %2974 = vmatmul.bf16.gmra.mxu1 %v2950_v6  ;;  %v4393_v25 = vpop.eup %4392  ;;  %v6385_v6 = vmax.f32 %v6384_v45, 0.0 }
 0x687   : > { %v2859_v17 = vmul.f32 %v4393_v25, %v2857_v49  ;;  %vm2865_vm2 = vweird.f32 %v4393_v25 }
 0x688   : > { %vm2866_vm4 = vmor %vm2864_vm3, %vm2865_vm2 }
 0x689   : > { %v2860_v9 = vmul.f32 %v4393_v25, %v2859_v17  ;;  %v3090_v61 = vpop.f32.mrf.mxu0 }
 0x68a   : > { %v6090_v10 = vadd.f32 %v3090_v61, %v3072_v1  ;;  %v6389_v1 = vmax.f32 %v6388_v26, 0.0  ;;  %v6390_v61 = vld [vmem:[#allocation11_spill] sm:$0xff] }
 0x68b   : > { %v2861_v43 = vmul.f32 0.5, %v2860_v9 }
 0x68c   : > { %v3098_v40 = vpack.c.bf16 %v6090_v10, %v6088_v16 }
 0x68d   : > { %v2862_v47 = vsub.f32 1.5, %v2861_v43  ;;  %v6391_v43 = vmax.f32 %v6390_v61, 0.0 }
 0x68e   : > { %3114 = vmatmul.bf16.gmra.mxu2 %v3098_v40 }
 0x68f   : > { %v2863_v56 = vmul.f32 %v4393_v25, %v2862_v47  ;;  %v3099_v47 = vpack.c.bf16 %v3094_v23, %v3093_v59  ;;  %v4325_v23 = vld [vmem:[%s6288_s11 + $0x8] sm:$0xff] }
 0x691   : > { %v2867_v48 = vsel %vm2866_vm4, %v4393_v25, %v2863_v56  ;;  %v6386_v25 = vld [vmem:[#allocation9_spill] sm:$0xff] }
 0x692   : > { %v2870_v41 = vmul.f32 %v2867_v48, %v2855_v62  ;;  %v2871_v18 = vmul.f32 %v2867_v48, %v2856_v3  ;;  %v2868_v53 = vmul.f32 %v2867_v48, %v2853_v57  ;;  %v2869_v33 = vmul.f32 %v2867_v48, %v2854_v42 }
 0x693   : > { %v6387_v35 = vmax.f32 %v6386_v25, 0.0 }
 0x694   : > { %v2874_v22 = vmul.f32 %v6007_v52, %v2870_v41  ;;  %v2875_v19 = vmul.f32 %v6012_v51, %v2871_v18  ;;  %v2872_v20 = vmul.f32 %v6017_v39, %v2868_v53  ;;  %v2873_v15 = vmul.f32 %v6024_v63, %v2869_v33  ;;  %v4331_v33 = vld [vmem:[%s6288_s11 + $0x38] sm:$0xff] }
 0x695   : > { %v3096_v41 = vmul.f32 %v6090_v10, %v6090_v10  ;;  %v3095_v18 = vmul.f32 %v6088_v16, %v6088_v16 }
 0x696   : > { %v2878_v31 = vadd.f32 %v6029_v27, %v2874_v22  ;;  %v2879_v7 = vadd.f32 %v6034_v28, %v2875_v19  ;;  %v2876_v24 = vadd.f32 %v6039_v2, %v2872_v20  ;;  %v2877_v29 = vadd.f32 %v6046_v60, %v2873_v15  ;;  %v4330_v22 = vld [vmem:[%s6288_s11 + $0x30] sm:$0xff]  ;;  %v4329_v20 = vld [vmem:[%s6288_s11 + $0x28] sm:$0xff]  ;;  %v4328_v15 = vld [vmem:[%s6288_s11 + $0x20] sm:$0xff] }
 0x697   : > { %v3100_v53 = vpack.c.bf16 %v3096_v41, %v3095_v18 }
 0x698   : > { %v3189_v55 = vmax.f32 %v2878_v31, 0.0  ;;  %v3193_v12 = vmax.f32 %v2879_v7, 0.0  ;;  %v3181_v49 = vmax.f32 %v2876_v24, 0.0  ;;  %v3185_v5 = vmax.f32 %v2877_v29, 0.0  ;;  %v4327_v7 = vld [vmem:[%s6288_s11 + $0x18] sm:$0xff]  ;;  %v4326_v24 = vld [vmem:[%s6288_s11 + $0x10] sm:$0xff] }
 0x69a   : > { %v3205_v11 = vadd.f32 %v3189_v55, %v6385_v6  ;;  %v3209_v17 = vadd.f32 %v3193_v12, %v6387_v35  ;;  %v3197_v9 = vadd.f32 %v3181_v49, %v6389_v1  ;;  %v3201_v40 = vadd.f32 %v3185_v5, %v6391_v43  ;;  %v4324_v55 = vld [vmem:[%s6288_s11] sm:$0xff] }
 0x69c   : > { %v3221_v56 = vmax.f32 %v3205_v11, 0.0  ;;  %v3225_v62 = vmax.f32 %v3209_v17, 0.0  ;;  %v3213_v57 = vmax.f32 %v3197_v9, 0.0  ;;  %v3217_v42 = vmax.f32 %v3201_v40, 0.0 }
 0x69e   : > { %3119 = vmatmul.bf16.gmra.mxu2 %v3099_v47  ;;  %v3235_v3 = vpack.c.bf16 %v3225_v62, %v3221_v56  ;;  %v3231_v48 = vpack.c.bf16 %v3217_v42, %v3213_v57 }
 0x6a0   : > { %3266 = vmatpush.bf16.msra.mxu3 %v3235_v3 }
 0x6a4   : > { %3267 = vmatpush.bf16.msra.mxu3 %v3231_v48 }
 0x6a7   : > { %4118 = vmatmul.msk.bf16.vlgmr.msra.gmra.mxu3 %vm1049_vm0, %v6078_v38 }
 0x6a8   : > { %3574 = vmatpush.bf16.msrb.mxu3 %v4331_v33 }
 0x6ac   : > { %3575 = vmatpush.bf16.msrb.mxu3 %v4330_v22 }
 0x6ae   : > { %3124 = vmatmul.bf16.gmra.mxu2 %v3100_v53 }
 0x6b0   : > { %3576 = vmatpush.bf16.msrb.mxu3 %v4329_v20 }
 0x6b4   : > { %3577 = vmatpush.bf16.msrb.mxu3 %v4328_v15 }
 0x6b8   : > { %3578 = vmatpush.bf16.msrb.mxu3 %v4327_v7 }
 0x6bc   : > { %3579 = vmatpush.bf16.msrb.mxu3 %v4326_v24 }
 0x6c0   : > { %3580 = vmatpush.bf16.msrb.mxu3 %v4325_v23 }
 0x6c4   : > { %3581 = vmatpush.bf16.msrb.mxu3 %v4324_v55 }
 0x6d3   : > { %v2960_v19 = vpop.f32.mrf.mxu1 }
 0x6db   : > { %v2962_v31 = vpop.f32.mrf.mxu1 }
 0x6dc   : > { %v2980_v5 = vadd.f32 %v2962_v31, %v2960_v19 }
 0x6e3   : > { %v2965_v29 = vpop.f32.mrf.mxu1 }
 0x6e4   : > { %v2981_v59 = vadd.f32 %v2980_v5, %v2965_v29 }
 0x6eb   : > { %v2967_v12 = vpop.f32.mrf.mxu1 }
 0x6ec   : > { %v2982_v45 = vadd.f32 %v2981_v59, %v2967_v12 }
 0x6ee   : > { %v2983_v11 = vrot.slane %v2982_v45, 4 }
 0x6f0   : > { %v2984_v25 = vadd.f32 %v2983_v11, %v2982_v45 }
 0x6f2   : > { %v2985_v1 = vrot.slane %v2984_v25, 2 }
 0x6f3   : > { %v2970_v49 = vpop.f32.mrf.mxu1 }
 0x6f4   : > { %v2986_v61 = vadd.f32 %v2985_v1, %v2984_v25 }
 0x6f6   : > { %v2987_v57 = vrot.slane %v2986_v61, 1 }
 0x6f8   : > { %v2988_v41 = vadd.f32 %v2987_v57, %v2986_v61 }
 0x6fa   : > { %v2989_v22 = vmul.f32 %v2988_v41, %v5259_v0 }
 0x6fb   : > { %v2972_v6 = vpop.f32.mrf.mxu1 }
 0x6fc   : > { %v2990_v9 = vadd.f32 %v2972_v6, %v2970_v49  ;;  %v3000_v31 = vmul.f32 %v2989_v22, %v2989_v22 }
 0x701   : > { %v3110_v35 = vpop.f32.mrf.mxu2 }
 0x702   : > { %v3255_v17 = vpop.f32.mrf.mxu3 }
 0x703   : > { %v2975_v26 = vpop.f32.mrf.mxu1 }
 0x704   : > { %v2991_v43 = vadd.f32 %v2990_v9, %v2975_v26 }
 0x709   : > { %v3112_v40 = vpop.f32.mrf.mxu2 }
 0x70a   : > { %v3257_v47 = vpop.f32.mrf.mxu3  ;;  %v3130_v12 = vadd.f32 %v3112_v40, %v3110_v35  ;;  %v3003_v35 = vsub.f32 %v5986_v36, %v2989_v22  ;;  %v3004_v40 = vsub.f32 %v5988_v34, %v2989_v22 }
 0x70b   : > { %v3302_v56 = vpack.c.bf16 %v3257_v47, %v3255_v17  ;;  %v2977_v62 = vpop.f32.mrf.mxu1  ;;  %v3006_v47 = vsub.f32 %v5994_v8, %v2989_v22 }
 0x70c   : > { %v2992_v3 = vadd.f32 %v2991_v43, %v2977_v62  ;;  %v3005_v43 = vsub.f32 %v5992_v30, %v2989_v22 }
 0x70d   : > { %3582 = vmatmul.bf16.vlgmr.msrb.gmra.mxu3 %v3302_v56 }
 0x70e   : > { %v2993_v42 = vrot.slane %v2992_v3, 4 }
 0x710   : > { %v2994_v48 = vadd.f32 %v2993_v42, %v2992_v3 }
 0x711   : > { %v3115_v53 = vpop.f32.mrf.mxu2 }
 0x712   : > { %v2995_v18 = vrot.slane %v2994_v48, 2  ;;  %v3131_v49 = vadd.f32 %v3130_v12, %v3115_v53  ;;  %v6392_v12 = vmax.f32 %v5671_v14, 0.0 }
 0x714   : > { %v2996_v33 = vadd.f32 %v2995_v18, %v2994_v48 }
 0x716   : > { %v2997_v19 = vrot.slane %v2996_v33, 1 }
 0x718   : > { %v2998_v20 = vadd.f32 %v2997_v19, %v2996_v33 }
 0x719   : > { %v3117_v7 = vpop.f32.mrf.mxu2 }
 0x71a   : > { %v2999_v15 = vmul.f32 %v2998_v20, %v5259_v0  ;;  %v3132_v45 = vadd.f32 %v3131_v49, %v3117_v7 }
 0x71c   : > { %v3001_v24 = vsub.f32 %v2999_v15, %v3000_v31  ;;  %v3133_v17 = vrot.slane %v3132_v45, 4 }
 0x71e   : > { %v3002_v29 = vmax.f32 %v3001_v24, 0.0  ;;  %v3134_v9 = vadd.f32 %v3133_v17, %v3132_v45  ;;  %v6395_v45 = vld [vmem:[#allocation24_spill] sm:$0xff] }
 0x720   : > { %v3007_v23 = vadd.f32 1e-05, %v3002_v29  ;;  %v3135_v48 = vrot.slane %v3134_v9, 2 }
 0x721   : > { %v3120_v55 = vpop.f32.mrf.mxu2 }
 0x722   : > { %4394 = vrsqrt.f32 %v3007_v23  ;;  %vm3014_vm6 = vweird.f32 %v3007_v23  ;;  %v3136_v19 = vadd.f32 %v3135_v48, %v3134_v9 }
 0x728   : > { %v4395_v5 = vpop.eup %4394 }
 0x729   : > { %v3009_v59 = vmul.f32 %v4395_v5, %v3007_v23  ;;  %v3122_v6 = vpop.f32.mrf.mxu2  ;;  %vm3015_vm5 = vweird.f32 %v4395_v5 }
 0x72a   : > { %vm3016_vm7 = vmor %vm3014_vm6, %vm3015_vm5  ;;  %v3140_v33 = vadd.f32 %v3122_v6, %v3120_v55  ;;  %v6393_v55 = vld [vmem:[#allocation23_spill] sm:$0xff]  ;;  %v6396_v6 = vmax.f32 %v6395_v45, 0.0 }
 0x72b   : > { %v3010_v11 = vmul.f32 %v4395_v5, %v3009_v59 }
 0x72d   : > { %v3011_v25 = vmul.f32 0.5, %v3010_v11 }
 0x72f   : > { %v3012_v26 = vsub.f32 1.5, %v3011_v25  ;;  %v6397_v25 = vld [vmem:[#allocation25_spill] sm:$0xff] }
 0x730   : > { %v6398_v17 = vmax.f32 %v6397_v25, 0.0 }
 0x731   : > { %v3013_v1 = vmul.f32 %v4395_v5, %v3012_v26  ;;  %v3125_v61 = vpop.f32.mrf.mxu2 }
 0x732   : > { %v3141_v20 = vadd.f32 %v3140_v33, %v3125_v61 }
 0x733   : > { %v3017_v56 = vsel %vm3016_vm7, %v4395_v5, %v3013_v1  ;;  %v6394_v5 = vmax.f32 %v6393_v55, 0.0  ;;  %v3137_v1 = vrot.slane %v3136_v19, 1  ;;  %v4332_v55 = vld [vmem:[%s6288_s11 + $0x40] sm:$0xff] }
 0x734   : > { %v3020_v62 = vmul.f32 %v3017_v56, %v3005_v43  ;;  %v3021_v3 = vmul.f32 %v3017_v56, %v3006_v47  ;;  %v3018_v57 = vmul.f32 %v3017_v56, %v3003_v35  ;;  %v3019_v42 = vmul.f32 %v3017_v56, %v3004_v40 }
 0x736   : > { %v3024_v41 = vmul.f32 %v6007_v52, %v3020_v62  ;;  %v3025_v18 = vmul.f32 %v6012_v51, %v3021_v3  ;;  %v3022_v53 = vmul.f32 %v6017_v39, %v3018_v57  ;;  %v3023_v30 = vmul.f32 %v6024_v63, %v3019_v42  ;;  %v4339_v57 = vld [vmem:[%s6288_s11 + $0x78] sm:$0xff] }
 0x737   : > { %v3138_v62 = vadd.f32 %v3137_v1, %v3136_v19  ;;  %v4336_v19 = vld [vmem:[%s6288_s11 + $0x60] sm:$0xff] }
 0x738   : > { %v3028_v8 = vadd.f32 %v6029_v27, %v3024_v41  ;;  %v3029_v36 = vadd.f32 %v6034_v28, %v3025_v18  ;;  %v3026_v34 = vadd.f32 %v6039_v2, %v3022_v53  ;;  %v3027_v22 = vadd.f32 %v6046_v60, %v3023_v30  ;;  %v4338_v53 = vld [vmem:[%s6288_s11 + $0x70] sm:$0xff] }
 0x739   : > { %v3127_v15 = vpop.f32.mrf.mxu2  ;;  %v3139_v48 = vmul.f32 %v3138_v62, %v5259_v0 }
 0x73a   : > { %v3190_v31 = vmax.f32 %v3028_v8, 0.0  ;;  %v3194_v7 = vmax.f32 %v3029_v36, 0.0  ;;  %v3182_v24 = vmax.f32 %v3026_v34, 0.0  ;;  %v3186_v29 = vmax.f32 %v3027_v22, 0.0  ;;  %v4337_v36 = vld [vmem:[%s6288_s11 + $0x68] sm:$0xff] }
 0x73b   : > { %v3142_v23 = vadd.f32 %v3141_v20, %v3127_v15  ;;  %v3150_v33 = vmul.f32 %v3139_v48, %v3139_v48  ;;  %v3269_v20 = vpop.f32.mrf.mxu3  ;;  %v3156_v45 = vsub.f32 %v6090_v10, %v3139_v48 }
 0x73c   : > { %v3206_v49 = vadd.f32 %v3190_v31, %v6392_v12  ;;  %v3210_v59 = vadd.f32 %v3194_v7, %v6394_v5  ;;  %v3198_v11 = vadd.f32 %v3182_v24, %v6396_v6  ;;  %v3202_v26 = vadd.f32 %v3186_v29, %v6398_v17  ;;  %v4334_v31 = vld [vmem:[%s6288_s11 + $0x50] sm:$0xff]  ;;  %v4333_v29 = vld [vmem:[%s6288_s11 + $0x48] sm:$0xff] }
 0x73d   : > { %v3143_v9 = vrot.slane %v3142_v23, 4  ;;  %v3153_v6 = vsub.f32 %v6074_v32, %v3139_v48 }
 0x73e   : > { %v3222_v61 = vmax.f32 %v3206_v49, 0.0  ;;  %v3226_v43 = vmax.f32 %v3210_v59, 0.0  ;;  %v3214_v40 = vmax.f32 %v3198_v11, 0.0  ;;  %v3218_v56 = vmax.f32 %v3202_v26, 0.0 }
 0x73f   : > { %v3144_v47 = vadd.f32 %v3143_v9, %v3142_v23  ;;  %v3155_v59 = vsub.f32 %v6088_v16, %v3139_v48  ;;  %v3154_v11 = vsub.f32 %v6076_v44, %v3139_v48  ;;  %v4354_v48 = vld [vmem:[%s6288_s11 + $0xf0] sm:$0xff] }
 0x740   : > { %v3236_v35 = vpack.c.bf16 %v3226_v43, %v3222_v61  ;;  %v3232_v42 = vpack.c.bf16 %v3218_v56, %v3214_v40 }
 0x741   : > { %v3145_v14 = vrot.slane %v3144_v47, 2 }
 0x742   : > { %3280 = vmatpush.bf16.msra.mxu0 %v3236_v35 }
 0x743   : > { %v3146_v3 = vadd.f32 %v3145_v14, %v3144_v47  ;;  %v3271_v49 = vpop.f32.mrf.mxu3 }
 0x744   : > { %v3303_v17 = vpack.c.bf16 %v3271_v49, %v3269_v20 }
 0x745   : > { %v3147_v41 = vrot.slane %v3146_v3, 1 }
 0x746   : > { %3281 = vmatpush.bf16.msra.mxu0 %v3232_v42 }
 0x747   : > { %v3148_v18 = vadd.f32 %v3147_v41, %v3146_v3 }
 0x749   : > { %v3149_v30 = vmul.f32 %v3148_v18, %v5259_v0  ;;  %4119 = vmatmul.msk.bf16.vlgmr.msra.gmra.mxu0 %vm1049_vm0, %v6078_v38  ;;  %v4335_v0 = vld [vmem:[%s6288_s11 + $0x58] sm:$0xff]  ;;  %v4353_v18 = vld [vmem:[%s6288_s11 + $0xe8] sm:$0xff] }
 0x74a   : > { %3588 = vmatpush.bf16.msrb.mxu0 %v4339_v57 }
 0x74b   : > { %v3151_v8 = vsub.f32 %v3149_v30, %v3150_v33  ;;  %v4351_v33 = vld [vmem:[%s6288_s11 + $0xd8] sm:$0xff] }
 0x74d   : > { %v3152_v34 = vmax.f32 %v3151_v8, 0.0 }
 0x74e   : > { %3589 = vmatpush.bf16.msrb.mxu0 %v4338_v53  ;;  %v4352_v53 = vld [vmem:[%s6288_s11 + $0xe0] sm:$0xff] }
 0x74f   : > { %v3157_v22 = vadd.f32 1e-05, %v3152_v34  ;;  %v4349_v34 = vld [vmem:[%s6288_s11 + $0xc8] sm:$0xff] }
 0x751   : > { %4396 = vrsqrt.f32 %v3157_v22  ;;  %vm3164_vm9 = vweird.f32 %v3157_v22 }
 0x752   : > { %3590 = vmatpush.bf16.msrb.mxu0 %v4337_v36  ;;  %v4350_v36 = vld [vmem:[%s6288_s11 + $0xd0] sm:$0xff] }
 0x756   : > { %3591 = vmatpush.bf16.msrb.mxu0 %v4336_v19 }
 0x757   : > { %v4397_v15 = vpop.eup %4396 }
 0x758   : > { %v3159_v7 = vmul.f32 %v4397_v15, %v3157_v22  ;;  %vm3165_vm8 = vweird.f32 %v4397_v15  ;;  %v4348_v22 = vld [vmem:[%s6288_s11 + $0xc0] sm:$0xff] }
 0x759   : > { %vm3166_vm10 = vmor %vm3164_vm9, %vm3165_vm8 }
 0x75a   : > { %3592 = vmatpush.bf16.msrb.mxu0 %v4335_v0  ;;  %v3160_v24 = vmul.f32 %v4397_v15, %v3159_v7  ;;  %v3375_v7 = vpop.permute.xlu1 %3374 }
 0x75c   : > { %v3161_v23 = vmul.f32 0.5, %v3160_v24 }
 0x75e   : > { %3593 = vmatpush.bf16.msrb.mxu0 %v4334_v31  ;;  %v3162_v12 = vsub.f32 1.5, %v3161_v23 }
 0x760   : > { %v3163_v5 = vmul.f32 %v4397_v15, %v3162_v12 }
 0x762   : > { %3594 = vmatpush.bf16.msrb.mxu0 %v4333_v29  ;;  %v3167_v25 = vsel %vm3166_vm10, %v4397_v15, %v3163_v5 }
 0x763   : > { %v3170_v26 = vmul.f32 %v3167_v25, %v3155_v59  ;;  %v3171_v1 = vmul.f32 %v3167_v25, %v3156_v45  ;;  %v3168_v9 = vmul.f32 %v3167_v25, %v3153_v6  ;;  %v3169_v61 = vmul.f32 %v3167_v25, %v3154_v11  ;;  %v3380_v59 = vpop.permute.xlu2 %3379 }
 0x765   : > { %v3174_v43 = vmul.f32 %v6007_v52, %v3170_v26  ;;  %v3175_v47 = vmul.f32 %v6012_v51, %v3171_v1  ;;  %v3172_v35 = vmul.f32 %v6017_v39, %v3168_v9  ;;  %v3173_v16 = vmul.f32 %v6024_v63, %v3169_v61 }
 0x766   : > { %3595 = vmatpush.bf16.msrb.mxu0 %v4332_v55 }
 0x767   : > { %v3178_v32 = vadd.f32 %v6029_v27, %v3174_v43  ;;  %v3179_v44 = vadd.f32 %v6034_v28, %v3175_v47  ;;  %v3176_v10 = vadd.f32 %v6039_v2, %v3172_v35  ;;  %v3177_v40 = vadd.f32 %v6046_v60, %v3173_v16 }
 0x769   : > { %3596 = vmatmul.bf16.vlgmr.msrb.gmra.mxu0 %v3303_v17  ;;  %v3191_v56 = vmax.f32 %v3178_v32, 0.0  ;;  %v3195_v62 = vmax.f32 %v3179_v44, 0.0  ;;  %v3183_v14 = vmax.f32 %v3176_v10, 0.0  ;;  %v3187_v3 = vmax.f32 %v3177_v40, 0.0 }
 0x76b   : > { %v3207_v52 = vadd.f32 %v3191_v56, %v2074_v21  ;;  %v3211_v51 = vadd.f32 %v3195_v62, %v2078_v13  ;;  %v3199_v39 = vadd.f32 %v3183_v14, %v2066_v4  ;;  %v3203_v63 = vadd.f32 %v3187_v3, %v2070_v37  ;;  %v4343_v21 = vld [vmem:[%s6288_s11 + $0x98] sm:$0xff]  ;;  %v4342_v13 = vld [vmem:[%s6288_s11 + $0x90] sm:$0xff]  ;;  %v4341_v4 = vld [vmem:[%s6288_s11 + $0x88] sm:$0xff] }
 0x76c   : > { %v4340_v37 = vld [vmem:[%s6288_s11 + $0x80] sm:$0xff] }
 0x76d   : > { %v3223_v27 = vmax.f32 %v3207_v52, 0.0  ;;  %v3227_v28 = vmax.f32 %v3211_v51, 0.0  ;;  %v3215_v60 = vmax.f32 %v3199_v39, 0.0  ;;  %v3219_v57 = vmax.f32 %v3203_v63, 0.0 }
 0x76f   : > { %v3237_v2 = vpack.c.bf16 %v3227_v28, %v3223_v27  ;;  %v3233_v42 = vpack.c.bf16 %v3219_v57, %v3215_v60 }
 0x771   : > { %3294 = vmatpush.bf16.msra.mxu1 %v3237_v2 }
 0x775   : > { %3295 = vmatpush.bf16.msra.mxu1 %v3233_v42 }
 0x778   : > { %4120 = vmatmul.msk.bf16.vlgmr.msra.gmra.mxu1 %vm1049_vm0, %v6078_v38  ;;  %v4355_v38 = vld [vmem:[%s6288_s11 + $0xf8] sm:$0xff] }
 0x779   : > { %3602 = vmatpush.bf16.msrb.mxu1 %v4347_v58  ;;  %3616 = vmatpush.bf16.msrb.mxu2 %v4355_v38 }
 0x77d   : > { %3603 = vmatpush.bf16.msrb.mxu1 %v4346_v54  ;;  %3617 = vmatpush.bf16.msrb.mxu2 %v4354_v48 }
 0x781   : > { %3604 = vmatpush.bf16.msrb.mxu1 %v4345_v46  ;;  %3618 = vmatpush.bf16.msrb.mxu2 %v4353_v18 }
 0x785   : > { %3605 = vmatpush.bf16.msrb.mxu1 %v4344_v50  ;;  %3619 = vmatpush.bf16.msrb.mxu2 %v4352_v53 }
 0x789   : > { %3606 = vmatpush.bf16.msrb.mxu1 %v4343_v21  ;;  %3620 = vmatpush.bf16.msrb.mxu2 %v4351_v33 }
 0x78d   : > { %3607 = vmatpush.bf16.msrb.mxu1 %v4342_v13  ;;  %3621 = vmatpush.bf16.msrb.mxu2 %v4350_v36 }
 0x790   : > { %v3583_v15 = vpop.f32.mrf.mxu3 }
 0x791   : > { %3608 = vmatpush.bf16.msrb.mxu1 %v4341_v4  ;;  %3622 = vmatpush.bf16.msrb.mxu2 %v4349_v34  ;;  %v3584_v29 = vadd.f32 %v3583_v15, %v3375_v7 }
 0x795   : > { %3609 = vmatpush.bf16.msrb.mxu1 %v4340_v37  ;;  %3623 = vmatpush.bf16.msrb.mxu2 %v4348_v22 }
 0x798   : > { %v3585_v49 = vpop.f32.mrf.mxu3 }
 0x799   : > { %v3586_v6 = vadd.f32 %v3585_v49, %v3380_v59 }
 0x7c6   : > { %v3283_v41 = vpop.f32.mrf.mxu0 }
 0x7ce   : > { %v3285_v30 = vpop.f32.mrf.mxu0 }
 0x7cf   : > { %v3304_v8 = vpack.c.bf16 %v3285_v30, %v3283_v41 }
 0x7d1   : > { %3610 = vmatmul.bf16.vlgmr.msrb.gmra.mxu1 %v3304_v8 }
 0x7e6   : > { %v3597_v31 = vpop.f32.mrf.mxu0 }
 0x7e7   : > { %v3598_v23 = vadd.f32 %v3597_v31, %v3584_v29 }
 0x7ee   : > { %v3599_v45 = vpop.f32.mrf.mxu0 }
 0x7ef   : > { %v3600_v25 = vadd.f32 %v3599_v45, %v3586_v6 }
 0x7f5   : > { %v3297_v19 = vpop.f32.mrf.mxu1 }
 0x7fd   : > { %v3299_v0 = vpop.f32.mrf.mxu1 }
 0x7fe   : > { %v3305_v20 = vpack.c.bf16 %v3299_v0, %v3297_v19 }
 0x800   : > { %3624 = vmatmul.bf16.vlgmr.msrb.gmra.mxu2 %v3305_v20 }
 0x84e   : > { %v3611_v24 = vpop.f32.mrf.mxu1 }
 0x84f   : > { %v3612_v12 = vadd.f32 %v3611_v24, %v3598_v23 }
 0x856   : > { %v3613_v11 = vpop.f32.mrf.mxu1 }
 0x857   : > { %v3614_v17 = vadd.f32 %v3613_v11, %v3600_v25 }
 0x883   : > { %v3625_v55 = vpop.f32.mrf.mxu2 }
 0x884   : > { %v3626_v5 = vadd.f32 %v3625_v55, %v3612_v12 }
 0x886   : > { %3630 = vst.msk [vmem:[%s467_s18] sm:$0xff] %vm1049_vm0, %v3626_v5 }
 0x88b   : > { %v3627_v26 = vpop.f32.mrf.mxu2 }
 0x88c   : > { %v3628_v1 = vadd.f32 %v3627_v26, %v3614_v17 }
 0x88e   : > { %3632 = vst.msk [vmem:[%s467_s18 + $0x8] sm:$0x3] %vm3631_vm11, %v3628_v1 }
 0x88f PF: > { %s24_s29 = sadd.s32 1, %s4420_s29  }
 0x890   : > { %p21_p4 = scmp.ge.s32.totalorder %s24_s29, 4  }
 0x892   :  { %23 = sbr.rel (!%p21_p4) target bundleno = 1 (0x1), region = 115 }

</bundles_post_ra>
